<compile_context>
chip_gen: v7x
topology: tpu7x:2x2x1
jax: 0.10.0
libtpu: 0.0.40
codegen_flags: <defaults>
</compile_context>

<pallas_src>
import functools

import jax
import jax.numpy as jnp
import numpy as np
from jax import lax
from jax.experimental import pallas as pl


def _mm_t(a, w):
    # a: (m, k), w: (n, k)  ->  (m, n)  ==  a @ w.T   (PyTorch nn.Linear convention)
    return lax.dot_general(a, w, (((1,), (1,)), ((), ())),
                           preferred_element_type=jnp.float32)


def _mm(a, w):
    # a: (m, k), w: (k, n)  ->  (m, n)
    return lax.dot_general(a, w, (((1,), (0,)), ((), ())),
                           preferred_element_type=jnp.float32)


def _layer_norm(y, g, b, eps=1e-5):
    mean = jnp.mean(y, axis=-1, keepdims=True)
    c = y - mean
    var = jnp.mean(c * c, axis=-1, keepdims=True)
    return c * lax.rsqrt(var + eps) * g + b


def _attention(q, k, v, wout, bout, nhead, scale):
    # q: (B, Q, E), k/v: (B, S, E).  Per-head 3-D einsums (single batch dim:
    # the known-good Mosaic dot_general lowering), heads concatenated once and
    # a single out-projection matmul applied.
    # TODO(synk): a head-batched 4-D einsum would avoid the lane concatenate,
    # but multi-batch-dim dot_general lowering is not guaranteed on Mosaic.
    B, Q, E = q.shape
    Dh = E // nhead
    heads = []
    for h in range(nhead):
        sl = slice(h * Dh, (h + 1) * Dh)
        s = jnp.einsum('bqd,bkd->bqk', q[..., sl] * scale, k[..., sl],
                       preferred_element_type=jnp.float32)     # (B, Q, S)
        s = s - jnp.max(s, axis=-1, keepdims=True)
        p = jnp.exp(s)
        p = p / jnp.sum(p, axis=-1, keepdims=True)             # exact divide
        heads.append(jnp.einsum('bqk,bkd->bqd', p, v[..., sl],
                                preferred_element_type=jnp.float32))
    attn = jnp.concatenate(heads, axis=-1).reshape(B * Q, E)
    return _mm_t(attn, wout) + bout                            # (B*Q, E)


def transformer_netconf_kernel(x_ref, big_w_ref, small_p_ref, head_p_ref, out_ref,
                               *, num_layers, nhead, hidden_dim, half_dim, out_dim):
    B, S, E = x_ref.shape
    H = hidden_dim
    Dh = E // nhead
    scale = 1.0 / float(np.sqrt(Dh))

    # Fold batch into the matmul M dimension: (B, S, E) -> (B*S, E).
    x2 = x_ref[...].astype(jnp.float32).reshape(B * S, E)
    x_last = None

    for l in range(num_layers):
        is_last = (l == num_layers - 1)

        bw = big_w_ref[l]                                # (4E + 2H, E)
        wqkv = bw[0:3 * E, :]                            # (3E, E) fused q/k/v
        wout = bw[3 * E:4 * E, :]                        # (E, E)  out-proj
        wl1 = bw[4 * E:4 * E + H, :]                     # (H, E)  linear1
        wl2t = bw[4 * E + H:4 * E + 2 * H, :]            # (H, E)  linear2 (transposed)

        sp = small_p_ref[l]                              # (8, P) biases / norms
        bqkv = sp[0:1, 0:3 * E]
        bout = sp[1:2, 0:E]
        bl1 = sp[2:3, 0:H]
        bl2 = sp[3:4, 0:E]
        n1g, n1b = sp[4:5, 0:E], sp[5:6, 0:E]
        n2g, n2b = sp[6:7, 0:E], sp[7:8, 0:E]

        # ---- fused Q/K/V projection: one matmul, N = 3E ----
        qkv = _mm_t(x2, wqkv) + bqkv                     # (B*S, 3E)
        q = qkv[:, 0 * E:1 * E].reshape(B, S, E)
        k = qkv[:, 1 * E:2 * E].reshape(B, S, E)
        v = qkv[:, 2 * E:3 * E].reshape(B, S, E)

        # TODO(synk): dropout after attention / FFN is identity in eval mode.
        if not is_last:
            attn = _attention(q, k, v, wout, bout, nhead, scale)   # (B*S, E)
            x2 = _layer_norm(x2 + attn, n1g, n1b)
            h1 = jnp.maximum(_mm_t(x2, wl1) + bl1, 0.0)
            ff = _mm(h1, wl2t) + bl2
            x2 = _layer_norm(x2 + ff, n2g, n2b)
        else:
            # Only x[:, -1, :] feeds the head: restrict the last layer's query,
            # out-projection, norms and FFN to the final token.
            q_last = q[:, S - 1:S, :]                               # (B, 1, E)
            attn = _attention(q_last, k, v, wout, bout, nhead, scale)  # (B, E)
            xl = x2.reshape(B, S, E)[:, S - 1, :]                   # (B, E)
            y = _layer_norm(xl + attn, n1g, n1b)
            h1 = jnp.maximum(_mm_t(y, wl1) + bl1, 0.0)
            ff = _mm(h1, wl2t) + bl2
            x_last = _layer_norm(y + ff, n2g, n2b)                  # (B, E)

    # ---- head MLP fc2 -> fc3 -> fc4, fused into the same kernel ----
    hp = head_p_ref[...]
    half, O = half_dim, out_dim
    fc2_w = hp[0:half, 0:E]
    fc3_w = hp[half:half + 5, 0:half]
    fc4_w = hp[half + 5:half + 5 + O, 0:5]
    r = half + 5 + O
    fc2_b = hp[r:r + 1, 0:half]
    fc3_b = hp[r + 1:r + 2, 0:5]
    fc4_b = hp[r + 2:r + 3, 0:O]

    h2 = _mm_t(x_last, fc2_w) + fc2_b                    # (B, half)
    h3 = _mm_t(h2, fc3_w) + fc3_b                        # (B, 5)
    out_ref[...] = _mm_t(h3, fc4_w) + fc4_b              # (B, O)


def pack_params(params):
    # Consolidate the many small per-layer arrays into three packed slabs
    # (fewer pallas_call inputs -> fewer DMA descriptors / buffers).
    L, _, E = params['wq'].shape
    H = params['lin1_w'].shape[1]
    half = params['fc2_w'].shape[0]
    O = params['fc4_w'].shape[0]

    big_w = jnp.concatenate([
        jnp.concatenate([params['wq'], params['wk'], params['wv']], axis=1),  # (L, 3E, E)
        params['outproj_w'],                                                  # (L, E, E)
        params['lin1_w'],                                                     # (L, H, E)
        jnp.transpose(params['lin2_w'], (0, 2, 1)),                           # (L, H, E)
    ], axis=1)                                                                # (L, 4E+2H, E)

    P = max(3 * E, H)

    def lrow(a):
        return jnp.pad(a, ((0, 0), (0, 0), (0, P - a.shape[-1])))

    small_p = jnp.concatenate([
        lrow(jnp.concatenate([params['bq'], params['bk'], params['bv']], axis=-1)),
        lrow(params['outproj_b']),
        lrow(params['lin1_b']),
        lrow(params['lin2_b']),
        lrow(params['norm1_g']), lrow(params['norm1_b']),
        lrow(params['norm2_g']), lrow(params['norm2_b']),
    ], axis=1)                                                                # (L, 8, P)

    Pc = max(E, half, 5, O)

    def hrow(a):
        return jnp.pad(a, ((0, 0), (0, Pc - a.shape[-1])))

    head_p = jnp.concatenate([
        hrow(params['fc2_w']), hrow(params['fc3_w']), hrow(params['fc4_w']),
        hrow(params['fc2_b']), hrow(params['fc3_b']), hrow(params['fc4_b']),
    ], axis=0)                                                                # (half+5+O+3, Pc)

    return big_w, small_p, head_p, dict(L=L, H=H, half=half, O=O)


def transformer_netconf_forward(x, params, *, nhead):
    B, S, E = x.shape
    big_w, small_p, head_p, dims = pack_params(params)

    kernel = functools.partial(
        transformer_netconf_kernel,
        num_layers=dims['L'], nhead=nhead, hidden_dim=dims['H'],
        half_dim=dims['half'], out_dim=dims['O'])

    # Single invocation, no grid: everything (activations + packed params) is
    # tiny and fits VMEM; one launch, one set of DMAs, whole output emitted.
    return pl.pallas_call(
        kernel,
        out_shape=jax.ShapeDtypeStruct((B, dims['O']), jnp.float32),
    )(x, big_w, small_p, head_p)


def select_nhead(input_size):
    if input_size % 5 == 0:
        return 5
    elif input_size % 3 == 0:
        return 3
    elif input_size % 2 == 0:
        return 2
    return 1


def init_params(key, input_size, hidden_dim, output_size, num_layers=2):
    E, H, O = input_size, hidden_dim, output_size
    half = int(E / 2)
    keys = iter(jax.random.split(key, 40))

    def w(shape, scale=0.1):
        return scale * jax.random.normal(next(keys), shape, jnp.float32)

    return {
        # self-attention in-projection (PyTorch in_proj_weight split into q/k/v)
        'wq': w((num_layers, E, E)), 'wk': w((num_layers, E, E)),
        'wv': w((num_layers, E, E)),
        'bq': w((num_layers, 1, E)), 'bk': w((num_layers, 1, E)),
        'bv': w((num_layers, 1, E)),
        'outproj_w': w((num_layers, E, E)), 'outproj_b': w((num_layers, 1, E)),
        # feed-forward
        'lin1_w': w((num_layers, H, E)), 'lin1_b': w((num_layers, 1, H)),
        'lin2_w': w((num_layers, E, H)), 'lin2_b': w((num_layers, 1, E)),
        # layer norms
        'norm1_g': jnp.ones((num_layers, 1, E), jnp.float32),
        'norm1_b': jnp.zeros((num_layers, 1, E), jnp.float32),
        'norm2_g': jnp.ones((num_layers, 1, E), jnp.float32),
        'norm2_b': jnp.zeros((num_layers, 1, E), jnp.float32),
        # head MLP
        'fc2_w': w((half, E)), 'fc2_b': w((1, half)),
        'fc3_w': w((5, half)), 'fc3_b': w((1, 5)),
        'fc4_w': w((O, 5)), 'fc4_b': w((1, O)),
    }


def reference_forward(x, p, nhead):
    # Pure-JAX reference mirroring the PyTorch forward semantics.
    B, S, E = x.shape
    L = p['wq'].shape[0]
    Dh = E // nhead
    scale = 1.0 / float(np.sqrt(Dh))

    def ln(y, g, b, eps=1e-5):
        m = jnp.mean(y, -1, keepdims=True)
        v = jnp.mean((y - m) ** 2, -1, keepdims=True)
        return (y - m) / jnp.sqrt(v + eps) * g + b

    for l in range(L):
        q = x @ p['wq'][l].T + p['bq'][l]
        k = x @ p['wk'][l].T + p['bk'][l]
        v = x @ p['wv'][l].T + p['bv'][l]
        qh = q.reshape(B, S, nhead, Dh).transpose(0, 2, 1, 3)
        kh = k.reshape(B, S, nhead, Dh).transpose(0, 2, 1, 3)
        vh = v.reshape(B, S, nhead, Dh).transpose(0, 2, 1, 3)
        s = jnp.einsum('bhqd,bhkd->bhqk', qh * scale, kh)
        pa = jax.nn.softmax(s, axis=-1)
        o = jnp.einsum('bhqk,bhkd->bhqd', pa, vh)
        o = o.transpose(0, 2, 1, 3).reshape(B, S, E)
        o = o @ p['outproj_w'][l].T + p['outproj_b'][l]
        x = ln(x + o, p['norm1_g'][l], p['norm1_b'][l])
        h1 = jax.nn.relu(x @ p['lin1_w'][l].T + p['lin1_b'][l])
        ff = h1 @ p['lin2_w'][l].T + p['lin2_b'][l]
        x = ln(x + ff, p['norm2_g'][l], p['norm2_b'][l])
    xl = x[:, -1, :]
    h2 = xl @ p['fc2_w'].T + p['fc2_b']
    h3 = h2 @ p['fc3_w'].T + p['fc3_b']
    return h3 @ p['fc4_w'].T + p['fc4_b']


if __name__ == "__main__":
    input_size, hidden_dim, output_size = 16, 32, 2
    seq_len, batch = 8, 16
    nhead = select_nhead(input_size)   # 16 % 2 == 0 -> nhead = 2

    key = jax.random.PRNGKey(0)
    kx, kp = jax.random.split(key)
    x = jax.random.normal(kx, (batch, seq_len, input_size), jnp.float32)
    params = init_params(kp, input_size, hidden_dim, output_size, num_layers=2)

    y = transformer_netconf_forward(x, params, nhead=nhead)
    y = jax.block_until_ready(y)
    assert y.shape == (batch, output_size)

    y_ref = reference_forward(x, params, nhead)
    np.testing.assert_allclose(np.asarray(y), np.asarray(y_ref),
                               rtol=1e-4, atol=1e-4)
    print("KERNEL_OK")
</pallas_src>

<mosaic_0001>
module attributes {stable_mosaic.version = 11 : i64} {
  func.func @transformer_netconf_kernel(%arg0: memref<16x8x16xf32, #tpu.memory_space<vmem>>, %arg1: memref<2x128x16xf32, #tpu.memory_space<vmem>>, %arg2: memref<2x8x48xf32, #tpu.memory_space<vmem>>, %arg3: memref<18x16xf32, #tpu.memory_space<vmem>>, %arg4: memref<16x2xf32, #tpu.memory_space<vmem>>) attributes {dimension_semantics = [], scalar_prefetch = 0 : i64, scratch_operands = 0 : i64, tpu.core_type = #tpu.core_type<tc>} {
    %c0 = arith.constant 0 : index
    %c0_0 = arith.constant 0 : index
    %c0_1 = arith.constant 0 : index
    %0 = vector.load %arg0[%c0, %c0_0, %c0_1] : memref<16x8x16xf32, #tpu.memory_space<vmem>>, vector<16x8x16xf32>
    %1 = vector.shape_cast %0 : vector<16x8x16xf32> to vector<128x16xf32>
    %c0_2 = arith.constant 0 : index
    %c0_3 = arith.constant 0 : index
    %c0_4 = arith.constant 0 : index
    %2 = vector.load %arg1[%c0_2, %c0_3, %c0_4] : memref<2x128x16xf32, #tpu.memory_space<vmem>>, vector<1x128x16xf32>
    %3 = vector.shape_cast %2 : vector<1x128x16xf32> to vector<128x16xf32>
    %4 = vector.extract_strided_slice %3 {offsets = [0, 0], sizes = [48, 16], strides = [1, 1]} : vector<128x16xf32> to vector<48x16xf32>
    %5 = vector.extract_strided_slice %3 {offsets = [48, 0], sizes = [16, 16], strides = [1, 1]} : vector<128x16xf32> to vector<16x16xf32>
    %6 = vector.extract_strided_slice %3 {offsets = [64, 0], sizes = [32, 16], strides = [1, 1]} : vector<128x16xf32> to vector<32x16xf32>
    %7 = vector.extract_strided_slice %3 {offsets = [96, 0], sizes = [32, 16], strides = [1, 1]} : vector<128x16xf32> to vector<32x16xf32>
    %c0_5 = arith.constant 0 : index
    %c0_6 = arith.constant 0 : index
    %c0_7 = arith.constant 0 : index
    %8 = vector.load %arg2[%c0_5, %c0_6, %c0_7] : memref<2x8x48xf32, #tpu.memory_space<vmem>>, vector<1x8x48xf32>
    %9 = vector.shape_cast %8 : vector<1x8x48xf32> to vector<8x48xf32>
    %10 = vector.extract_strided_slice %9 {offsets = [0, 0], sizes = [1, 48], strides = [1, 1]} : vector<8x48xf32> to vector<1x48xf32>
    %11 = vector.extract_strided_slice %9 {offsets = [1, 0], sizes = [1, 16], strides = [1, 1]} : vector<8x48xf32> to vector<1x16xf32>
    %12 = vector.extract_strided_slice %9 {offsets = [2, 0], sizes = [1, 32], strides = [1, 1]} : vector<8x48xf32> to vector<1x32xf32>
    %13 = vector.extract_strided_slice %9 {offsets = [3, 0], sizes = [1, 16], strides = [1, 1]} : vector<8x48xf32> to vector<1x16xf32>
    %14 = vector.extract_strided_slice %9 {offsets = [4, 0], sizes = [1, 16], strides = [1, 1]} : vector<8x48xf32> to vector<1x16xf32>
    %15 = vector.extract_strided_slice %9 {offsets = [5, 0], sizes = [1, 16], strides = [1, 1]} : vector<8x48xf32> to vector<1x16xf32>
    %16 = vector.extract_strided_slice %9 {offsets = [6, 0], sizes = [1, 16], strides = [1, 1]} : vector<8x48xf32> to vector<1x16xf32>
    %17 = vector.extract_strided_slice %9 {offsets = [7, 0], sizes = [1, 16], strides = [1, 1]} : vector<8x48xf32> to vector<1x16xf32>
    %cst = arith.constant dense<0.000000e+00> : vector<128x48xf32>
    %18 = tpu.matmul %1, %4, %cst {dimension_numbers = #tpu.dot_dimension_numbers<[1], [1], [0], [0], [0, 0, 1, 0], [], []>} : vector<128x16xf32>, vector<48x16xf32>, vector<128x48xf32> -> vector<128x48xf32>
    %19 = vector.broadcast %10 : vector<1x48xf32> to vector<128x48xf32>
    %20 = arith.addf %18, %19 : vector<128x48xf32>
    %21 = vector.extract_strided_slice %20 {offsets = [0, 0], sizes = [128, 16], strides = [1, 1]} : vector<128x48xf32> to vector<128x16xf32>
    %22 = vector.shape_cast %21 : vector<128x16xf32> to vector<16x8x16xf32>
    %23 = vector.extract_strided_slice %20 {offsets = [0, 16], sizes = [128, 16], strides = [1, 1]} : vector<128x48xf32> to vector<128x16xf32>
    %24 = vector.shape_cast %23 : vector<128x16xf32> to vector<16x8x16xf32>
    %25 = vector.extract_strided_slice %20 {offsets = [0, 32], sizes = [128, 16], strides = [1, 1]} : vector<128x48xf32> to vector<128x16xf32>
    %26 = vector.shape_cast %25 : vector<128x16xf32> to vector<16x8x16xf32>
    %27 = vector.extract_strided_slice %22 {offsets = [0, 0, 0], sizes = [16, 8, 8], strides = [1, 1, 1]} : vector<16x8x16xf32> to vector<16x8x8xf32>
    %cst_8 = arith.constant 0.353553385 : f32
    %28 = vector.broadcast %cst_8 : f32 to vector<16x8x8xf32>
    %29 = arith.mulf %27, %28 : vector<16x8x8xf32>
    %30 = vector.extract_strided_slice %24 {offsets = [0, 0, 0], sizes = [16, 8, 8], strides = [1, 1, 1]} : vector<16x8x16xf32> to vector<16x8x8xf32>
    "tpu.trace_start"() <{level = 10 : i32, message = "bqd,bkd->bqk"}> : () -> ()
    %cst_9 = arith.constant dense<0.000000e+00> : vector<16x8x8xf32>
    %31 = tpu.matmul %29, %30, %cst_9 {dimension_numbers = #tpu.dot_dimension_numbers<[2], [2], [1], [1], [0, 0, 0, 1, 1, 1], [0], [0]>} : vector<16x8x8xf32>, vector<16x8x8xf32>, vector<16x8x8xf32> -> vector<16x8x8xf32>
    "tpu.trace_stop"() : () -> ()
    %cst_10 = arith.constant dense<0xFF800000> : vector<16x8xf32>
    %32 = vector.multi_reduction <maximumf>, %31, %cst_10 [2] : vector<16x8x8xf32> to vector<16x8xf32>
    %33 = vector.shape_cast %32 : vector<16x8xf32> to vector<16x8x1xf32>
    %34 = vector.broadcast %33 : vector<16x8x1xf32> to vector<16x8x8xf32>
    %35 = arith.subf %31, %34 : vector<16x8x8xf32>
    %36 = math.exp %35 : vector<16x8x8xf32>
    %cst_11 = arith.constant dense<0.000000e+00> : vector<16x8xf32>
    %37 = vector.multi_reduction <add>, %36, %cst_11 [2] : vector<16x8x8xf32> to vector<16x8xf32>
    %38 = vector.shape_cast %37 : vector<16x8xf32> to vector<16x8x1xf32>
    %39 = vector.broadcast %38 : vector<16x8x1xf32> to vector<16x8x8xf32>
    %40 = arith.divf %36, %39 : vector<16x8x8xf32>
    %41 = vector.extract_strided_slice %26 {offsets = [0, 0, 0], sizes = [16, 8, 8], strides = [1, 1, 1]} : vector<16x8x16xf32> to vector<16x8x8xf32>
    "tpu.trace_start"() <{level = 10 : i32, message = "bqk,bkd->bqd"}> : () -> ()
    %cst_12 = arith.constant dense<0.000000e+00> : vector<16x8x8xf32>
    %42 = tpu.matmul %40, %41, %cst_12 {dimension_numbers = #tpu.dot_dimension_numbers<[2], [1], [1], [2], [0, 0, 0, 1, 1, 2], [0], [0]>} : vector<16x8x8xf32>, vector<16x8x8xf32>, vector<16x8x8xf32> -> vector<16x8x8xf32>
    "tpu.trace_stop"() : () -> ()
    %43 = vector.extract_strided_slice %22 {offsets = [0, 0, 8], sizes = [16, 8, 8], strides = [1, 1, 1]} : vector<16x8x16xf32> to vector<16x8x8xf32>
    %cst_13 = arith.constant 0.353553385 : f32
    %44 = vector.broadcast %cst_13 : f32 to vector<16x8x8xf32>
    %45 = arith.mulf %43, %44 : vector<16x8x8xf32>
    %46 = vector.extract_strided_slice %24 {offsets = [0, 0, 8], sizes = [16, 8, 8], strides = [1, 1, 1]} : vector<16x8x16xf32> to vector<16x8x8xf32>
    "tpu.trace_start"() <{level = 10 : i32, message = "bqd,bkd->bqk"}> : () -> ()
    %cst_14 = arith.constant dense<0.000000e+00> : vector<16x8x8xf32>
    %47 = tpu.matmul %45, %46, %cst_14 {dimension_numbers = #tpu.dot_dimension_numbers<[2], [2], [1], [1], [0, 0, 0, 1, 1, 1], [0], [0]>} : vector<16x8x8xf32>, vector<16x8x8xf32>, vector<16x8x8xf32> -> vector<16x8x8xf32>
    "tpu.trace_stop"() : () -> ()
    %cst_15 = arith.constant dense<0xFF800000> : vector<16x8xf32>
    %48 = vector.multi_reduction <maximumf>, %47, %cst_15 [2] : vector<16x8x8xf32> to vector<16x8xf32>
    %49 = vector.shape_cast %48 : vector<16x8xf32> to vector<16x8x1xf32>
    %50 = vector.broadcast %49 : vector<16x8x1xf32> to vector<16x8x8xf32>
    %51 = arith.subf %47, %50 : vector<16x8x8xf32>
    %52 = math.exp %51 : vector<16x8x8xf32>
    %cst_16 = arith.constant dense<0.000000e+00> : vector<16x8xf32>
    %53 = vector.multi_reduction <add>, %52, %cst_16 [2] : vector<16x8x8xf32> to vector<16x8xf32>
    %54 = vector.shape_cast %53 : vector<16x8xf32> to vector<16x8x1xf32>
    %55 = vector.broadcast %54 : vector<16x8x1xf32> to vector<16x8x8xf32>
    %56 = arith.divf %52, %55 : vector<16x8x8xf32>
    %57 = vector.extract_strided_slice %26 {offsets = [0, 0, 8], sizes = [16, 8, 8], strides = [1, 1, 1]} : vector<16x8x16xf32> to vector<16x8x8xf32>
    "tpu.trace_start"() <{level = 10 : i32, message = "bqk,bkd->bqd"}> : () -> ()
    %cst_17 = arith.constant dense<0.000000e+00> : vector<16x8x8xf32>
    %58 = tpu.matmul %56, %57, %cst_17 {dimension_numbers = #tpu.dot_dimension_numbers<[2], [1], [1], [2], [0, 0, 0, 1, 1, 2], [0], [0]>} : vector<16x8x8xf32>, vector<16x8x8xf32>, vector<16x8x8xf32> -> vector<16x8x8xf32>
    "tpu.trace_stop"() : () -> ()
    %59 = tpu.concatenate %42, %58 in 2 : vector<16x8x8xf32>, vector<16x8x8xf32> -> vector<16x8x16xf32>
    %60 = vector.shape_cast %59 : vector<16x8x16xf32> to vector<128x16xf32>
    %cst_18 = arith.constant dense<0.000000e+00> : vector<128x16xf32>
    %61 = tpu.matmul %60, %5, %cst_18 {dimension_numbers = #tpu.dot_dimension_numbers<[1], [1], [0], [0], [0, 0, 1, 0], [], []>} : vector<128x16xf32>, vector<16x16xf32>, vector<128x16xf32> -> vector<128x16xf32>
    %62 = vector.broadcast %11 : vector<1x16xf32> to vector<128x16xf32>
    %63 = arith.addf %61, %62 : vector<128x16xf32>
    %64 = arith.addf %1, %63 : vector<128x16xf32>
    %cst_19 = arith.constant dense<0.000000e+00> : vector<128xf32>
    %65 = vector.multi_reduction <add>, %64, %cst_19 [1] : vector<128x16xf32> to vector<128xf32>
    %66 = vector.shape_cast %65 : vector<128xf32> to vector<128x1xf32>
    %cst_20 = arith.constant 1.600000e+01 : f32
    %67 = vector.broadcast %cst_20 : f32 to vector<128x1xf32>
    %68 = arith.divf %66, %67 : vector<128x1xf32>
    %69 = vector.broadcast %68 : vector<128x1xf32> to vector<128x16xf32>
    %70 = arith.subf %64, %69 : vector<128x16xf32>
    %71 = arith.mulf %70, %70 : vector<128x16xf32>
    %cst_21 = arith.constant dense<0.000000e+00> : vector<128xf32>
    %72 = vector.multi_reduction <add>, %71, %cst_21 [1] : vector<128x16xf32> to vector<128xf32>
    %73 = vector.shape_cast %72 : vector<128xf32> to vector<128x1xf32>
    %cst_22 = arith.constant 1.600000e+01 : f32
    %74 = vector.broadcast %cst_22 : f32 to vector<128x1xf32>
    %75 = arith.divf %73, %74 : vector<128x1xf32>
    %cst_23 = arith.constant 9.99999974E-6 : f32
    %76 = vector.broadcast %cst_23 : f32 to vector<128x1xf32>
    %77 = arith.addf %75, %76 : vector<128x1xf32>
    %78 = math.rsqrt %77 : vector<128x1xf32>
    %79 = vector.broadcast %78 : vector<128x1xf32> to vector<128x16xf32>
    %80 = arith.mulf %70, %79 : vector<128x16xf32>
    %81 = vector.broadcast %14 : vector<1x16xf32> to vector<128x16xf32>
    %82 = arith.mulf %80, %81 : vector<128x16xf32>
    %83 = vector.broadcast %15 : vector<1x16xf32> to vector<128x16xf32>
    %84 = arith.addf %82, %83 : vector<128x16xf32>
    %cst_24 = arith.constant dense<0.000000e+00> : vector<128x32xf32>
    %85 = tpu.matmul %84, %6, %cst_24 {dimension_numbers = #tpu.dot_dimension_numbers<[1], [1], [0], [0], [0, 0, 1, 0], [], []>} : vector<128x16xf32>, vector<32x16xf32>, vector<128x32xf32> -> vector<128x32xf32>
    %86 = vector.broadcast %12 : vector<1x32xf32> to vector<128x32xf32>
    %87 = arith.addf %85, %86 : vector<128x32xf32>
    %cst_25 = arith.constant 0.000000e+00 : f32
    %88 = vector.broadcast %cst_25 : f32 to vector<128x32xf32>
    %89 = arith.maximumf %87, %88 : vector<128x32xf32>
    %cst_26 = arith.constant dense<0.000000e+00> : vector<128x16xf32>
    %90 = tpu.matmul %89, %7, %cst_26 {dimension_numbers = #tpu.dot_dimension_numbers<[1], [0], [0], [1], [0, 0, 1, 1], [], []>} : vector<128x32xf32>, vector<32x16xf32>, vector<128x16xf32> -> vector<128x16xf32>
    %91 = vector.broadcast %13 : vector<1x16xf32> to vector<128x16xf32>
    %92 = arith.addf %90, %91 : vector<128x16xf32>
    %93 = arith.addf %84, %92 : vector<128x16xf32>
    %cst_27 = arith.constant dense<0.000000e+00> : vector<128xf32>
    %94 = vector.multi_reduction <add>, %93, %cst_27 [1] : vector<128x16xf32> to vector<128xf32>
    %95 = vector.shape_cast %94 : vector<128xf32> to vector<128x1xf32>
    %cst_28 = arith.constant 1.600000e+01 : f32
    %96 = vector.broadcast %cst_28 : f32 to vector<128x1xf32>
    %97 = arith.divf %95, %96 : vector<128x1xf32>
    %98 = vector.broadcast %97 : vector<128x1xf32> to vector<128x16xf32>
    %99 = arith.subf %93, %98 : vector<128x16xf32>
    %100 = arith.mulf %99, %99 : vector<128x16xf32>
    %cst_29 = arith.constant dense<0.000000e+00> : vector<128xf32>
    %101 = vector.multi_reduction <add>, %100, %cst_29 [1] : vector<128x16xf32> to vector<128xf32>
    %102 = vector.shape_cast %101 : vector<128xf32> to vector<128x1xf32>
    %cst_30 = arith.constant 1.600000e+01 : f32
    %103 = vector.broadcast %cst_30 : f32 to vector<128x1xf32>
    %104 = arith.divf %102, %103 : vector<128x1xf32>
    %cst_31 = arith.constant 9.99999974E-6 : f32
    %105 = vector.broadcast %cst_31 : f32 to vector<128x1xf32>
    %106 = arith.addf %104, %105 : vector<128x1xf32>
    %107 = math.rsqrt %106 : vector<128x1xf32>
    %108 = vector.broadcast %107 : vector<128x1xf32> to vector<128x16xf32>
    %109 = arith.mulf %99, %108 : vector<128x16xf32>
    %110 = vector.broadcast %16 : vector<1x16xf32> to vector<128x16xf32>
    %111 = arith.mulf %109, %110 : vector<128x16xf32>
    %112 = vector.broadcast %17 : vector<1x16xf32> to vector<128x16xf32>
    %113 = arith.addf %111, %112 : vector<128x16xf32>
    %c1 = arith.constant 1 : index
    %c0_32 = arith.constant 0 : index
    %c0_33 = arith.constant 0 : index
    %114 = vector.load %arg1[%c1, %c0_32, %c0_33] : memref<2x128x16xf32, #tpu.memory_space<vmem>>, vector<1x128x16xf32>
    %115 = vector.shape_cast %114 : vector<1x128x16xf32> to vector<128x16xf32>
    %116 = vector.extract_strided_slice %115 {offsets = [0, 0], sizes = [48, 16], strides = [1, 1]} : vector<128x16xf32> to vector<48x16xf32>
    %117 = vector.extract_strided_slice %115 {offsets = [48, 0], sizes = [16, 16], strides = [1, 1]} : vector<128x16xf32> to vector<16x16xf32>
    %118 = vector.extract_strided_slice %115 {offsets = [64, 0], sizes = [32, 16], strides = [1, 1]} : vector<128x16xf32> to vector<32x16xf32>
    %119 = vector.extract_strided_slice %115 {offsets = [96, 0], sizes = [32, 16], strides = [1, 1]} : vector<128x16xf32> to vector<32x16xf32>
    %c1_34 = arith.constant 1 : index
    %c0_35 = arith.constant 0 : index
    %c0_36 = arith.constant 0 : index
    %120 = vector.load %arg2[%c1_34, %c0_35, %c0_36] : memref<2x8x48xf32, #tpu.memory_space<vmem>>, vector<1x8x48xf32>
    %121 = vector.shape_cast %120 : vector<1x8x48xf32> to vector<8x48xf32>
    %122 = vector.extract_strided_slice %121 {offsets = [0, 0], sizes = [1, 48], strides = [1, 1]} : vector<8x48xf32> to vector<1x48xf32>
    %123 = vector.extract_strided_slice %121 {offsets = [1, 0], sizes = [1, 16], strides = [1, 1]} : vector<8x48xf32> to vector<1x16xf32>
    %124 = vector.extract_strided_slice %121 {offsets = [2, 0], sizes = [1, 32], strides = [1, 1]} : vector<8x48xf32> to vector<1x32xf32>
    %125 = vector.extract_strided_slice %121 {offsets = [3, 0], sizes = [1, 16], strides = [1, 1]} : vector<8x48xf32> to vector<1x16xf32>
    %126 = vector.extract_strided_slice %121 {offsets = [4, 0], sizes = [1, 16], strides = [1, 1]} : vector<8x48xf32> to vector<1x16xf32>
    %127 = vector.extract_strided_slice %121 {offsets = [5, 0], sizes = [1, 16], strides = [1, 1]} : vector<8x48xf32> to vector<1x16xf32>
    %128 = vector.extract_strided_slice %121 {offsets = [6, 0], sizes = [1, 16], strides = [1, 1]} : vector<8x48xf32> to vector<1x16xf32>
    %129 = vector.extract_strided_slice %121 {offsets = [7, 0], sizes = [1, 16], strides = [1, 1]} : vector<8x48xf32> to vector<1x16xf32>
    %cst_37 = arith.constant dense<0.000000e+00> : vector<128x48xf32>
    %130 = tpu.matmul %113, %116, %cst_37 {dimension_numbers = #tpu.dot_dimension_numbers<[1], [1], [0], [0], [0, 0, 1, 0], [], []>} : vector<128x16xf32>, vector<48x16xf32>, vector<128x48xf32> -> vector<128x48xf32>
    %131 = vector.broadcast %122 : vector<1x48xf32> to vector<128x48xf32>
    %132 = arith.addf %130, %131 : vector<128x48xf32>
    %133 = vector.extract_strided_slice %132 {offsets = [0, 0], sizes = [128, 16], strides = [1, 1]} : vector<128x48xf32> to vector<128x16xf32>
    %134 = vector.shape_cast %133 : vector<128x16xf32> to vector<16x8x16xf32>
    %135 = vector.extract_strided_slice %132 {offsets = [0, 16], sizes = [128, 16], strides = [1, 1]} : vector<128x48xf32> to vector<128x16xf32>
    %136 = vector.shape_cast %135 : vector<128x16xf32> to vector<16x8x16xf32>
    %137 = vector.extract_strided_slice %132 {offsets = [0, 32], sizes = [128, 16], strides = [1, 1]} : vector<128x48xf32> to vector<128x16xf32>
    %138 = vector.shape_cast %137 : vector<128x16xf32> to vector<16x8x16xf32>
    %139 = vector.extract_strided_slice %134 {offsets = [0, 7, 0], sizes = [16, 1, 16], strides = [1, 1, 1]} : vector<16x8x16xf32> to vector<16x1x16xf32>
    %140 = vector.extract_strided_slice %139 {offsets = [0, 0, 0], sizes = [16, 1, 8], strides = [1, 1, 1]} : vector<16x1x16xf32> to vector<16x1x8xf32>
    %cst_38 = arith.constant 0.353553385 : f32
    %141 = vector.broadcast %cst_38 : f32 to vector<16x1x8xf32>
    %142 = arith.mulf %140, %141 : vector<16x1x8xf32>
    %143 = vector.extract_strided_slice %136 {offsets = [0, 0, 0], sizes = [16, 8, 8], strides = [1, 1, 1]} : vector<16x8x16xf32> to vector<16x8x8xf32>
    "tpu.trace_start"() <{level = 10 : i32, message = "bqd,bkd->bqk"}> : () -> ()
    %cst_39 = arith.constant dense<0.000000e+00> : vector<16x1x8xf32>
    %144 = tpu.matmul %142, %143, %cst_39 {dimension_numbers = #tpu.dot_dimension_numbers<[2], [2], [1], [1], [0, 0, 0, 1, 1, 1], [0], [0]>} : vector<16x1x8xf32>, vector<16x8x8xf32>, vector<16x1x8xf32> -> vector<16x1x8xf32>
    "tpu.trace_stop"() : () -> ()
    %cst_40 = arith.constant dense<0xFF800000> : vector<16x1xf32>
    %145 = vector.multi_reduction <maximumf>, %144, %cst_40 [2] : vector<16x1x8xf32> to vector<16x1xf32>
    %146 = vector.shape_cast %145 : vector<16x1xf32> to vector<16x1x1xf32>
    %147 = vector.broadcast %146 : vector<16x1x1xf32> to vector<16x1x8xf32>
    %148 = arith.subf %144, %147 : vector<16x1x8xf32>
    %149 = math.exp %148 : vector<16x1x8xf32>
    %cst_41 = arith.constant dense<0.000000e+00> : vector<16x1xf32>
    %150 = vector.multi_reduction <add>, %149, %cst_41 [2] : vector<16x1x8xf32> to vector<16x1xf32>
    %151 = vector.shape_cast %150 : vector<16x1xf32> to vector<16x1x1xf32>
    %152 = vector.broadcast %151 : vector<16x1x1xf32> to vector<16x1x8xf32>
    %153 = arith.divf %149, %152 : vector<16x1x8xf32>
    %154 = vector.extract_strided_slice %138 {offsets = [0, 0, 0], sizes = [16, 8, 8], strides = [1, 1, 1]} : vector<16x8x16xf32> to vector<16x8x8xf32>
    "tpu.trace_start"() <{level = 10 : i32, message = "bqk,bkd->bqd"}> : () -> ()
    %cst_42 = arith.constant dense<0.000000e+00> : vector<16x1x8xf32>
    %155 = tpu.matmul %153, %154, %cst_42 {dimension_numbers = #tpu.dot_dimension_numbers<[2], [1], [1], [2], [0, 0, 0, 1, 1, 2], [0], [0]>} : vector<16x1x8xf32>, vector<16x8x8xf32>, vector<16x1x8xf32> -> vector<16x1x8xf32>
    "tpu.trace_stop"() : () -> ()
    %156 = vector.extract_strided_slice %139 {offsets = [0, 0, 8], sizes = [16, 1, 8], strides = [1, 1, 1]} : vector<16x1x16xf32> to vector<16x1x8xf32>
    %cst_43 = arith.constant 0.353553385 : f32
    %157 = vector.broadcast %cst_43 : f32 to vector<16x1x8xf32>
    %158 = arith.mulf %156, %157 : vector<16x1x8xf32>
    %159 = vector.extract_strided_slice %136 {offsets = [0, 0, 8], sizes = [16, 8, 8], strides = [1, 1, 1]} : vector<16x8x16xf32> to vector<16x8x8xf32>
    "tpu.trace_start"() <{level = 10 : i32, message = "bqd,bkd->bqk"}> : () -> ()
    %cst_44 = arith.constant dense<0.000000e+00> : vector<16x1x8xf32>
    %160 = tpu.matmul %158, %159, %cst_44 {dimension_numbers = #tpu.dot_dimension_numbers<[2], [2], [1], [1], [0, 0, 0, 1, 1, 1], [0], [0]>} : vector<16x1x8xf32>, vector<16x8x8xf32>, vector<16x1x8xf32> -> vector<16x1x8xf32>
    "tpu.trace_stop"() : () -> ()
    %cst_45 = arith.constant dense<0xFF800000> : vector<16x1xf32>
    %161 = vector.multi_reduction <maximumf>, %160, %cst_45 [2] : vector<16x1x8xf32> to vector<16x1xf32>
    %162 = vector.shape_cast %161 : vector<16x1xf32> to vector<16x1x1xf32>
    %163 = vector.broadcast %162 : vector<16x1x1xf32> to vector<16x1x8xf32>
    %164 = arith.subf %160, %163 : vector<16x1x8xf32>
    %165 = math.exp %164 : vector<16x1x8xf32>
    %cst_46 = arith.constant dense<0.000000e+00> : vector<16x1xf32>
    %166 = vector.multi_reduction <add>, %165, %cst_46 [2] : vector<16x1x8xf32> to vector<16x1xf32>
    %167 = vector.shape_cast %166 : vector<16x1xf32> to vector<16x1x1xf32>
    %168 = vector.broadcast %167 : vector<16x1x1xf32> to vector<16x1x8xf32>
    %169 = arith.divf %165, %168 : vector<16x1x8xf32>
    %170 = vector.extract_strided_slice %138 {offsets = [0, 0, 8], sizes = [16, 8, 8], strides = [1, 1, 1]} : vector<16x8x16xf32> to vector<16x8x8xf32>
    "tpu.trace_start"() <{level = 10 : i32, message = "bqk,bkd->bqd"}> : () -> ()
    %cst_47 = arith.constant dense<0.000000e+00> : vector<16x1x8xf32>
    %171 = tpu.matmul %169, %170, %cst_47 {dimension_numbers = #tpu.dot_dimension_numbers<[2], [1], [1], [2], [0, 0, 0, 1, 1, 2], [0], [0]>} : vector<16x1x8xf32>, vector<16x8x8xf32>, vector<16x1x8xf32> -> vector<16x1x8xf32>
    "tpu.trace_stop"() : () -> ()
    %172 = tpu.concatenate %155, %171 in 2 : vector<16x1x8xf32>, vector<16x1x8xf32> -> vector<16x1x16xf32>
    %173 = vector.shape_cast %172 : vector<16x1x16xf32> to vector<16x16xf32>
    %cst_48 = arith.constant dense<0.000000e+00> : vector<16x16xf32>
    %174 = tpu.matmul %173, %117, %cst_48 {dimension_numbers = #tpu.dot_dimension_numbers<[1], [1], [0], [0], [0, 0, 1, 0], [], []>} : vector<16x16xf32>, vector<16x16xf32>, vector<16x16xf32> -> vector<16x16xf32>
    %175 = vector.broadcast %123 : vector<1x16xf32> to vector<16x16xf32>
    %176 = arith.addf %174, %175 : vector<16x16xf32>
    %177 = vector.shape_cast %113 : vector<128x16xf32> to vector<16x8x16xf32>
    %178 = vector.extract_strided_slice %177 {offsets = [0, 7, 0], sizes = [16, 1, 16], strides = [1, 1, 1]} : vector<16x8x16xf32> to vector<16x1x16xf32>
    %179 = vector.shape_cast %178 : vector<16x1x16xf32> to vector<16x16xf32>
    %180 = arith.addf %179, %176 : vector<16x16xf32>
    %cst_49 = arith.constant dense<0.000000e+00> : vector<16xf32>
    %181 = vector.multi_reduction <add>, %180, %cst_49 [1] : vector<16x16xf32> to vector<16xf32>
    %182 = vector.shape_cast %181 : vector<16xf32> to vector<16x1xf32>
    %cst_50 = arith.constant 1.600000e+01 : f32
    %183 = vector.broadcast %cst_50 : f32 to vector<16x1xf32>
    %184 = arith.divf %182, %183 : vector<16x1xf32>
    %185 = vector.broadcast %184 : vector<16x1xf32> to vector<16x16xf32>
    %186 = arith.subf %180, %185 : vector<16x16xf32>
    %187 = arith.mulf %186, %186 : vector<16x16xf32>
    %cst_51 = arith.constant dense<0.000000e+00> : vector<16xf32>
    %188 = vector.multi_reduction <add>, %187, %cst_51 [1] : vector<16x16xf32> to vector<16xf32>
    %189 = vector.shape_cast %188 : vector<16xf32> to vector<16x1xf32>
    %cst_52 = arith.constant 1.600000e+01 : f32
    %190 = vector.broadcast %cst_52 : f32 to vector<16x1xf32>
    %191 = arith.divf %189, %190 : vector<16x1xf32>
    %cst_53 = arith.constant 9.99999974E-6 : f32
    %192 = vector.broadcast %cst_53 : f32 to vector<16x1xf32>
    %193 = arith.addf %191, %192 : vector<16x1xf32>
    %194 = math.rsqrt %193 : vector<16x1xf32>
    %195 = vector.broadcast %194 : vector<16x1xf32> to vector<16x16xf32>
    %196 = arith.mulf %186, %195 : vector<16x16xf32>
    %197 = vector.broadcast %126 : vector<1x16xf32> to vector<16x16xf32>
    %198 = arith.mulf %196, %197 : vector<16x16xf32>
    %199 = vector.broadcast %127 : vector<1x16xf32> to vector<16x16xf32>
    %200 = arith.addf %198, %199 : vector<16x16xf32>
    %cst_54 = arith.constant dense<0.000000e+00> : vector<16x32xf32>
    %201 = tpu.matmul %200, %118, %cst_54 {dimension_numbers = #tpu.dot_dimension_numbers<[1], [1], [0], [0], [0, 0, 1, 0], [], []>} : vector<16x16xf32>, vector<32x16xf32>, vector<16x32xf32> -> vector<16x32xf32>
    %202 = vector.broadcast %124 : vector<1x32xf32> to vector<16x32xf32>
    %203 = arith.addf %201, %202 : vector<16x32xf32>
    %cst_55 = arith.constant 0.000000e+00 : f32
    %204 = vector.broadcast %cst_55 : f32 to vector<16x32xf32>
    %205 = arith.maximumf %203, %204 : vector<16x32xf32>
    %cst_56 = arith.constant dense<0.000000e+00> : vector<16x16xf32>
    %206 = tpu.matmul %205, %119, %cst_56 {dimension_numbers = #tpu.dot_dimension_numbers<[1], [0], [0], [1], [0, 0, 1, 1], [], []>} : vector<16x32xf32>, vector<32x16xf32>, vector<16x16xf32> -> vector<16x16xf32>
    %207 = vector.broadcast %125 : vector<1x16xf32> to vector<16x16xf32>
    %208 = arith.addf %206, %207 : vector<16x16xf32>
    %209 = arith.addf %200, %208 : vector<16x16xf32>
    %cst_57 = arith.constant dense<0.000000e+00> : vector<16xf32>
    %210 = vector.multi_reduction <add>, %209, %cst_57 [1] : vector<16x16xf32> to vector<16xf32>
    %211 = vector.shape_cast %210 : vector<16xf32> to vector<16x1xf32>
    %cst_58 = arith.constant 1.600000e+01 : f32
    %212 = vector.broadcast %cst_58 : f32 to vector<16x1xf32>
    %213 = arith.divf %211, %212 : vector<16x1xf32>
    %214 = vector.broadcast %213 : vector<16x1xf32> to vector<16x16xf32>
    %215 = arith.subf %209, %214 : vector<16x16xf32>
    %216 = arith.mulf %215, %215 : vector<16x16xf32>
    %cst_59 = arith.constant dense<0.000000e+00> : vector<16xf32>
    %217 = vector.multi_reduction <add>, %216, %cst_59 [1] : vector<16x16xf32> to vector<16xf32>
    %218 = vector.shape_cast %217 : vector<16xf32> to vector<16x1xf32>
    %cst_60 = arith.constant 1.600000e+01 : f32
    %219 = vector.broadcast %cst_60 : f32 to vector<16x1xf32>
    %220 = arith.divf %218, %219 : vector<16x1xf32>
    %cst_61 = arith.constant 9.99999974E-6 : f32
    %221 = vector.broadcast %cst_61 : f32 to vector<16x1xf32>
    %222 = arith.addf %220, %221 : vector<16x1xf32>
    %223 = math.rsqrt %222 : vector<16x1xf32>
    %224 = vector.broadcast %223 : vector<16x1xf32> to vector<16x16xf32>
    %225 = arith.mulf %215, %224 : vector<16x16xf32>
    %226 = vector.broadcast %128 : vector<1x16xf32> to vector<16x16xf32>
    %227 = arith.mulf %225, %226 : vector<16x16xf32>
    %228 = vector.broadcast %129 : vector<1x16xf32> to vector<16x16xf32>
    %229 = arith.addf %227, %228 : vector<16x16xf32>
    %c0_62 = arith.constant 0 : index
    %c0_63 = arith.constant 0 : index
    %230 = vector.load %arg3[%c0_62, %c0_63] : memref<18x16xf32, #tpu.memory_space<vmem>>, vector<18x16xf32>
    %231 = vector.extract_strided_slice %230 {offsets = [0, 0], sizes = [8, 16], strides = [1, 1]} : vector<18x16xf32> to vector<8x16xf32>
    %232 = vector.extract_strided_slice %230 {offsets = [8, 0], sizes = [5, 8], strides = [1, 1]} : vector<18x16xf32> to vector<5x8xf32>
    %233 = vector.extract_strided_slice %230 {offsets = [13, 0], sizes = [2, 5], strides = [1, 1]} : vector<18x16xf32> to vector<2x5xf32>
    %234 = vector.extract_strided_slice %230 {offsets = [15, 0], sizes = [1, 8], strides = [1, 1]} : vector<18x16xf32> to vector<1x8xf32>
    %235 = vector.extract_strided_slice %230 {offsets = [16, 0], sizes = [1, 5], strides = [1, 1]} : vector<18x16xf32> to vector<1x5xf32>
    %236 = vector.extract_strided_slice %230 {offsets = [17, 0], sizes = [1, 2], strides = [1, 1]} : vector<18x16xf32> to vector<1x2xf32>
    %cst_64 = arith.constant dense<0.000000e+00> : vector<16x8xf32>
    %237 = tpu.matmul %229, %231, %cst_64 {dimension_numbers = #tpu.dot_dimension_numbers<[1], [1], [0], [0], [0, 0, 1, 0], [], []>} : vector<16x16xf32>, vector<8x16xf32>, vector<16x8xf32> -> vector<16x8xf32>
    %238 = vector.broadcast %234 : vector<1x8xf32> to vector<16x8xf32>
    %239 = arith.addf %237, %238 : vector<16x8xf32>
    %cst_65 = arith.constant dense<0.000000e+00> : vector<16x5xf32>
    %240 = tpu.matmul %239, %232, %cst_65 {dimension_numbers = #tpu.dot_dimension_numbers<[1], [1], [0], [0], [0, 0, 1, 0], [], []>} : vector<16x8xf32>, vector<5x8xf32>, vector<16x5xf32> -> vector<16x5xf32>
    %241 = vector.broadcast %235 : vector<1x5xf32> to vector<16x5xf32>
    %242 = arith.addf %240, %241 : vector<16x5xf32>
    %cst_66 = arith.constant dense<0.000000e+00> : vector<16x2xf32>
    %243 = tpu.matmul %242, %233, %cst_66 {dimension_numbers = #tpu.dot_dimension_numbers<[1], [1], [0], [0], [0, 0, 1, 0], [], []>} : vector<16x5xf32>, vector<2x5xf32>, vector<16x2xf32> -> vector<16x2xf32>
    %244 = vector.broadcast %236 : vector<1x2xf32> to vector<16x2xf32>
    %245 = arith.addf %243, %244 : vector<16x2xf32>
    %c0_67 = arith.constant 0 : index
    %c0_68 = arith.constant 0 : index
    %246 = vector.load %arg4[%c0_67, %c0_68] : memref<16x2xf32, #tpu.memory_space<vmem>>, vector<16x2xf32>
    tpu.vector_store %arg4[%c0_67, %c0_68], %245 {strides = array<i32>} : memref<16x2xf32, #tpu.memory_space<vmem>>, vector<16x2xf32>,
    return
  }
}

</mosaic_0001>

<bundles_post_ra>
// kernel: tpu_custom_call.1
= control target key start
LH: loop header
LB: loop body
LE: loop exit
PB: predicated region body
PF: predicated region fallthrough
CT: control target
= control target key end

     0   :  { %vm54_vm0 = vcmask 130048   ;;  %v19515_v2 = vmov 0  ;;  %v19466_v26 = vmov 0.0   ;;  %v50_v27 = vlaneseq  ;;  %s15766_s9 = smov 112   ;;  %s15767_s10 = smov 96   ;;  %s19461_s1 = inlined_call_operand.vmem [shape: f32[2,128,16], index: 1, kind: input, shape index: {}]   ;;  %s19462_s0 = inlined_call_operand.vmem [shape: f32[16,8,16], index: 0, kind: input, shape index: {}]   ;;  %s19463_s2 = inlined_call_operand.vmem [shape: f32[2,8,48], index: 2, kind: input, shape index: {}]   ;;  %s19464_s3 = inlined_call_operand.vmem [shape: f32[18,16], index: 3, kind: input, shape index: {}]   ;;  %s19465_s4 = inlined_call_operand.vmem [shape: f32[16,2], index: 4, kind: output, shape index: {}]  }
   0x1   :  { %v33_v0 = vld [vmem:[%s19461_s1] sm:$0xff]  ;;  %v34_v1 = vld [vmem:[%s19461_s1 + $0x8] sm:$0xff]  ;;  %vm15805_vm1 = vmpackc.low %vm54_vm0, %vm54_vm0  ;;  %14505 = vmatprep.subr.mxu1 %v19466_v26  ;;  %vm15765_vm2 = vmmov 0   ;;  %s15768_s11 = smov 104   ;;  %vm285_vm3 = vcmask 64512   ;;  %s15769_s12 = smov 120  }
   0x2   :  { %v19516_v2 = vsel %vm15805_vm1, 4294967295, %v19515_v2  ;;  %v15317_v3 = vpack.c.bf16 %v34_v1, %v33_v0  ;;  %v35_v4 = vld [vmem:[%s19461_s1 + $0x10] sm:$0xff]  ;;  %v36_v5 = vld [vmem:[%s19461_s1 + $0x18] sm:$0xff]  ;;  %v17_v7 = vld [vmem:[%s19462_s0] sm:$0xff]  ;;  %v15899_v28 = vshrl.u32 %v50_v27, 7  ;;  %14507 = vmatprep.mubr.msk.f32.mxu1 %vm15765_vm2, %v19466_v26  ;;  %s15770_s13 = smov 88  }
   0x3   :  { %19517 = vst [vmem:[#allocation2_spill] sm:$0xff] %v19516_v2  ;;  %v15323_v6 = vpack.c.bf16 %v36_v5, %v35_v4  ;;  %14481 = vmatprep.mubr.msk.f32.mxu0 %vm54_vm0, %v17_v7  ;;  %v37_v8 = vld [vmem:[%s19461_s1 + $0x20] sm:$0xff]  ;;  %v38_v9 = vld [vmem:[%s19461_s1 + $0x28] sm:$0xff]  ;;  %v19_v12 = vld [vmem:[%s19462_s0 + $0x10] sm:$0xff]  ;;  %s15771_s14 = smov 8   ;;  %vm6340_vm4 = vcmask 261120  }
   0x4   :  { %15319 = vmatprep.subr.msk.bf16.mxu0 %vm15805_vm1, %v15317_v3  ;;  %v15329_v10 = vpack.c.bf16 %v38_v9, %v37_v8  ;;  %v18_v11 = vld [vmem:[%s19462_s0 + $0x8] sm:$0xff]  ;;  %v20_v13 = vld [vmem:[%s19462_s0 + $0x18] sm:$0xff]  ;;  %v21_v14 = vld [vmem:[%s19462_s0 + $0x20] sm:$0xff]  ;;  %19518 = vst [vmem:[#allocation3_spill] sm:$0xff] %v15899_v28  ;;  %v15906_v29 = vsub.s32 0, %v15899_v28  ;;  %vm8312_vm5 = vcmask 57344  }
   0x5   :  { %15322 = vmatpush3.bf16.xpose.msk.msra.mxu0 %vm15805_vm1, %v15317_v3  ;;  %v22_v15 = vld [vmem:[%s19462_s0 + $0x28] sm:$0xff]  ;;  %v23_v16 = vld [vmem:[%s19462_s0 + $0x30] sm:$0xff]  ;;  %v24_v17 = vld [vmem:[%s19462_s0 + $0x38] sm:$0xff]  ;;  %vm12446_vm6 = vcmask 1041409   ;;  %vm12449_vm7 = vcmask 1042434   ;;  %vm12452_vm8 = vcmask 1043459  }
   0x6   :  { %15325 = vmatprep.subr.msk.bf16.mxu0 %vm15805_vm1, %v15323_v6  ;;  %v25_v18 = vld [vmem:[%s19462_s0 + $0x40] sm:$0xff]  ;;  %v26_v19 = vld [vmem:[%s19462_s0 + $0x48] sm:$0xff]  ;;  %v27_v20 = vld [vmem:[%s19462_s0 + $0x50] sm:$0xff]  ;;  %19519 = vst [vmem:[#allocation4_spill] sm:$0xff] %v15906_v29  ;;  %vm12455_vm9 = vcmask 1044484   ;;  %vm12458_vm10 = vcmask 1045509  }
   0x7   :  { %v28_v21 = vld [vmem:[%s19462_s0 + $0x58] sm:$0xff]  ;;  %v29_v22 = vld [vmem:[%s19462_s0 + $0x60] sm:$0xff]  ;;  %v30_v23 = vld [vmem:[%s19462_s0 + $0x68] sm:$0xff]  ;;  %vm12461_vm11 = vcmask 1046534   ;;  %vm12464_vm12 = vcmask 1047559   ;;  %vm12666_vm13 = vcmask 129024  }
   0x8   :  { %v31_v24 = vld [vmem:[%s19462_s0 + $0x70] sm:$0xff]  ;;  %v32_v25 = vld [vmem:[%s19462_s0 + $0x78] sm:$0xff]  ;;  %v49_v30 = vld [vmem:[%s19463_s2] sm:$0xff]  ;;  %vm12659_vm14 = vcmask 130055   ;;  %vm13667_vm15 = vcmask 39936  }
   0x9   :  { %v53_v31 = vrot.slane %v49_v30, %v15906_v29 }
   0xd   :  { %15328 = vmatpush3.bf16.xpose.msk.msra.mxu0 %vm15805_vm1, %v15323_v6 }
   0xe   :  { %15331 = vmatprep.subr.msk.bf16.mxu0 %vm15805_vm1, %v15329_v10 }
  0x15   :  { %15334 = vmatpush3.bf16.xpose.msk.msra.mxu0 %vm15805_vm1, %v15329_v10 }
  0x16   :  { %14570 = vmatprep.subr.mxu0 %v19466_v26 }
  0x1c   :  { %14482 = vmatmul.mubr.msk.f32.vlgmr.msra.gmra.mrb[0].mxu0 %vm54_vm0, %v18_v11 }
  0x1d   :  { %14484 = vmatprep.mubr.msk.f32.mxu0 %vm54_vm0, %v19_v12 }
  0x20   :  { %14485 = vmatmul.mubr.msk.f32.gmra.mrb[2].mxu0 %vm54_vm0, %v20_v13 }
  0x21   :  { %14487 = vmatprep.mubr.msk.f32.mxu0 %vm54_vm0, %v21_v14 }
  0x24   :  { %14488 = vmatmul.mubr.msk.f32.gmra.mrb[4].mxu0 %vm54_vm0, %v22_v15 }
  0x25   :  { %14490 = vmatprep.mubr.msk.f32.mxu0 %vm54_vm0, %v23_v16 }
  0x28   :  { %14491 = vmatmul.mubr.msk.f32.gmra.mrb[6].mxu0 %vm54_vm0, %v24_v17 }
  0x29   :  { %14493 = vmatprep.mubr.msk.f32.mxu0 %vm54_vm0, %v25_v18 }
  0x2c   :  { %14494 = vmatmul.mubr.msk.f32.gmra.mrb[8].mxu0 %vm54_vm0, %v26_v19 }
  0x2d   :  { %14496 = vmatprep.mubr.msk.f32.mxu0 %vm54_vm0, %v27_v20 }
  0x30   :  { %14497 = vmatmul.mubr.msk.f32.gmra.mrb[10].mxu0 %vm54_vm0, %v28_v21 }
  0x31   :  { %14499 = vmatprep.mubr.msk.f32.mxu0 %vm54_vm0, %v29_v22 }
  0x34   :  { %14500 = vmatmul.mubr.msk.f32.gmra.mrb[12].mxu0 %vm54_vm0, %v30_v23 }
  0x35   :  { %14502 = vmatprep.mubr.msk.f32.mxu0 %vm54_vm0, %v31_v24 }
  0x38   :  { %14503 = vmatmul.mubr.msk.f32.gmra.mrb[14].mxu0 %vm54_vm0, %v32_v25 }
  0x39   :  { %14572 = vmatprep.mubr.msk.f32.mxu0 %vm15765_vm2, %v19466_v26 }
  0xef   :  { %v14483_v32 = vpop.f32.mrb[0].mxu0 }
  0xf0   :  { %v187_v33 = vpop.f32.mrb[1].mxu0  ;;  %v15916_v37 = vadd.f32 %v14483_v32, %v53_v31 }
  0xf1   :  { %v15912_v34 = vadd.f32 %v187_v33, %v53_v31 }
  0xf2   :  { %v16023_v5 = vmul.f32 0.35355338, %v15916_v37 }
  0xf3   :  { %v14486_v35 = vpop.f32.mrb[2].mxu0  ;;  %283 = vrot.lane.b32.xlu0 %v15912_v34, %s15766_s9  ;;  %v16015_v1 = vmul.f32 0.35355338, %v15912_v34 }
  0xf4   :  { %v197_v36 = vpop.f32.mrb[3].mxu0  ;;  %v15920_v39 = vadd.f32 %v14486_v35, %v53_v31 }
  0xf5   :  { %v15918_v38 = vadd.f32 %v197_v36, %v53_v31 }
  0xf6   :  { %v16041_v11 = vmul.f32 0.35355338, %v15920_v39 }
  0xf7   :  { %v14489_v40 = vpop.f32.mrb[4].mxu0  ;;  %440 = vrot.lane.b32.xlu1 %v15918_v38, %s15766_s9  ;;  %362 = vrot.lane.b32.xlu0 %v15916_v37, %s15766_s9  ;;  %v16032_v8 = vmul.f32 0.35355338, %v15918_v38 }
  0xf8   :  { %v207_v41 = vpop.f32.mrb[5].mxu0  ;;  %v15928_v43 = vadd.f32 %v14489_v40, %v53_v31 }
  0xf9   :  { %v15926_v42 = vadd.f32 %v207_v41, %v53_v31 }
  0xfa   :  { %v16059_v17 = vmul.f32 0.35355338, %v15928_v43 }
  0xfb   :  { %v14492_v44 = vpop.f32.mrb[6].mxu0  ;;  %518 = vrot.lane.b32.xlu1 %v15920_v39, %s15766_s9  ;;  %596 = vrot.lane.b32.xlu0 %v15926_v42, %s15766_s9  ;;  %v16050_v14 = vmul.f32 0.35355338, %v15926_v42 }
  0xfc   :  { %v217_v45 = vpop.f32.mrb[7].mxu0  ;;  %v15936_v47 = vadd.f32 %v14492_v44, %v53_v31 }
  0xfd   :  { %v15934_v46 = vadd.f32 %v217_v45, %v53_v31 }
  0xfe   :  { %v16082_v24 = vmul.f32 0.35355338, %v15936_v47 }
  0xff   :  { %v14495_v48 = vpop.f32.mrb[8].mxu0  ;;  %674 = vrot.lane.b32.xlu1 %v15928_v43, %s15766_s9  ;;  %752 = vrot.lane.b32.xlu0 %v15934_v46, %s15766_s9  ;;  %v16068_v20 = vmul.f32 0.35355338, %v15934_v46 }
 0x100   :  { %v227_v49 = vpop.f32.mrb[9].mxu0  ;;  %v15944_v51 = vadd.f32 %v14495_v48, %v53_v31 }
 0x101   :  { %v15942_v50 = vadd.f32 %v227_v49, %v53_v31 }
 0x102   :  { %v16111_v32 = vmul.f32 0.35355338, %v15944_v51 }
 0x103   :  { %v14498_v52 = vpop.f32.mrb[10].mxu0  ;;  %830 = vrot.lane.b32.xlu1 %v15936_v47, %s15766_s9  ;;  %908 = vrot.lane.b32.xlu0 %v15942_v50, %s15766_s9  ;;  %v16099_v30 = vmul.f32 0.35355338, %v15942_v50 }
 0x104   :  { %v237_v53 = vpop.f32.mrb[11].mxu0  ;;  %v15952_v55 = vadd.f32 %v14498_v52, %v53_v31 }
 0x105   :  { %v15950_v54 = vadd.f32 %v237_v53, %v53_v31 }
 0x106   :  { %v16132_v35 = vmul.f32 0.35355338, %v15952_v55 }
 0x107   :  { %v14501_v56 = vpop.f32.mrb[12].mxu0  ;;  %986 = vrot.lane.b32.xlu1 %v15944_v51, %s15766_s9  ;;  %1064 = vrot.lane.b32.xlu0 %v15950_v54, %s15766_s9  ;;  %v16123_v33 = vmul.f32 0.35355338, %v15950_v54 }
 0x108   :  { %v247_v57 = vpop.f32.mrb[13].mxu0  ;;  %v15960_v59 = vadd.f32 %v14501_v56, %v53_v31 }
 0x109   :  { %v15958_v58 = vadd.f32 %v247_v57, %v53_v31 }
 0x10a   :  { %v16076_v22 = vmul.f32 0.35355338, %v15960_v59 }
 0x10b   :  { %v14504_v60 = vpop.f32.mrb[14].mxu0  ;;  %1142 = vrot.lane.b32.xlu1 %v15952_v55, %s15766_s9  ;;  %1220 = vrot.lane.b32.xlu0 %v15958_v58, %s15766_s9  ;;  %v16141_v36 = vmul.f32 0.35355338, %v15958_v58 }
 0x10c   :  { %v257_v61 = vpop.f32.mrb[15].mxu0  ;;  %v15968_v63 = vadd.f32 %v14504_v60, %v53_v31 }
 0x10d   :  { %v15966_v62 = vadd.f32 %v257_v61, %v53_v31 }
 0x10e   :  { %v16096_v27 = vmul.f32 0.35355338, %v15968_v63 }
 0x10f   :  { %1298 = vrot.lane.b32.xlu1 %v15960_v59, %s15766_s9  ;;  %1376 = vrot.lane.b32.xlu0 %v15966_v62, %s15766_s9  ;;  %v16150_v40 = vmul.f32 0.35355338, %v15966_v62 }
 0x113   :  { %1454 = vrot.lane.b32.xlu1 %v15968_v63, %s15766_s9  ;;  %1783 = vrot.lane.b32.xlu0 %v15916_v37, %s15767_s10 }
 0x117   :  { %1707 = vrot.lane.b32.xlu1 %v15912_v34, %s15767_s10  ;;  %1859 = vrot.lane.b32.xlu0 %v15918_v38, %s15767_s10 }
 0x11b   :  { %1935 = vrot.lane.b32.xlu1 %v15920_v39, %s15767_s10  ;;  %2011 = vrot.lane.b32.xlu0 %v15926_v42, %s15767_s10 }
 0x11f   :  { %2087 = vrot.lane.b32.xlu1 %v15928_v43, %s15767_s10  ;;  %2315 = vrot.lane.b32.xlu0 %v15942_v50, %s15767_s10 }
 0x123   :  { %2163 = vrot.lane.b32.xlu1 %v15934_v46, %s15767_s10  ;;  %2467 = vrot.lane.b32.xlu0 %v15950_v54, %s15767_s10 }
 0x127   :  { %2239 = vrot.lane.b32.xlu1 %v15936_v47, %s15767_s10  ;;  %2619 = vrot.lane.b32.xlu0 %v15958_v58, %s15767_s10 }
 0x12b   :  { %2391 = vrot.lane.b32.xlu1 %v15944_v51, %s15767_s10  ;;  %2925 = vrot.lane.b32.xlu0 %v15912_v34, %s15768_s11 }
 0x12f   :  { %2543 = vrot.lane.b32.xlu1 %v15952_v55, %s15767_s10  ;;  %2771 = vrot.lane.b32.xlu0 %v15966_v62, %s15767_s10 }
 0x133   :  { %2695 = vrot.lane.b32.xlu1 %v15960_v59, %s15767_s10 }
 0x137   :  { %2847 = vrot.lane.b32.xlu1 %v15968_v63, %s15767_s10 }
 0x13b   :  { %3003 = vrot.lane.b32.xlu1 %v15916_v37, %s15768_s11 }
 0x165   :  { %v284_v0 = vpop.permute.xlu0 %283 }
 0x166   :  { %14506 = vmatpush3.xpose.msk.msra.mxu1 %vm285_vm3, %v284_v0 }
 0x167   :  { %14510 = vmatprep.subr.mxu1 %v19466_v26 }
 0x169   :  { %v441_v3 = vpop.permute.xlu1 %440  ;;  %v363_v4 = vpop.permute.xlu0 %362  ;;  %14508 = vmatmul.mubr.msk.f32.vlgmr.msra.gmra.mrb[0].mxu1 %vm285_vm3, %v16015_v1 }
 0x16a   :  { %14511 = vmatpush3.xpose.msk.msra.mxu1 %vm285_vm3, %v363_v4  ;;  %14512 = vmatprep.mubr.msk.f32.mxu1 %vm15765_vm2, %v19466_v26 }
 0x16b   :  { %14515 = vmatprep.subr.mxu1 %v19466_v26 }
 0x16d   :  { %v519_v6 = vpop.permute.xlu1 %518  ;;  %v597_v7 = vpop.permute.xlu0 %596  ;;  %14513 = vmatmul.mubr.msk.f32.vlgmr.msra.gmra.mrb[2].mxu1 %vm285_vm3, %v16023_v5 }
 0x16e   :  { %14516 = vmatpush3.xpose.msk.msra.mxu1 %vm285_vm3, %v441_v3  ;;  %14517 = vmatprep.mubr.msk.f32.mxu1 %vm15765_vm2, %v19466_v26 }
 0x16f   :  { %14520 = vmatprep.subr.mxu1 %v19466_v26 }
 0x171   :  { %v675_v9 = vpop.permute.xlu1 %674  ;;  %v753_v10 = vpop.permute.xlu0 %752  ;;  %14518 = vmatmul.mubr.msk.f32.vlgmr.msra.gmra.mrb[4].mxu1 %vm285_vm3, %v16032_v8 }
 0x172   :  { %14521 = vmatpush3.xpose.msk.msra.mxu1 %vm285_vm3, %v519_v6  ;;  %14522 = vmatprep.mubr.msk.f32.mxu1 %vm15765_vm2, %v19466_v26 }
 0x173   :  { %14525 = vmatprep.subr.mxu1 %v19466_v26 }
 0x175   :  { %v831_v12 = vpop.permute.xlu1 %830  ;;  %v909_v13 = vpop.permute.xlu0 %908  ;;  %14523 = vmatmul.mubr.msk.f32.vlgmr.msra.gmra.mrb[6].mxu1 %vm285_vm3, %v16041_v11 }
 0x176   :  { %14526 = vmatpush3.xpose.msk.msra.mxu1 %vm285_vm3, %v597_v7  ;;  %14527 = vmatprep.mubr.msk.f32.mxu1 %vm15765_vm2, %v19466_v26 }
 0x177   :  { %14530 = vmatprep.subr.mxu1 %v19466_v26 }
 0x179   :  { %v987_v15 = vpop.permute.xlu1 %986  ;;  %v1065_v16 = vpop.permute.xlu0 %1064  ;;  %14528 = vmatmul.mubr.msk.f32.vlgmr.msra.gmra.mrb[8].mxu1 %vm285_vm3, %v16050_v14 }
 0x17a   :  { %14531 = vmatpush3.xpose.msk.msra.mxu1 %vm285_vm3, %v675_v9  ;;  %14532 = vmatprep.mubr.msk.f32.mxu1 %vm15765_vm2, %v19466_v26 }
 0x17b   :  { %14535 = vmatprep.subr.mxu1 %v19466_v26 }
 0x17d   :  { %v1143_v18 = vpop.permute.xlu1 %1142  ;;  %v1221_v19 = vpop.permute.xlu0 %1220  ;;  %14533 = vmatmul.mubr.msk.f32.vlgmr.msra.gmra.mrb[10].mxu1 %vm285_vm3, %v16059_v17 }
 0x17e   :  { %14536 = vmatpush3.xpose.msk.msra.mxu1 %vm285_vm3, %v753_v10  ;;  %14537 = vmatprep.mubr.msk.f32.mxu1 %vm15765_vm2, %v19466_v26 }
 0x17f   :  { %14540 = vmatprep.subr.mxu1 %v19466_v26 }
 0x181   :  { %v1299_v21 = vpop.permute.xlu1 %1298  ;;  %14538 = vmatmul.mubr.msk.f32.vlgmr.msra.gmra.mrb[12].mxu1 %vm285_vm3, %v16068_v20  ;;  %v1377_v23 = vpop.permute.xlu0 %1376 }
 0x182   :  { %14541 = vmatpush3.xpose.msk.msra.mxu1 %vm285_vm3, %v831_v12  ;;  %14571 = vmatpush3.xpose.msk.msra.mxu0 %vm285_vm3, %v1299_v21 }
 0x183   :  { %14542 = vmatprep.mubr.msk.f32.mxu1 %vm15765_vm2, %v19466_v26  ;;  %14580 = vmatprep.subr.mxu0 %v19466_v26 }
 0x184   :  { %14545 = vmatprep.subr.mxu1 %v19466_v26 }
 0x185   :  { %14573 = vmatmul.mubr.msk.f32.vlgmr.msra.gmra.mrb[16].mxu0 %vm285_vm3, %v16076_v22  ;;  %v1455_v25 = vpop.permute.xlu1 %1454  ;;  %14543 = vmatmul.mubr.msk.f32.vlgmr.msra.gmra.mrb[14].mxu1 %vm285_vm3, %v16082_v24  ;;  %v1784_v31 = vpop.permute.xlu0 %1783 }
 0x186   :  { %14546 = vmatpush3.xpose.msk.msra.mxu1 %vm285_vm3, %v909_v13  ;;  %14581 = vmatpush3.xpose.msk.msra.mxu0 %vm285_vm3, %v1455_v25 }
 0x187   :  { %14547 = vmatprep.mubr.msk.f32.mxu1 %vm15765_vm2, %v19466_v26  ;;  %14582 = vmatprep.mubr.msk.f32.mxu0 %vm15765_vm2, %v19466_v26 }
 0x188   :  { %14590 = vmatprep.subr.mxu0 %v19466_v26  ;;  %14550 = vmatprep.subr.mxu1 %v19466_v26 }
 0x189   :  { %14583 = vmatmul.mubr.msk.f32.vlgmr.msra.gmra.mrb[18].mxu0 %vm285_vm3, %v16096_v27  ;;  %14548 = vmatmul.mubr.msk.f32.vlgmr.msra.gmra.mrb[16].mxu1 %vm285_vm3, %v16099_v30  ;;  %v1708_v41 = vpop.permute.xlu1 %1707 }
 0x18a   :  { %14551 = vmatpush3.xpose.msk.msra.mxu1 %vm285_vm3, %v987_v15  ;;  %14591 = vmatpush3.msra.mxu0 %v1784_v31 }
 0x18b   :  { %14552 = vmatprep.mubr.msk.f32.mxu1 %vm15765_vm2, %v19466_v26  ;;  %14555 = vmatprep.subr.mxu1 %v19466_v26 }
 0x18c   :  { %14592 = vmatprep.mubr.msk.f32.mxu0 %vm15765_vm2, %v19466_v26  ;;  %14600 = vmatprep.subr.mxu0 %v19466_v26 }
 0x18d   :  { %14553 = vmatmul.mubr.msk.f32.vlgmr.msra.gmra.mrb[18].mxu1 %vm285_vm3, %v16111_v32 }
 0x18e   :  { %14556 = vmatpush3.xpose.msk.msra.mxu1 %vm285_vm3, %v1065_v16  ;;  %14557 = vmatprep.mubr.msk.f32.mxu1 %vm15765_vm2, %v19466_v26 }
 0x18f   :  { %14560 = vmatprep.subr.mxu1 %v19466_v26 }
 0x191   :  { %14558 = vmatmul.mubr.msk.f32.vlgmr.msra.gmra.mrb[20].mxu1 %vm285_vm3, %v16123_v33 }
 0x192   :  { %14561 = vmatpush3.xpose.msk.msra.mxu1 %vm285_vm3, %v1143_v18  ;;  %14562 = vmatprep.mubr.msk.f32.mxu1 %vm15765_vm2, %v19466_v26 }
 0x193   :  { %14565 = vmatprep.subr.mxu1 %v19466_v26 }
 0x195   :  { %14563 = vmatmul.mubr.msk.f32.vlgmr.msra.gmra.mrb[22].mxu1 %vm285_vm3, %v16132_v35 }
 0x196   :  { %14566 = vmatpush3.xpose.msk.msra.mxu1 %vm285_vm3, %v1221_v19  ;;  %14567 = vmatprep.mubr.msk.f32.mxu1 %vm15765_vm2, %v19466_v26 }
 0x197   :  { %14575 = vmatprep.subr.mxu1 %v19466_v26 }
 0x199   :  { %14568 = vmatmul.mubr.msk.f32.vlgmr.msra.gmra.mrb[24].mxu1 %vm285_vm3, %v16141_v36 }
 0x19a   :  { %14576 = vmatpush3.xpose.msk.msra.mxu1 %vm285_vm3, %v1377_v23  ;;  %14577 = vmatprep.mubr.msk.f32.mxu1 %vm15765_vm2, %v19466_v26 }
 0x19b   :  { %14585 = vmatprep.subr.mxu1 %v19466_v26 }
 0x19d   :  { %14578 = vmatmul.mubr.msk.f32.vlgmr.msra.gmra.mrb[26].mxu1 %vm285_vm3, %v16150_v40 }
 0x19e   :  { %14586 = vmatpush3.msra.mxu1 %v1708_v41  ;;  %14587 = vmatprep.mubr.msk.f32.mxu1 %vm15765_vm2, %v19466_v26 }
 0x19f   :  { %14595 = vmatprep.subr.mxu1 %v19466_v26 }
 0x23c   :  { %v16158_v44 = vpop.f32.mrb[0].mxu1 }
 0x23d   :  { %v14509_v45 = vpop.f32.mrb[1].mxu1  ;;  %v1531_v48 = vsel %vm285_vm3, %v16158_v44, -inf }
 0x23e   :  { %1532 = vmax.xlane.f32.xlu0 %v1531_v48 }
 0x240   :  { %v16162_v49 = vpop.f32.mrb[2].mxu1 }
 0x241   :  { %v14514_v52 = vpop.f32.mrb[3].mxu1  ;;  %v1534_v53 = vsel %vm285_vm3, %v16162_v49, -inf }
 0x242   :  { %1535 = vmax.xlane.f32.xlu1 %v1534_v53 }
 0x244   :  { %v16166_v56 = vpop.f32.mrb[4].mxu1 }
 0x245   :  { %v14519_v57 = vpop.f32.mrb[5].mxu1  ;;  %v1537_v60 = vsel %vm285_vm3, %v16166_v56, -inf }
 0x246   :  { %1538 = vmax.xlane.f32.xlu0 %v1537_v60 }
 0x248   :  { %v16170_v61 = vpop.f32.mrb[6].mxu1 }
 0x249   :  { %v14524_v0 = vpop.f32.mrb[7].mxu1  ;;  %v1540_v3 = vsel %vm285_vm3, %v16170_v61, -inf }
 0x24a   :  { %1541 = vmax.xlane.f32.xlu0 %v1540_v3 }
 0x24c   :  { %v16174_v4 = vpop.f32.mrb[8].mxu1 }
 0x24d   :  { %v14529_v6 = vpop.f32.mrb[9].mxu1  ;;  %v1543_v7 = vsel %vm285_vm3, %v16174_v4, -inf }
 0x24e   :  { %1544 = vmax.xlane.f32.xlu1 %v1543_v7 }
 0x250   :  { %v16178_v9 = vpop.f32.mrb[10].mxu1 }
 0x251   :  { %v14534_v10 = vpop.f32.mrb[11].mxu1  ;;  %v1546_v12 = vsel %vm285_vm3, %v16178_v9, -inf }
 0x252   :  { %1547 = vmax.xlane.f32.xlu0 %v1546_v12 }
 0x254   :  { %v16182_v13 = vpop.f32.mrb[12].mxu1 }
 0x255   :  { %v14539_v15 = vpop.f32.mrb[13].mxu1  ;;  %v1549_v16 = vsel %vm285_vm3, %v16182_v13, -inf }
 0x256   :  { %1550 = vmax.xlane.f32.xlu1 %v1549_v16 }
 0x258   :  { %v16186_v18 = vpop.f32.mrb[14].mxu1  ;;  %v16188_v19 = vpop.f32.mrb[16].mxu0 }
 0x259   :  { %v14544_v21 = vpop.f32.mrb[15].mxu1  ;;  %v14574_v23 = vpop.f32.mrb[17].mxu0  ;;  %v1570_v25 = vsel %vm285_vm3, %v16188_v19, -inf  ;;  %v1552_v0 = vsel %vm285_vm3, %v16186_v18, -inf }
 0x25a   :  { %1571 = vmax.xlane.f32.xlu0 %v1570_v25 }
 0x25c   :  { %v16192_v31 = vpop.f32.mrb[16].mxu1  ;;  %v16194_v41 = vpop.f32.mrb[18].mxu0 }
 0x25d   :  { %v14549_v45 = vpop.f32.mrb[17].mxu1  ;;  %v14584_v48 = vpop.f32.mrb[19].mxu0  ;;  %v1576_v52 = vsel %vm285_vm3, %v16194_v41, -inf  ;;  %v1555_v53 = vsel %vm285_vm3, %v16192_v31, -inf }
 0x25e   :  { %1577 = vmax.xlane.f32.xlu0 %v1576_v52  ;;  %1556 = vmax.xlane.f32.xlu1 %v1555_v53  ;;  %v16230_v48 = vpop.permute.xlu1 %1935  ;;  %v16236_v53 = vpop.permute.xlu0 %1859 }
 0x260   :  { %v16200_v57 = vpop.f32.mrb[18].mxu1 }
 0x261   :  { %v14554_v60 = vpop.f32.mrb[19].mxu1  ;;  %v1558_v7 = vsel %vm285_vm3, %v16200_v57, -inf }
 0x262   :  { %1553 = vmax.xlane.f32.xlu0 %v1552_v0  ;;  %v16232_v52 = vpop.permute.xlu1 %2087  ;;  %v16242_v60 = vpop.permute.xlu0 %2011 }
 0x264   :  { %v16204_v3 = vpop.f32.mrb[20].mxu1 }
 0x265   :  { %v14559_v6 = vpop.f32.mrb[21].mxu1  ;;  %v1561_v10 = vsel %vm285_vm3, %v16204_v3, -inf }
 0x266   :  { %1559 = vmax.xlane.f32.xlu0 %v1558_v7  ;;  %1562 = vmax.xlane.f32.xlu1 %v1561_v10 }
 0x268   :  { %v16210_v12 = vpop.f32.mrb[22].mxu1 }
 0x269   :  { %v14564_v15 = vpop.f32.mrb[23].mxu1  ;;  %v1564_v16 = vsel %vm285_vm3, %v16210_v12, -inf }
 0x26a   :  { %1565 = vmax.xlane.f32.xlu0 %v1564_v16 }
 0x26c   :  { %v16214_v21 = vpop.f32.mrb[24].mxu1 }
 0x26d   :  { %v14569_v23 = vpop.f32.mrb[25].mxu1 }
 0x270   :  { %v16216_v25 = vpop.f32.mrb[26].mxu1 }
 0x271   :  { %v14579_v45 = vpop.f32.mrb[27].mxu1 }
 0x277   :  { %3001 = vrot.lane.b32.xlu1 %v16023_v5, %s15769_s12  ;;  %v1567_v5 = vsel %vm285_vm3, %v16214_v21, -inf }
 0x27b   :  { %3159 = vrot.lane.b32.xlu1 %v15920_v39, %s15768_s11 }
 0x27f   :  { %3157 = vrot.lane.b32.xlu1 %v16041_v11, %s15769_s12  ;;  %v1573_v11 = vsel %vm285_vm3, %v16216_v25, -inf }
 0x280   :  { %2923 = vrot.lane.b32.xlu0 %v16015_v1, %s15769_s12  ;;  %v16240_v1 = vpop.permute.xlu1 %2163 }
 0x284   :  { %3081 = vrot.lane.b32.xlu0 %v15918_v38, %s15768_s11  ;;  %v16244_v0 = vpop.permute.xlu1 %2239 }
 0x288   :  { %3079 = vrot.lane.b32.xlu0 %v16032_v8, %s15769_s12  ;;  %v16246_v8 = vpop.permute.xlu0 %2315  ;;  %v16248_v6 = vpop.permute.xlu1 %2391 }
 0x289   :  { %19520 = vst [vmem:[#allocation5_spill] sm:$0xff] %v16246_v8  ;;  %19521 = vst [vmem:[#allocation6_spill] sm:$0xff] %v16248_v6 }
 0x28c   :  { %v16250_v7 = vpop.permute.xlu0 %2467  ;;  %v16252_v10 = vpop.permute.xlu1 %2543 }
 0x28d   :  { %19522 = vst [vmem:[#allocation7_spill] sm:$0xff] %v16250_v7  ;;  %19523 = vst [vmem:[#allocation8_spill] sm:$0xff] %v16252_v10 }
 0x290   :  { %v16254_v15 = vpop.permute.xlu0 %2619  ;;  %v16256_v16 = vpop.permute.xlu1 %2695 }
 0x291   :  { %19524 = vst [vmem:[#allocation9_spill] sm:$0xff] %v16254_v15  ;;  %19525 = vst [vmem:[#allocation10_spill] sm:$0xff] %v16256_v16 }
 0x294   :  { %v16258_v23 = vpop.permute.xlu0 %2925  ;;  %v16260_v45 = vpop.permute.xlu1 %2847 }
 0x295   :  { %19526 = vst [vmem:[#allocation11_spill] sm:$0xff] %v16258_v23  ;;  %19527 = vst [vmem:[#allocation12_spill] sm:$0xff] %v16260_v45 }
 0x2a3   :  { %1568 = vmax.xlane.f32.xlu1 %v1567_v5  ;;  %v16262_v5 = vpop.permute.xlu0 %2771 }
 0x2a4   :  { %19528 = vst [vmem:[#allocation13_spill] sm:$0xff] %v16262_v5 }
 0x2a7   :  { %1574 = vmax.xlane.f32.xlu1 %v1573_v11  ;;  %v16264_v11 = vpop.permute.xlu1 %3003 }
 0x2a8   :  { %19529 = vst [vmem:[#allocation14_spill] sm:$0xff] %v16264_v11 }
 0x2cb   :  { %v1533_v26 = vpop.xlane.xlu0 %1532 }
 0x2cc   :  { %v1579_v29 = vsub.f32 %v16158_v44, %v1533_v26 }
 0x2ce   :  { %v1595_v28 = vmul.f32 1.442695, %v1579_v29 }
 0x2cf   :  { %v1536_v2 = vpop.xlane.xlu1 %1535 }
 0x2d0   :  { %15413 = vpow2.f32 %v1595_v28  ;;  %v1580_v10 = vsub.f32 %v16162_v49, %v1536_v2 }
 0x2d2   :  { %v1597_v6 = vmul.f32 1.442695, %v1580_v10 }
 0x2d3   :  { %v1539_v15 = vpop.xlane.xlu0 %1538 }
 0x2d4   :  { %15415 = vpow2.f32 %v1597_v6  ;;  %v1581_v16 = vsub.f32 %v16166_v56, %v1539_v15 }
 0x2d6   :  { %v1599_v23 = vmul.f32 1.442695, %v1581_v16 }
 0x2d7   :  { %v1542_v7 = vpop.xlane.xlu0 %1541 }
 0x2d8   :  { %15417 = vpow2.f32 %v1599_v23  ;;  %v1582_v5 = vsub.f32 %v16170_v61, %v1542_v7 }
 0x2da   :  { %v16270_v45 = vpop.eup %15413  ;;  %v1601_v11 = vmul.f32 1.442695, %v1582_v5 }
 0x2db   :  { %v1545_v8 = vpop.xlane.xlu1 %1544  ;;  %v1627_v26 = vsel %vm285_vm3, %v16270_v45, 0.0 }
 0x2dc   :  { %15419 = vpow2.f32 %v1601_v11  ;;  %v1583_v2 = vsub.f32 %v16174_v4, %v1545_v8  ;;  %1628 = vadd.xlane.f32.xlu1 %v1627_v26 }
 0x2de   :  { %v16275_v28 = vpop.eup %15415  ;;  %v1603_v29 = vmul.f32 1.442695, %v1583_v2 }
 0x2df   :  { %v1548_v44 = vpop.xlane.xlu0 %1547  ;;  %v1630_v49 = vsel %vm285_vm3, %v16275_v28, 0.0 }
 0x2e0   :  { %15421 = vpow2.f32 %v1603_v29  ;;  %v1584_v56 = vsub.f32 %v16178_v9, %v1548_v44  ;;  %1631 = vadd.xlane.f32.xlu0 %v1630_v49 }
 0x2e2   :  { %v16280_v61 = vpop.eup %15417  ;;  %v1605_v6 = vmul.f32 1.442695, %v1584_v56 }
 0x2e3   :  { %v1551_v7 = vpop.xlane.xlu1 %1550  ;;  %v1633_v10 = vsel %vm285_vm3, %v16280_v61, 0.0 }
 0x2e4   :  { %15423 = vpow2.f32 %v1605_v6  ;;  %v1585_v4 = vsub.f32 %v16182_v13, %v1551_v7  ;;  %1634 = vadd.xlane.f32.xlu1 %v1633_v10 }
 0x2e6   :  { %v16285_v8 = vpop.eup %15419  ;;  %v1607_v15 = vmul.f32 1.442695, %v1585_v4 }
 0x2e7   :  { %v1572_v16 = vpop.xlane.xlu0 %1571  ;;  %v1636_v23 = vsel %vm285_vm3, %v16285_v8, 0.0 }
 0x2e8   :  { %15425 = vpow2.f32 %v1607_v15  ;;  %v1592_v9 = vsub.f32 %v16188_v19, %v1572_v16  ;;  %1637 = vadd.xlane.f32.xlu0 %v1636_v23 }
 0x2ea   :  { %v16290_v5 = vpop.eup %15421  ;;  %v1621_v11 = vmul.f32 1.442695, %v1592_v9 }
 0x2eb   :  { %v1578_v26 = vpop.xlane.xlu0 %1577  ;;  %v1557_v2 = vpop.xlane.xlu1 %1556  ;;  %v1639_v13 = vsel %vm285_vm3, %v16290_v5, 0.0 }
 0x2ec   :  { %15427 = vpow2.f32 %v1621_v11  ;;  %v1594_v29 = vsub.f32 %v16194_v41, %v1578_v26  ;;  %v1587_v44 = vsub.f32 %v16192_v31, %v1557_v2  ;;  %1640 = vadd.xlane.f32.xlu1 %v1639_v13 }
 0x2ee   :  { %v16296_v49 = vpop.eup %15423  ;;  %v1625_v56 = vmul.f32 1.442695, %v1594_v29  ;;  %v1611_v6 = vmul.f32 1.442695, %v1587_v44 }
 0x2ef   :  { %v1554_v19 = vpop.xlane.xlu0 %1553  ;;  %v1642_v7 = vsel %vm285_vm3, %v16296_v49, 0.0 }
 0x2f0   :  { %15429 = vpow2.f32 %v1625_v56  ;;  %v1586_v10 = vsub.f32 %v16186_v18, %v1554_v19  ;;  %1643 = vadd.xlane.f32.xlu0 %v1642_v7 }
 0x2f1   :  { %15431 = vpow2.f32 %v1611_v6 }
 0x2f2   :  { %v16301_v4 = vpop.eup %15425  ;;  %v1609_v15 = vmul.f32 1.442695, %v1586_v10 }
 0x2f3   :  { %v1560_v41 = vpop.xlane.xlu0 %1559  ;;  %v1563_v16 = vpop.xlane.xlu1 %1562  ;;  %v1645_v31 = vsel %vm285_vm3, %v16301_v4, 0.0 }
 0x2f4   :  { %15433 = vpow2.f32 %v1609_v15  ;;  %v1588_v23 = vsub.f32 %v16200_v57, %v1560_v41  ;;  %v1589_v9 = vsub.f32 %v16204_v3, %v1563_v16  ;;  %1646 = vadd.xlane.f32.xlu1 %v1645_v31 }
 0x2f6   :  { %v16307_v11 = vpop.eup %15427  ;;  %v1613_v26 = vmul.f32 1.442695, %v1588_v23  ;;  %v1615_v18 = vmul.f32 1.442695, %v1589_v9 }
 0x2f7   :  { %v1566_v2 = vpop.xlane.xlu0 %1565  ;;  %v1666_v13 = vsel %vm285_vm3, %v16307_v11, 0.0  ;;  %v16344_v23 = vpop.permute.xlu1 %3001 }
 0x2f8   :  { %15435 = vpow2.f32 %v1613_v26  ;;  %v1590_v29 = vsub.f32 %v16210_v12, %v1566_v2  ;;  %1667 = vadd.xlane.f32.xlu0 %v1666_v13 }
 0x2f9   :  { %15437 = vpow2.f32 %v1615_v18 }
 0x2fa   :  { %v16312_v44 = vpop.eup %15429  ;;  %v1617_v56 = vmul.f32 1.442695, %v1590_v29 }
 0x2fb   :  { %v16314_v57 = vpop.eup %15431  ;;  %v1672_v3 = vsel %vm285_vm3, %v16312_v44, 0.0  ;;  %v16348_v9 = vpop.permute.xlu1 %3159 }
 0x2fc   :  { %15439 = vpow2.f32 %v1617_v56  ;;  %1673 = vadd.xlane.f32.xlu0 %v1672_v3  ;;  %v1651_v6 = vsel %vm285_vm3, %v16314_v57, 0.0 }
 0x2fd   :  { %1652 = vadd.xlane.f32.xlu1 %v1651_v6 }
 0x2fe   :  { %v16320_v19 = vpop.eup %15433 }
 0x2ff   :  { %v1648_v12 = vsel %vm285_vm3, %v16320_v19, 0.0 }
 0x300   :  { %1649 = vadd.xlane.f32.xlu0 %v1648_v12 }
 0x302   :  { %v16324_v7 = vpop.eup %15435 }
 0x303   :  { %v16326_v10 = vpop.eup %15437  ;;  %v1654_v15 = vsel %vm285_vm3, %v16324_v7, 0.0 }
 0x304   :  { %1655 = vadd.xlane.f32.xlu0 %v1654_v15  ;;  %v1657_v41 = vsel %vm285_vm3, %v16326_v10, 0.0 }
 0x305   :  { %1658 = vadd.xlane.f32.xlu1 %v1657_v41  ;;  %v19532_v41 = vld [vmem:[#allocation7_spill] sm:$0xff] }
 0x306   :  { %v16332_v16 = vpop.eup %15439 }
 0x307   :  { %v1660_v31 = vsel %vm285_vm3, %v16332_v16, 0.0 }
 0x308   :  { %1661 = vadd.xlane.f32.xlu0 %v1660_v31 }
 0x316   :  { %3315 = vrot.lane.b32.xlu1 %v15928_v43, %s15768_s11 }
 0x31a   :  { %3313 = vrot.lane.b32.xlu1 %v16059_v17, %s15769_s12  ;;  %v16354_v17 = vpop.permute.xlu1 %3157 }
 0x31e   :  { %3471 = vrot.lane.b32.xlu1 %v15936_v47, %s15768_s11  ;;  %3237 = vrot.lane.b32.xlu0 %v15926_v42, %s15768_s11 }
 0x322   :  { %3235 = vrot.lane.b32.xlu0 %v16050_v14, %s15769_s12 }
 0x326   :  { %3393 = vrot.lane.b32.xlu0 %v15934_v46, %s15768_s11 }
 0x32a   :  { %3391 = vrot.lane.b32.xlu0 %v16068_v20, %s15769_s12 }
 0x32e   :  { %3549 = vrot.lane.b32.xlu0 %v15942_v50, %s15768_s11 }
 0x330   :  { %v1569_v26 = vpop.xlane.xlu1 %1568 }
 0x331   :  { %v1591_v18 = vsub.f32 %v16214_v21, %v1569_v26 }
 0x332   :  { %3547 = vrot.lane.b32.xlu0 %v16099_v30, %s15769_s12 }
 0x333   :  { %v1619_v14 = vmul.f32 1.442695, %v1591_v18  ;;  %v19533_v18 = vld [vmem:[#allocation6_spill] sm:$0xff] }
 0x334   :  { %v1575_v2 = vpop.xlane.xlu1 %1574 }
 0x335   :  { %15441 = vpow2.f32 %v1619_v14  ;;  %v1593_v13 = vsub.f32 %v16216_v25, %v1575_v2 }
 0x336   :  { %3705 = vrot.lane.b32.xlu0 %v15950_v54, %s15768_s11 }
 0x337   :  { %v1623_v20 = vmul.f32 1.442695, %v1593_v13  ;;  %v19534_v13 = vld [vmem:[#allocation8_spill] sm:$0xff] }
 0x339   :  { %15443 = vpow2.f32 %v1623_v20  ;;  %v19535_v20 = vld [vmem:[#allocation9_spill] sm:$0xff] }
 0x33a   :  { %3703 = vrot.lane.b32.xlu0 %v16123_v33, %s15769_s12  ;;  %v16394_v33 = vpop.permute.xlu0 %2923 }
 0x33e   :  { %3861 = vrot.lane.b32.xlu0 %v15958_v58, %s15768_s11 }
 0x33f   :  { %v16368_v21 = vpop.eup %15441 }
 0x340   :  { %v1663_v30 = vsel %vm285_vm3, %v16368_v21, 0.0 }
 0x342   :  { %1664 = vadd.xlane.f32.xlu1 %v1663_v30  ;;  %3859 = vrot.lane.b32.xlu0 %v16141_v36, %s15769_s12 }
 0x343   :  { %v16374_v25 = vpop.eup %15443 }
 0x344   :  { %v1669_v29 = vsel %vm285_vm3, %v16374_v25, 0.0 }
 0x346   :  { %1670 = vadd.xlane.f32.xlu1 %v1669_v29  ;;  %4017 = vrot.lane.b32.xlu0 %v15966_v62, %s15768_s11 }
 0x34a   :  { %4015 = vrot.lane.b32.xlu0 %v16150_v40, %s15769_s12  ;;  %v19530_v40 = vmov 0.0  }
 0x34e   :  { %4423 = vrot.lane.b32.xlu0 %v15916_v37, %s15770_s13  ;;  %v16400_v37 = vpop.permute.xlu0 %3081 }
 0x352   :  { %4499 = vrot.lane.b32.xlu0 %v15918_v38, %s15770_s13  ;;  %v16406_v38 = vpop.permute.xlu0 %3079 }
 0x356   :  { %4651 = vrot.lane.b32.xlu0 %v15926_v42, %s15770_s13 }
 0x357   :  { %3469 = vrot.lane.b32.xlu1 %v16082_v24, %s15769_s12 }
 0x35a   :  { %4803 = vrot.lane.b32.xlu0 %v15934_v46, %s15770_s13 }
 0x35b   :  { %3627 = vrot.lane.b32.xlu1 %v15944_v51, %s15768_s11 }
 0x35e   :  { %4955 = vrot.lane.b32.xlu0 %v15942_v50, %s15770_s13 }
 0x35f   :  { %3625 = vrot.lane.b32.xlu1 %v16111_v32, %s15769_s12 }
 0x363   :  { %3783 = vrot.lane.b32.xlu1 %v15952_v55, %s15768_s11 }
 0x367   :  { %3781 = vrot.lane.b32.xlu1 %v16132_v35, %s15769_s12 }
 0x369   :  { %v1629_v42 = vpop.xlane.xlu1 %1628 }
 0x36a   :  { %15445 = vrcp.f32 %v1629_v42  ;;  %v19537_v42 = vld [vmem:[#allocation12_spill] sm:$0xff] }
 0x36b   :  { %3939 = vrot.lane.b32.xlu1 %v15960_v59, %s15768_s11 }
 0x36d   :  { %v1632_v46 = vpop.xlane.xlu0 %1631 }
 0x36e   :  { %15447 = vrcp.f32 %v1632_v46 }
 0x36f   :  { %3937 = vrot.lane.b32.xlu1 %v16076_v22, %s15769_s12 }
 0x371   :  { %v1635_v50 = vpop.xlane.xlu1 %1634 }
 0x372   :  { %15449 = vrcp.f32 %v1635_v50 }
 0x373   :  { %4095 = vrot.lane.b32.xlu1 %v15968_v63, %s15768_s11 }
 0x374   :  { %v15446_v24 = vpop.eup %15445 }
 0x375   :  { %v1638_v32 = vpop.xlane.xlu0 %1637  ;;  %v1676_v35 = vmul.f32 %v15446_v24, %v16270_v45  ;;  %v19538_v24 = vld [vmem:[#allocation14_spill] sm:$0xff] }
 0x376   :  { %15451 = vrcp.f32 %v1638_v32 }
 0x377   :  { %4093 = vrot.lane.b32.xlu1 %v16096_v27, %s15769_s12  ;;  %14588 = vmatmul.mubr.msk.f32.vlgmr.msra.gmra.mrb[28].mxu1 %vm285_vm3, %v1676_v35 }
 0x378   :  { %v15448_v36 = vpop.eup %15447  ;;  %14596 = vmatpush3.msra.mxu1 %v16236_v53  ;;  %14597 = vmatprep.mubr.msk.f32.mxu1 %vm15765_vm2, %v19530_v40 }
 0x379   :  { %v1641_v22 = vpop.xlane.xlu1 %1640  ;;  %v1678_v56 = vmul.f32 %v15448_v36, %v16275_v28  ;;  %14605 = vmatprep.subr.mxu1 %v19530_v40 }
 0x37a   :  { %15453 = vrcp.f32 %v1641_v22 }
 0x37b   :  { %4347 = vrot.lane.b32.xlu1 %v15912_v34, %s15770_s13  ;;  %14593 = vmatmul.mubr.msk.f32.vlgmr.msra.gmra.mrb[20].mxu0 %vm285_vm3, %v1678_v56 }
 0x37c   :  { %v15450_v27 = vpop.eup %15449  ;;  %14601 = vmatpush3.msra.mxu0 %v16230_v48  ;;  %14602 = vmatprep.mubr.msk.f32.mxu0 %vm15765_vm2, %v19530_v40 }
 0x37d   :  { %v1644_v53 = vpop.xlane.xlu0 %1643  ;;  %v1680_v45 = vmul.f32 %v15450_v27, %v16280_v61  ;;  %14610 = vmatprep.subr.mxu0 %v19530_v40 }
 0x37e   :  { %15455 = vrcp.f32 %v1644_v53 }
 0x37f   :  { %4575 = vrot.lane.b32.xlu1 %v15920_v39, %s15770_s13  ;;  %14598 = vmatmul.mubr.msk.f32.vlgmr.msra.gmra.mrb[30].mxu1 %vm285_vm3, %v1680_v45 }
 0x380   :  { %v15452_v34 = vpop.eup %15451  ;;  %14606 = vmatpush3.msra.mxu1 %v16242_v60  ;;  %14607 = vmatprep.mubr.msk.f32.mxu1 %vm15765_vm2, %v19530_v40 }
 0x381   :  { %v1647_v48 = vpop.xlane.xlu1 %1646  ;;  %v1682_v28 = vmul.f32 %v15452_v34, %v16285_v8  ;;  %14615 = vmatprep.subr.mxu1 %v19530_v40 }
 0x382   :  { %15457 = vrcp.f32 %v1647_v48 }
 0x383   :  { %4727 = vrot.lane.b32.xlu1 %v15928_v43, %s15770_s13  ;;  %14603 = vmatmul.mubr.msk.f32.vlgmr.msra.gmra.mrb[22].mxu0 %vm285_vm3, %v1682_v28 }
 0x384   :  { %v15454_v39 = vpop.eup %15453  ;;  %14611 = vmatpush3.msra.mxu0 %v16232_v52  ;;  %14612 = vmatprep.mubr.msk.f32.mxu0 %vm15765_vm2, %v19530_v40 }
 0x385   :  { %v1668_v60 = vpop.xlane.xlu0 %1667  ;;  %v1684_v61 = vmul.f32 %v15454_v39, %v16290_v5  ;;  %14620 = vmatprep.subr.mxu0 %v19530_v40 }
 0x387   :  { %4879 = vrot.lane.b32.xlu1 %v15936_v47, %s15770_s13  ;;  %14608 = vmatmul.mubr.msk.f32.vlgmr.msra.gmra.mrb[32].mxu1 %vm285_vm3, %v1684_v61 }
 0x388   :  { %v15456_v8 = vpop.eup %15455  ;;  %14616 = vmatpush3.msra.mxu1 %v16240_v1  ;;  %14617 = vmatprep.mubr.msk.f32.mxu1 %vm15765_vm2, %v19530_v40 }
 0x389   :  { %v1674_v43 = vpop.xlane.xlu0 %1673  ;;  %v1686_v52 = vmul.f32 %v15456_v8, %v16296_v49  ;;  %14625 = vmatprep.subr.mxu1 %v19530_v40  ;;  %v19531_v49 = vld [vmem:[#allocation5_spill] sm:$0xff] }
 0x38a   :  { %v1653_v3 = vpop.xlane.xlu1 %1652 }
 0x38b   :  { %15459 = vrcp.f32 %v1653_v3  ;;  %5031 = vrot.lane.b32.xlu1 %v15944_v51, %s15770_s13  ;;  %14613 = vmatmul.mubr.msk.f32.vlgmr.msra.gmra.mrb[24].mxu0 %vm285_vm3, %v1686_v52  ;;  %v19540_v52 = vld [vmem:[#allocation11_spill] sm:$0xff] }
 0x38c   :  { %v15458_v47 = vpop.eup %15457  ;;  %14621 = vmatpush3.msra.mxu0 %v16244_v0  ;;  %14622 = vmatprep.mubr.msk.f32.mxu0 %vm15765_vm2, %v19530_v40 }
 0x38d   :  { %v1650_v1 = vpop.xlane.xlu0 %1649  ;;  %v1688_v5 = vmul.f32 %v15458_v47, %v16301_v4  ;;  %14630 = vmatprep.subr.mxu0 %v19530_v40 }
 0x38e   :  { %15461 = vrcp.f32 %v1650_v1 }
 0x38f   :  { %14618 = vmatmul.mubr.msk.f32.vlgmr.msra.gmra.mrb[34].mxu1 %vm285_vm3, %v1688_v5 }
 0x390   :  { %14626 = vmatpush3.msra.mxu1 %v19531_v49  ;;  %14627 = vmatprep.mubr.msk.f32.mxu1 %vm15765_vm2, %v19530_v40 }
 0x391   :  { %v1656_v51 = vpop.xlane.xlu0 %1655  ;;  %14635 = vmatprep.subr.mxu1 %v19530_v40 }
 0x392   :  { %15463 = vrcp.f32 %v1656_v51  ;;  %v1659_v0 = vpop.xlane.xlu1 %1658 }
 0x393   :  { %15465 = vrcp.f32 %v1659_v0 }
 0x395   :  { %v15460_v6 = vpop.eup %15459  ;;  %v1662_v12 = vpop.xlane.xlu0 %1661 }
 0x396   :  { %15467 = vrcp.f32 %v1662_v12  ;;  %v1692_v4 = vmul.f32 %v15460_v6, %v16314_v57  ;;  %v3316_v50 = vpop.permute.xlu1 %3315 }
 0x397   :  { %15469 = vrcp.f32 %v1668_v60  ;;  %v19539_v60 = vld [vmem:[#allocation13_spill] sm:$0xff] }
 0x398   :  { %v15462_v15 = vpop.eup %15461  ;;  %14628 = vmatmul.mubr.msk.f32.vlgmr.msra.gmra.mrb[36].mxu1 %vm285_vm3, %v1692_v4  ;;  %15471 = vrcp.f32 %v1674_v43 }
 0x399   :  { %14636 = vmatpush3.msra.mxu1 %v19532_v41  ;;  %v1690_v31 = vmul.f32 %v15462_v15, %v16320_v19  ;;  %14637 = vmatprep.mubr.msk.f32.mxu1 %vm15765_vm2, %v19530_v40 }
 0x39a   :  { %14645 = vmatprep.subr.mxu1 %v19530_v40 }
 0x39b   :  { %14623 = vmatmul.mubr.msk.f32.vlgmr.msra.gmra.mrb[26].mxu0 %vm285_vm3, %v1690_v31 }
 0x39c   :  { %v15464_v26 = vpop.eup %15463  ;;  %14631 = vmatpush3.msra.mxu0 %v19533_v18  ;;  %14632 = vmatprep.mubr.msk.f32.mxu0 %vm15765_vm2, %v19530_v40 }
 0x39d   :  { %v15466_v57 = vpop.eup %15465  ;;  %14640 = vmatprep.subr.mxu0 %v19530_v40  ;;  %v1694_v14 = vmul.f32 %v15464_v26, %v16324_v7  ;;  %v19536_v7 = vld [vmem:[#allocation10_spill] sm:$0xff] }
 0x39e   :  { %v1696_v19 = vmul.f32 %v15466_v57, %v16326_v10 }
 0x39f   :  { %14633 = vmatmul.mubr.msk.f32.vlgmr.msra.gmra.mrb[28].mxu0 %vm285_vm3, %v1694_v14 }
 0x3a0   :  { %v15468_v2 = vpop.eup %15467  ;;  %14638 = vmatmul.mubr.msk.f32.vlgmr.msra.gmra.mrb[38].mxu1 %vm285_vm3, %v1696_v19  ;;  %14641 = vmatpush3.msra.mxu0 %v19534_v13 }
 0x3a1   :  { %14646 = vmatpush3.msra.mxu1 %v19535_v20  ;;  %14642 = vmatprep.mubr.msk.f32.mxu0 %vm15765_vm2, %v19530_v40  ;;  %v1698_v30 = vmul.f32 %v15468_v2, %v16332_v16  ;;  %v15470_v29 = vpop.eup %15469 }
 0x3a2   :  { %14650 = vmatprep.subr.mxu0 %v19530_v40  ;;  %14647 = vmatprep.mubr.msk.f32.mxu1 %vm15765_vm2, %v19530_v40  ;;  %v1702_v10 = vmul.f32 %v15470_v29, %v16307_v11  ;;  %v15472_v16 = vpop.eup %15471  ;;  %v16510_v11 = vpop.permute.xlu0 %3237 }
 0x3a3   :  { %14643 = vmatmul.mubr.msk.f32.vlgmr.msra.gmra.mrb[30].mxu0 %vm285_vm3, %v1698_v30  ;;  %14655 = vmatprep.subr.mxu1 %v19530_v40  ;;  %v1706_v46 = vmul.f32 %v15472_v16, %v16312_v44  ;;  %v3314_v44 = vpop.permute.xlu1 %3313 }
 0x3a4   :  { %14651 = vmatpush3.msra.mxu0 %v19536_v7  ;;  %14652 = vmatprep.mubr.msk.f32.mxu0 %vm15765_vm2, %v19530_v40 }
 0x3a5   :  { %14660 = vmatprep.subr.mxu0 %v19530_v40 }
 0x3a6   :  { %v3236_v32 = vpop.permute.xlu0 %3235 }
 0x3a7   :  { %14653 = vmatmul.mubr.msk.f32.vlgmr.msra.gmra.mrb[32].mxu0 %vm285_vm3, %v1702_v10 }
 0x3a8   :  { %14661 = vmatpush3.msra.mxu0 %v19537_v42  ;;  %14662 = vmatprep.mubr.msk.f32.mxu0 %vm15765_vm2, %v19530_v40 }
 0x3a9   :  { %14670 = vmatprep.subr.mxu0 %v19530_v40 }
 0x3ab   :  { %14663 = vmatmul.mubr.msk.f32.vlgmr.msra.gmra.mrb[34].mxu0 %vm285_vm3, %v1706_v46 }
 0x3ac   :  { %14672 = vmatprep.mubr.msk.f32.mxu0 %vm15765_vm2, %v19530_v40 }
 0x3af   :  { %14671 = vmatpush3.xpose.msk.msra.mxu0 %vm285_vm3, %v19538_v24 }
 0x3b0   :  { %14680 = vmatprep.subr.mxu0 %v19530_v40 }
 0x3b2   :  { %14673 = vmatmul.mubr.msk.f32.vlgmr.msra.gmra.mrb[36].mxu0 %vm285_vm3, %v16344_v23  ;;  %v3472_v23 = vpop.permute.xlu1 %3471 }
 0x3b3   :  { %14681 = vmatpush3.xpose.msk.msra.mxu0 %vm285_vm3, %v16348_v9  ;;  %14682 = vmatprep.mubr.msk.f32.mxu0 %vm15765_vm2, %v19530_v40  ;;  %v3394_v9 = vpop.permute.xlu0 %3393 }
 0x3b4   :  { %14690 = vmatprep.subr.mxu0 %v19530_v40 }
 0x3b6   :  { %14683 = vmatmul.mubr.msk.f32.vlgmr.msra.gmra.mrb[38].mxu0 %vm285_vm3, %v16354_v17 }
 0x3b7   :  { %14691 = vmatpush3.xpose.msk.msra.mxu0 %vm285_vm3, %v3316_v50  ;;  %14692 = vmatprep.mubr.msk.f32.mxu0 %vm15765_vm2, %v19530_v40  ;;  %v3392_v35 = vpop.permute.xlu0 %3391 }
 0x3b8   :  { %14700 = vmatprep.subr.mxu0 %v19530_v40 }
 0x3ba   :  { %14693 = vmatmul.mubr.msk.f32.vlgmr.msra.gmra.mrb[40].mxu0 %vm285_vm3, %v3314_v44 }
 0x3bb   :  { %14701 = vmatpush3.xpose.msk.msra.mxu0 %vm285_vm3, %v3472_v23  ;;  %14702 = vmatprep.mubr.msk.f32.mxu0 %vm15765_vm2, %v19530_v40  ;;  %v3550_v17 = vpop.permute.xlu0 %3549 }
 0x3bc   :  { %14710 = vmatprep.subr.mxu0 %v19530_v40 }
 0x3bf   :  { %v16531_v36 = vpop.permute.xlu0 %3547 }
 0x3c3   :  { %v16533_v27 = vpop.permute.xlu0 %3705 }
 0x3c7   :  { %v16538_v34 = vpop.permute.xlu0 %3703 }
 0x3cb   :  { %v3862_v43 = vpop.permute.xlu0 %3861 }
 0x3cf   :  { %v1665_v22 = vpop.xlane.xlu1 %1664 }
 0x3d0   :  { %15473 = vrcp.f32 %v1665_v22 }
 0x3d3   :  { %v1671_v56 = vpop.xlane.xlu1 %1670 }
 0x3d4   :  { %15475 = vrcp.f32 %v1671_v56 }
 0x3d7   :  { %v3470_v53 = vpop.permute.xlu1 %3469 }
 0x3d8   :  { %14703 = vmatmul.mubr.msk.f32.vlgmr.msra.gmra.mrb[42].mxu0 %vm285_vm3, %v3470_v53 }
 0x3d9   :  { %14712 = vmatprep.mubr.msk.f32.mxu0 %vm15765_vm2, %v19530_v40 }
 0x3da   :  { %v15474_v45 = vpop.eup %15473 }
 0x3db   :  { %v3628_v48 = vpop.permute.xlu1 %3627  ;;  %v1700_v28 = vmul.f32 %v15474_v45, %v16368_v21 }
 0x3dc   :  { %14711 = vmatpush3.xpose.msk.msra.mxu0 %vm285_vm3, %v3628_v48 }
 0x3dd   :  { %14648 = vmatmul.mubr.msk.f32.vlgmr.msra.gmra.mrb[40].mxu1 %vm285_vm3, %v1700_v28  ;;  %14720 = vmatprep.subr.mxu0 %v19530_v40 }
 0x3de   :  { %v15476_v39 = vpop.eup %15475  ;;  %14656 = vmatpush3.msra.mxu1 %v19539_v60  ;;  %14657 = vmatprep.mubr.msk.f32.mxu1 %vm15765_vm2, %v19530_v40 }
 0x3df   :  { %v3626_v61 = vpop.permute.xlu1 %3625  ;;  %v1704_v8 = vmul.f32 %v15476_v39, %v16374_v25  ;;  %14665 = vmatprep.subr.mxu1 %v19530_v40  ;;  %v3860_v25 = vpop.permute.xlu0 %3859 }
 0x3e0   :  { %14713 = vmatmul.mubr.msk.f32.vlgmr.msra.gmra.mrb[44].mxu0 %vm285_vm3, %v3626_v61 }
 0x3e1   :  { %14658 = vmatmul.mubr.msk.f32.vlgmr.msra.gmra.mrb[42].mxu1 %vm285_vm3, %v1704_v8  ;;  %14722 = vmatprep.mubr.msk.f32.mxu0 %vm15765_vm2, %v19530_v40 }
 0x3e2   :  { %14667 = vmatprep.mubr.msk.f32.mxu1 %vm15765_vm2, %v19530_v40 }
 0x3e3   :  { %v3784_v21 = vpop.permute.xlu1 %3783  ;;  %v4018_v1 = vpop.permute.xlu0 %4017 }
 0x3e4   :  { %14721 = vmatpush3.xpose.msk.msra.mxu0 %vm285_vm3, %v3784_v21 }
 0x3e5   :  { %14666 = vmatpush3.xpose.msk.msra.mxu1 %vm285_vm3, %v19540_v52  ;;  %14730 = vmatprep.subr.mxu0 %v19530_v40 }
 0x3e6   :  { %14675 = vmatprep.subr.mxu1 %v19530_v40 }
 0x3e7   :  { %v3782_v3 = vpop.permute.xlu1 %3781 }
 0x3e8   :  { %14668 = vmatmul.mubr.msk.f32.vlgmr.msra.gmra.mrb[44].mxu1 %vm285_vm3, %v16394_v33  ;;  %14723 = vmatmul.mubr.msk.f32.vlgmr.msra.gmra.mrb[46].mxu0 %vm285_vm3, %v3782_v3 }
 0x3e9   :  { %14676 = vmatpush3.xpose.msk.msra.mxu1 %vm285_vm3, %v16400_v37  ;;  %14677 = vmatprep.mubr.msk.f32.mxu1 %vm15765_vm2, %v19530_v40  ;;  %v4016_v37 = vpop.permute.xlu0 %4015 }
 0x3ea   :  { %14685 = vmatprep.subr.mxu1 %v19530_v40  ;;  %14732 = vmatprep.mubr.msk.f32.mxu0 %vm15765_vm2, %v19530_v40 }
 0x3eb   :  { %v3940_v47 = vpop.permute.xlu1 %3939 }
 0x3ec   :  { %14678 = vmatmul.mubr.msk.f32.vlgmr.msra.gmra.mrb[46].mxu1 %vm285_vm3, %v16406_v38  ;;  %14731 = vmatpush3.xpose.msk.msra.mxu0 %vm285_vm3, %v3940_v47 }
 0x3ed   :  { %14686 = vmatpush3.xpose.msk.msra.mxu1 %vm285_vm3, %v16510_v11  ;;  %14687 = vmatprep.mubr.msk.f32.mxu1 %vm15765_vm2, %v19530_v40  ;;  %v4424_v49 = vpop.permute.xlu0 %4423 }
 0x3ee   :  { %14695 = vmatprep.subr.mxu1 %v19530_v40  ;;  %14740 = vmatprep.subr.mxu0 %v19530_v40 }
 0x3ef   :  { %v3938_v33 = vpop.permute.xlu1 %3937 }
 0x3f0   :  { %14688 = vmatmul.mubr.msk.f32.vlgmr.msra.gmra.mrb[48].mxu1 %vm285_vm3, %v3236_v32  ;;  %14733 = vmatmul.mubr.msk.f32.vlgmr.msra.gmra.mrb[48].mxu0 %vm285_vm3, %v3938_v33 }
 0x3f1   :  { %14696 = vmatpush3.xpose.msk.msra.mxu1 %vm285_vm3, %v3394_v9  ;;  %14697 = vmatprep.mubr.msk.f32.mxu1 %vm15765_vm2, %v19530_v40 }
 0x3f2   :  { %14705 = vmatprep.subr.mxu1 %v19530_v40  ;;  %14742 = vmatprep.mubr.msk.f32.mxu0 %vm15765_vm2, %v19530_v40 }
 0x3f3   :  { %v4096_v38 = vpop.permute.xlu1 %4095 }
 0x3f4   :  { %14698 = vmatmul.mubr.msk.f32.vlgmr.msra.gmra.mrb[50].mxu1 %vm285_vm3, %v3392_v35  ;;  %14741 = vmatpush3.xpose.msk.msra.mxu0 %vm285_vm3, %v4096_v38 }
 0x3f5   :  { %14706 = vmatpush3.xpose.msk.msra.mxu1 %vm285_vm3, %v3550_v17  ;;  %14707 = vmatprep.mubr.msk.f32.mxu1 %vm15765_vm2, %v19530_v40 }
 0x3f6   :  { %14715 = vmatprep.subr.mxu1 %v19530_v40  ;;  %14750 = vmatprep.subr.mxu0 %v19530_v40 }
 0x3f7   :  { %v4094_v5 = vpop.permute.xlu1 %4093 }
 0x3f8   :  { %14708 = vmatmul.mubr.msk.f32.vlgmr.msra.gmra.mrb[52].mxu1 %vm285_vm3, %v16531_v36  ;;  %14743 = vmatmul.mubr.msk.f32.vlgmr.msra.gmra.mrb[50].mxu0 %vm285_vm3, %v4094_v5 }
 0x3f9   :  { %14716 = vmatpush3.xpose.msk.msra.mxu1 %vm285_vm3, %v16533_v27  ;;  %14751 = vmatpush3.msra.mxu0 %v4424_v49 }
 0x3fa   :  { %14717 = vmatprep.mubr.msk.f32.mxu1 %vm15765_vm2, %v19530_v40  ;;  %14725 = vmatprep.subr.mxu1 %v19530_v40 }
 0x3fb   :  { %14752 = vmatprep.mubr.msk.f32.mxu0 %vm15765_vm2, %v19530_v40  ;;  %14760 = vmatprep.subr.mxu0 %v19530_v40  ;;  %v4348_v51 = vpop.permute.xlu1 %4347 }
 0x3fc   :  { %14718 = vmatmul.mubr.msk.f32.vlgmr.msra.gmra.mrb[54].mxu1 %vm285_vm3, %v16538_v34 }
 0x3fd   :  { %14726 = vmatpush3.xpose.msk.msra.mxu1 %vm285_vm3, %v3862_v43  ;;  %14727 = vmatprep.mubr.msk.f32.mxu1 %vm15765_vm2, %v19530_v40 }
 0x3fe   :  { %14735 = vmatprep.subr.mxu1 %v19530_v40 }
 0x400   :  { %14728 = vmatmul.mubr.msk.f32.vlgmr.msra.gmra.mrb[56].mxu1 %vm285_vm3, %v3860_v25 }
 0x401   :  { %14736 = vmatpush3.xpose.msk.msra.mxu1 %vm285_vm3, %v4018_v1  ;;  %14737 = vmatprep.mubr.msk.f32.mxu1 %vm15765_vm2, %v19530_v40 }
 0x402   :  { %14745 = vmatprep.subr.mxu1 %v19530_v40 }
 0x404   :  { %14738 = vmatmul.mubr.msk.f32.vlgmr.msra.gmra.mrb[58].mxu1 %vm285_vm3, %v4016_v37 }
 0x405   :  { %14746 = vmatpush3.msra.mxu1 %v4348_v51  ;;  %14747 = vmatprep.mubr.msk.f32.mxu1 %vm15765_vm2, %v19530_v40 }
 0x406   :  { %14755 = vmatprep.subr.mxu1 %v19530_v40 }
 0x44a   :  { %v16620_v0 = vpop.f32.mrb[28].mxu1 }
 0x44b   :  { %v14589_v6 = vpop.f32.mrb[29].mxu1 }
 0x44e   :  { %v16622_v12 = vpop.f32.mrb[20].mxu0 }
 0x44f   :  { %v14594_v4 = vpop.f32.mrb[21].mxu0 }
 0x452   :  { %v16624_v15 = vpop.f32.mrb[30].mxu1 }
 0x453   :  { %v14599_v41 = vpop.f32.mrb[31].mxu1 }
 0x456   :  { %v16626_v31 = vpop.f32.mrb[22].mxu0 }
 0x457   :  { %v14604_v26 = vpop.f32.mrb[23].mxu0 }
 0x45a   :  { %v16628_v18 = vpop.f32.mrb[32].mxu1 }
 0x45b   :  { %v14609_v57 = vpop.f32.mrb[33].mxu1 }
 0x45e   :  { %v16630_v14 = vpop.f32.mrb[24].mxu0 }
 0x45f   :  { %v14614_v19 = vpop.f32.mrb[25].mxu0 }
 0x462   :  { %v16632_v2 = vpop.f32.mrb[34].mxu1 }
 0x463   :  { %v14619_v13 = vpop.f32.mrb[35].mxu1 }
 0x46b   :  { %v16634_v20 = vpop.f32.mrb[36].mxu1 }
 0x46c   :  { %v14629_v30 = vpop.f32.mrb[37].mxu1 }
 0x46e   :  { %v16636_v29 = vpop.f32.mrb[26].mxu0 }
 0x46f   :  { %v14624_v7 = vpop.f32.mrb[27].mxu0 }
 0x472   :  { %v16638_v10 = vpop.f32.mrb[28].mxu0 }
 0x473   :  { %v16640_v16 = vpop.f32.mrb[38].mxu1  ;;  %v14634_v42 = vpop.f32.mrb[29].mxu0 }
 0x474   :  { %v14639_v46 = vpop.f32.mrb[39].mxu1 }
 0x476   :  { %v16642_v50 = vpop.f32.mrb[30].mxu0 }
 0x477   :  { %v14644_v24 = vpop.f32.mrb[31].mxu0 }
 0x47a   :  { %v16644_v11 = vpop.f32.mrb[32].mxu0 }
 0x47b   :  { %v14654_v44 = vpop.f32.mrb[33].mxu0 }
 0x47e   :  { %v16646_v32 = vpop.f32.mrb[34].mxu0 }
 0x47f   :  { %v14664_v23 = vpop.f32.mrb[35].mxu0 }
 0x485   :  { %v16648_v9 = vpop.f32.mrb[36].mxu0 }
 0x486   :  { %v14674_v35 = vpop.f32.mrb[37].mxu0  ;;  %v4174_v17 = vsel %vm285_vm3, %v16648_v9, -inf }
 0x487   :  { %4175 = vmax.xlane.f32.xlu1 %v4174_v17 }
 0x489   :  { %v16652_v36 = vpop.f32.mrb[38].mxu0 }
 0x48a   :  { %v14684_v22 = vpop.f32.mrb[39].mxu0  ;;  %v4180_v49 = vsel %vm285_vm3, %v16652_v36, -inf }
 0x48d   :  { %v16654_v56 = vpop.f32.mrb[40].mxu0 }
 0x48e   :  { %v14694_v27 = vpop.f32.mrb[41].mxu0  ;;  %v4186_v41 = vsel %vm285_vm3, %v16654_v56, -inf }
 0x4ab   :  { %v16656_v53 = vpop.f32.mrb[42].mxu0 }
 0x4ac   :  { %v14704_v45 = vpop.f32.mrb[43].mxu0  ;;  %v4192_v7 = vsel %vm285_vm3, %v16656_v53, -inf }
 0x4b0   :  { %v16658_v34 = vpop.f32.mrb[40].mxu1 }
 0x4b1   :  { %v14649_v48 = vpop.f32.mrb[41].mxu1 }
 0x4b3   :  { %v16660_v28 = vpop.f32.mrb[44].mxu0 }
 0x4b4   :  { %v16662_v39 = vpop.f32.mrb[42].mxu1  ;;  %v14714_v60 = vpop.f32.mrb[45].mxu0  ;;  %v4198_v44 = vsel %vm285_vm3, %v16660_v28, -inf }
 0x4b5   :  { %v14659_v61 = vpop.f32.mrb[43].mxu1 }
 0x4bb   :  { %v16664_v8 = vpop.f32.mrb[44].mxu1  ;;  %v16666_v43 = vpop.f32.mrb[46].mxu0 }
 0x4bc   :  { %v14669_v21 = vpop.f32.mrb[45].mxu1  ;;  %v14724_v52 = vpop.f32.mrb[47].mxu0  ;;  %v4171_v25 = vsel %vm285_vm3, %v16664_v8, -inf  ;;  %v4204_v22 = vsel %vm285_vm3, %v16666_v43, -inf }
 0x4bd   :  { %4172 = vmax.xlane.f32.xlu0 %v4171_v25  ;;  %v16720_v52 = vpop.permute.xlu1 %4575 }
 0x4bf   :  { %v16670_v3 = vpop.f32.mrb[46].mxu1 }
 0x4c0   :  { %v14679_v47 = vpop.f32.mrb[47].mxu1  ;;  %v4177_v1 = vsel %vm285_vm3, %v16670_v3, -inf }
 0x4c1   :  { %4178 = vmax.xlane.f32.xlu0 %v4177_v1  ;;  %v16722_v25 = vpop.permute.xlu1 %4727 }
 0x4c3   :  { %v16674_v33 = vpop.f32.mrb[48].mxu1  ;;  %v16676_v37 = vpop.f32.mrb[48].mxu0 }
 0x4c4   :  { %v14689_v38 = vpop.f32.mrb[49].mxu1  ;;  %v14734_v5 = vpop.f32.mrb[49].mxu0  ;;  %v4183_v51 = vsel %vm285_vm3, %v16674_v33, -inf  ;;  %v4210_v60 = vsel %vm285_vm3, %v16676_v37, -inf }
 0x4c5   :  { %4181 = vmax.xlane.f32.xlu0 %v4180_v49  ;;  %4184 = vmax.xlane.f32.xlu1 %v4183_v51  ;;  %v16724_v47 = vpop.permute.xlu1 %4879 }
 0x4c7   :  { %v16682_v6 = vpop.f32.mrb[50].mxu1 }
 0x4c8   :  { %v14699_v4 = vpop.f32.mrb[51].mxu1  ;;  %v4189_v26 = vsel %vm285_vm3, %v16682_v6, -inf }
 0x4c9   :  { %4187 = vmax.xlane.f32.xlu0 %v4186_v41  ;;  %4190 = vmax.xlane.f32.xlu1 %v4189_v26  ;;  %v16726_v1 = vpop.permute.xlu1 %5031 }
 0x4cb   :  { %v16688_v57 = vpop.f32.mrb[52].mxu1  ;;  %v16690_v19 = vpop.f32.mrb[50].mxu0 }
 0x4cc   :  { %v14709_v13 = vpop.f32.mrb[53].mxu1  ;;  %v14744_v30 = vpop.f32.mrb[51].mxu0  ;;  %v4195_v42 = vsel %vm285_vm3, %v16688_v57, -inf  ;;  %v4216_v21 = vsel %vm285_vm3, %v16690_v19, -inf }
 0x4cd   :  { %4193 = vmax.xlane.f32.xlu0 %v4192_v7  ;;  %4196 = vmax.xlane.f32.xlu1 %v4195_v42 }
 0x4cf   :  { %v16696_v46 = vpop.f32.mrb[54].mxu1 }
 0x4d0   :  { %v14719_v24 = vpop.f32.mrb[55].mxu1  ;;  %v4201_v23 = vsel %vm285_vm3, %v16696_v46, -inf }
 0x4d1   :  { %4199 = vmax.xlane.f32.xlu0 %v4198_v44  ;;  %4202 = vmax.xlane.f32.xlu1 %v4201_v23 }
 0x4d3   :  { %v16702_v35 = vpop.f32.mrb[56].mxu1 }
 0x4d4   :  { %v14729_v17 = vpop.f32.mrb[57].mxu1  ;;  %v4207_v27 = vsel %vm285_vm3, %v16702_v35, -inf }
 0x4d5   :  { %4205 = vmax.xlane.f32.xlu0 %v4204_v22  ;;  %4208 = vmax.xlane.f32.xlu1 %v4207_v27 }
 0x4d7   :  { %v16708_v45 = vpop.f32.mrb[58].mxu1 }
 0x4d8   :  { %v14739_v48 = vpop.f32.mrb[59].mxu1  ;;  %v4213_v61 = vsel %vm285_vm3, %v16708_v45, -inf }
 0x4d9   :  { %4211 = vmax.xlane.f32.xlu0 %v4210_v60  ;;  %4214 = vmax.xlane.f32.xlu1 %v4213_v61 }
 0x4dd   :  { %4217 = vmax.xlane.f32.xlu0 %v4216_v21 }
 0x4ea   :  { %5183 = vrot.lane.b32.xlu1 %v15952_v55, %s15770_s13 }
 0x4f3   :  { %5107 = vrot.lane.b32.xlu0 %v15950_v54, %s15770_s13  ;;  %v16733_v54 = vpop.permute.xlu0 %4499 }
 0x4f7   :  { %v16735_v4 = vpop.permute.xlu0 %4651 }
 0x4fb   :  { %v16739_v41 = vpop.permute.xlu0 %4803 }
 0x4ff   :  { %v16741_v26 = vpop.permute.xlu0 %4955 }
 0x514   :  { %v4176_v38 = vpop.xlane.xlu1 %4175 }
 0x515   :  { %v4220_v5 = vsub.f32 %v16648_v9, %v4176_v38 }
 0x517   :  { %v4237_v49 = vmul.f32 1.442695, %v4220_v5 }
 0x519   :  { %15477 = vpow2.f32 %v4237_v49 }
 0x523   :  { %v16729_v51 = vpop.eup %15477 }
 0x524   :  { %v4270_v55 = vsel %vm285_vm3, %v16729_v51, 0.0 }
 0x525   :  { %4271 = vadd.xlane.f32.xlu0 %v4270_v55 }
 0x53b   :  { %5259 = vrot.lane.b32.xlu0 %v15958_v58, %s15770_s13 }
 0x54a   :  { %v4173_v9 = vpop.xlane.xlu0 %4172 }
 0x54b   :  { %v4219_v13 = vsub.f32 %v16664_v8, %v4173_v9 }
 0x54d   :  { %v4235_v30 = vmul.f32 1.442695, %v4219_v13 }
 0x54e   :  { %v4179_v7 = vpop.xlane.xlu0 %4178 }
 0x54f   :  { %15479 = vpow2.f32 %v4235_v30 }
 0x552   :  { %v4182_v42 = vpop.xlane.xlu0 %4181 }
 0x553   :  { %v4222_v24 = vsub.f32 %v16652_v36, %v4182_v42 }
 0x555   :  { %v4241_v44 = vmul.f32 1.442695, %v4222_v24 }
 0x556   :  { %v4188_v23 = vpop.xlane.xlu0 %4187 }
 0x557   :  { %15481 = vpow2.f32 %v4241_v44  ;;  %v4224_v17 = vsub.f32 %v16654_v56, %v4188_v23 }
 0x559   :  { %v16746_v22 = vpop.eup %15479  ;;  %v4245_v58 = vmul.f32 1.442695, %v4224_v17 }
 0x55a   :  { %v4194_v27 = vpop.xlane.xlu0 %4193  ;;  %v4267_v48 = vsel %vm285_vm3, %v16746_v22, 0.0 }
 0x55b   :  { %15483 = vpow2.f32 %v4245_v58  ;;  %v4226_v8 = vsub.f32 %v16656_v53, %v4194_v27  ;;  %4268 = vadd.xlane.f32.xlu1 %v4267_v48 }
 0x55d   :  { %v4249_v60 = vmul.f32 1.442695, %v4226_v8 }
 0x55e   :  { %v4200_v61 = vpop.xlane.xlu0 %4199 }
 0x55f   :  { %15485 = vpow2.f32 %v4249_v60  ;;  %v4228_v36 = vsub.f32 %v16660_v28, %v4200_v61 }
 0x561   :  { %v16752_v21 = vpop.eup %15481  ;;  %v4253_v38 = vmul.f32 1.442695, %v4228_v36 }
 0x562   :  { %v4206_v56 = vpop.xlane.xlu0 %4205  ;;  %v4276_v5 = vsel %vm285_vm3, %v16752_v21, 0.0 }
 0x563   :  { %15487 = vpow2.f32 %v4253_v38  ;;  %v4230_v49 = vsub.f32 %v16666_v43, %v4206_v56  ;;  %4277 = vadd.xlane.f32.xlu0 %v4276_v5 }
 0x565   :  { %v16757_v55 = vpop.eup %15483  ;;  %v4257_v53 = vmul.f32 1.442695, %v4230_v49 }
 0x566   :  { %v4212_v9 = vpop.xlane.xlu0 %4211  ;;  %v4282_v13 = vsel %vm285_vm3, %v16757_v55, 0.0 }
 0x567   :  { %15489 = vpow2.f32 %v4257_v53  ;;  %v4232_v28 = vsub.f32 %v16676_v37, %v4212_v9  ;;  %4283 = vadd.xlane.f32.xlu0 %v4282_v13  ;;  %v4185_v37 = vpop.xlane.xlu1 %4184 }
 0x568   :  { %v4223_v61 = vsub.f32 %v16674_v33, %v4185_v37 }
 0x569   :  { %v16762_v30 = vpop.eup %15485  ;;  %v4261_v42 = vmul.f32 1.442695, %v4232_v28 }
 0x56a   :  { %v4288_v24 = vsel %vm285_vm3, %v16762_v30, 0.0  ;;  %v4243_v36 = vmul.f32 1.442695, %v4223_v61 }
 0x56b   :  { %15491 = vpow2.f32 %v4261_v42  ;;  %4289 = vadd.xlane.f32.xlu0 %v4288_v24  ;;  %v4191_v48 = vpop.xlane.xlu1 %4190  ;;  %v4218_v24 = vpop.xlane.xlu0 %4217 }
 0x56c   :  { %5335 = vrot.lane.b32.xlu1 %v15960_v59, %s15770_s13  ;;  %v4221_v59 = vsub.f32 %v16670_v3, %v4179_v7  ;;  %v4225_v38 = vsub.f32 %v16682_v6, %v4191_v48  ;;  %v4234_v37 = vsub.f32 %v16690_v19, %v4218_v24 }
 0x56d   :  { %v16768_v43 = vpop.eup %15487 }
 0x56e   :  { %v4294_v44 = vsel %vm285_vm3, %v16768_v43, 0.0  ;;  %v4239_v60 = vmul.f32 1.442695, %v4221_v59  ;;  %v4247_v5 = vmul.f32 1.442695, %v4225_v38 }
 0x56f   :  { %4295 = vadd.xlane.f32.xlu0 %v4294_v44  ;;  %v4197_v8 = vpop.xlane.xlu1 %4196  ;;  %v4265_v48 = vmul.f32 1.442695, %v4234_v37 }
 0x570   :  { %15493 = vpow2.f32 %v4239_v60  ;;  %v4227_v49 = vsub.f32 %v16688_v57, %v4197_v8 }
 0x571   :  { %v16772_v23 = vpop.eup %15489  ;;  %15495 = vpow2.f32 %v4243_v36 }
 0x572   :  { %v4300_v17 = vsel %vm285_vm3, %v16772_v23, 0.0  ;;  %15497 = vpow2.f32 %v4247_v5  ;;  %v4251_v9 = vmul.f32 1.442695, %v4227_v49  ;;  %v16822_v5 = vpop.permute.xlu0 %5107 }
 0x573   :  { %4301 = vadd.xlane.f32.xlu0 %v4300_v17  ;;  %v4203_v56 = vpop.xlane.xlu1 %4202 }
 0x574   :  { %v4229_v13 = vsub.f32 %v16696_v46, %v4203_v56  ;;  %15499 = vpow2.f32 %v4251_v9 }
 0x575   :  { %v16776_v58 = vpop.eup %15491 }
 0x576   :  { %v4306_v27 = vsel %vm285_vm3, %v16776_v58, 0.0  ;;  %v4255_v3 = vmul.f32 1.442695, %v4229_v13 }
 0x577   :  { %4307 = vadd.xlane.f32.xlu0 %v4306_v27  ;;  %v4209_v53 = vpop.xlane.xlu1 %4208 }
 0x578   :  { %v4231_v33 = vsub.f32 %v16702_v35, %v4209_v53  ;;  %15501 = vpow2.f32 %v4255_v3 }
 0x57a   :  { %v16785_v28 = vpop.eup %15493  ;;  %v4259_v57 = vmul.f32 1.442695, %v4231_v33 }
 0x57b   :  { %v4215_v6 = vpop.xlane.xlu1 %4214  ;;  %v4273_v7 = vsel %vm285_vm3, %v16785_v28, 0.0  ;;  %v16792_v42 = vpop.eup %15495 }
 0x57c   :  { %v4233_v46 = vsub.f32 %v16708_v45, %v4215_v6  ;;  %v4279_v44 = vsel %vm285_vm3, %v16792_v42, 0.0  ;;  %15503 = vpow2.f32 %v4259_v57 }
 0x57e   :  { %v4263_v35 = vmul.f32 1.442695, %v4233_v46 }
 0x57f   :  { %v5184_v13 = vpop.permute.xlu1 %5183 }
 0x580   :  { %15505 = vpow2.f32 %v4263_v35 }
 0x581   :  { %15507 = vpow2.f32 %v4265_v48 }
 0x58d   :  { %5411 = vrot.lane.b32.xlu0 %v15966_v62, %s15770_s13  ;;  %v16797_v62 = vpop.eup %15497 }
 0x58e   :  { %v4285_v17 = vsel %vm285_vm3, %v16797_v62, 0.0  ;;  %v16802_v27 = vpop.eup %15499 }
 0x58f   :  { %v4291_v45 = vsel %vm285_vm3, %v16802_v27, 0.0  ;;  %v16806_v59 = vpop.eup %15501 }
 0x590   :  { %4274 = vadd.xlane.f32.xlu1 %v4273_v7  ;;  %v4297_v8 = vsel %vm285_vm3, %v16806_v59, 0.0  ;;  %v16810_v60 = vpop.eup %15503 }
 0x591   :  { %v4303_v19 = vsel %vm285_vm3, %v16810_v60, 0.0  ;;  %v16814_v61 = vpop.eup %15505 }
 0x592   :  { %v4309_v36 = vsel %vm285_vm3, %v16814_v61, 0.0  ;;  %v16818_v38 = vpop.eup %15507 }
 0x593   :  { %v4312_v56 = vsel %vm285_vm3, %v16818_v38, 0.0 }
 0x594   :  { %4280 = vadd.xlane.f32.xlu1 %v4279_v44 }
 0x598   :  { %4286 = vadd.xlane.f32.xlu1 %v4285_v17 }
 0x59c   :  { %4292 = vadd.xlane.f32.xlu1 %v4291_v45 }
 0x5a0   :  { %4298 = vadd.xlane.f32.xlu1 %v4297_v8 }
 0x5a4   :  { %4304 = vadd.xlane.f32.xlu1 %v4303_v19 }
 0x5a8   :  { %4310 = vadd.xlane.f32.xlu1 %v4309_v36 }
 0x5ac   :  { %4313 = vadd.xlane.f32.xlu1 %v4312_v56 }
 0x5b2   :  { %v4272_v49 = vpop.xlane.xlu0 %4271 }
 0x5b3   :  { %15509 = vrcp.f32 %v4272_v49 }
 0x5b6   :  { %v16832_v33 = vpop.permute.xlu0 %5259 }
 0x5bd   :  { %v15510_v53 = vpop.eup %15509  ;;  %5487 = vrot.lane.b32.xlu1 %v15968_v63, %s15770_s13 }
 0x5be   :  { %v4318_v9 = vmul.f32 %v15510_v53, %v16729_v51 }
 0x5c0   :  { %14753 = vmatmul.mubr.msk.f32.vlgmr.msra.gmra.mrb[52].mxu0 %vm285_vm3, %v4318_v9 }
 0x5c1   :  { %14761 = vmatpush3.msra.mxu0 %v16720_v52  ;;  %14762 = vmatprep.mubr.msk.f32.mxu0 %vm15765_vm2, %v19530_v40 }
 0x5c2   :  { %14770 = vmatprep.subr.mxu0 %v19530_v40 }
 0x5e8   :  { %v4269_v3 = vpop.xlane.xlu1 %4268 }
 0x5e9   :  { %15511 = vrcp.f32 %v4269_v3 }
 0x5ec   :  { %v5336_v17 = vpop.permute.xlu1 %5335 }
 0x5f0   :  { %v4278_v6 = vpop.xlane.xlu0 %4277 }
 0x5f1   :  { %15513 = vrcp.f32 %v4278_v6 }
 0x5f3   :  { %v15512_v7 = vpop.eup %15511 }
 0x5f4   :  { %v4284_v63 = vpop.xlane.xlu0 %4283  ;;  %v4316_v51 = vmul.f32 %v15512_v7, %v16746_v22 }
 0x5f5   :  { %15515 = vrcp.f32 %v4284_v63 }
 0x5f6   :  { %14748 = vmatmul.mubr.msk.f32.vlgmr.msra.gmra.mrb[60].mxu1 %vm285_vm3, %v4316_v51 }
 0x5f7   :  { %14756 = vmatpush3.msra.mxu1 %v16733_v54  ;;  %14757 = vmatprep.mubr.msk.f32.mxu1 %vm15765_vm2, %v19530_v40 }
 0x5f8   :  { %v4290_v52 = vpop.xlane.xlu0 %4289  ;;  %14765 = vmatprep.subr.mxu1 %v19530_v40 }
 0x5f9   :  { %15517 = vrcp.f32 %v4290_v52  ;;  %v39_v52 = vld [vmem:[%s19461_s1 + $0x30] sm:$0xff] }
 0x5fb   :  { %v15514_v57 = vpop.eup %15513 }
 0x5fc   :  { %v4296_v46 = vpop.xlane.xlu0 %4295  ;;  %v4322_v24 = vmul.f32 %v15514_v57, %v16752_v21 }
 0x5fd   :  { %15519 = vrcp.f32 %v4296_v46 }
 0x5fe   :  { %14763 = vmatmul.mubr.msk.f32.vlgmr.msra.gmra.mrb[54].mxu0 %vm285_vm3, %v4322_v24 }
 0x5ff   :  { %v15516_v22 = vpop.eup %15515  ;;  %14771 = vmatpush3.msra.mxu0 %v16722_v25  ;;  %14772 = vmatprep.mubr.msk.f32.mxu0 %vm15765_vm2, %v19530_v40 }
 0x600   :  { %v4302_v54 = vpop.xlane.xlu0 %4301  ;;  %14780 = vmatprep.subr.mxu0 %v19530_v40  ;;  %v4326_v44 = vmul.f32 %v15516_v22, %v16757_v55 }
 0x601   :  { %15521 = vrcp.f32 %v4302_v54 }
 0x602   :  { %14773 = vmatmul.mubr.msk.f32.vlgmr.msra.gmra.mrb[56].mxu0 %vm285_vm3, %v4326_v44 }
 0x603   :  { %v15518_v35 = vpop.eup %15517  ;;  %14781 = vmatpush3.msra.mxu0 %v16724_v47  ;;  %14782 = vmatprep.mubr.msk.f32.mxu0 %vm15765_vm2, %v19530_v40 }
 0x604   :  { %v4308_v21 = vpop.xlane.xlu0 %4307  ;;  %14790 = vmatprep.subr.mxu0 %v19530_v40  ;;  %v4330_v25 = vmul.f32 %v15518_v35, %v16762_v30 }
 0x605   :  { %15523 = vrcp.f32 %v4308_v21 }
 0x606   :  { %14783 = vmatmul.mubr.msk.f32.vlgmr.msra.gmra.mrb[58].mxu0 %vm285_vm3, %v4330_v25 }
 0x607   :  { %v15520_v37 = vpop.eup %15519  ;;  %14791 = vmatpush3.msra.mxu0 %v16726_v1  ;;  %14792 = vmatprep.mubr.msk.f32.mxu0 %vm15765_vm2, %v19530_v40 }
 0x608   :  { %14800 = vmatprep.subr.mxu0 %v19530_v40  ;;  %v4334_v47 = vmul.f32 %v15520_v37, %v16768_v43  ;;  %v5412_v6 = vpop.permute.xlu0 %5411 }
 0x60a   :  { %14793 = vmatmul.mubr.msk.f32.vlgmr.msra.gmra.mrb[60].mxu0 %vm285_vm3, %v4334_v47 }
 0x60b   :  { %v15522_v55 = vpop.eup %15521  ;;  %14801 = vmatpush3.msra.mxu0 %v5184_v13  ;;  %14802 = vmatprep.mubr.msk.f32.mxu0 %vm15765_vm2, %v19530_v40 }
 0x60c   :  { %14810 = vmatprep.subr.mxu0 %v19530_v40  ;;  %v4338_v30 = vmul.f32 %v15522_v55, %v16772_v23 }
 0x60e   :  { %14803 = vmatmul.mubr.msk.f32.vlgmr.msra.gmra.mrb[62].mxu0 %vm285_vm3, %v4338_v30 }
 0x60f   :  { %v15524_v1 = vpop.eup %15523  ;;  %14811 = vmatpush3.msra.mxu0 %v5336_v17  ;;  %14812 = vmatprep.mubr.msk.f32.mxu0 %vm15765_vm2, %v19530_v40 }
 0x610   :  { %v4342_v43 = vmul.f32 %v15524_v1, %v16776_v58  ;;  %14820 = vmatprep.subr.mxu0 %v19530_v40 }
 0x612   :  { %14813 = vmatmul.mubr.msk.f32.vlgmr.msra.gmra.mrb[64].mxu0 %vm285_vm3, %v4342_v43 }
 0x613   :  { %14822 = vmatprep.mubr.msk.f32.mxu0 %vm15765_vm2, %v19530_v40 }
 0x61d   :  { %v4275_v48 = vpop.xlane.xlu1 %4274 }
 0x61e   :  { %15525 = vrcp.f32 %v4275_v48 }
 0x621   :  { %v4281_v23 = vpop.xlane.xlu1 %4280 }
 0x622   :  { %15527 = vrcp.f32 %v4281_v23 }
 0x625   :  { %v4287_v45 = vpop.xlane.xlu1 %4286 }
 0x626   :  { %15529 = vrcp.f32 %v4287_v45 }
 0x628   :  { %v15526_v8 = vpop.eup %15525 }
 0x629   :  { %v4293_v19 = vpop.xlane.xlu1 %4292  ;;  %v4320_v36 = vmul.f32 %v15526_v8, %v16785_v28 }
 0x62a   :  { %15531 = vrcp.f32 %v4293_v19 }
 0x62b   :  { %14758 = vmatmul.mubr.msk.f32.vlgmr.msra.gmra.mrb[62].mxu1 %vm285_vm3, %v4320_v36 }
 0x62c   :  { %v15528_v58 = vpop.eup %15527  ;;  %14766 = vmatpush3.msra.mxu1 %v16735_v4  ;;  %14767 = vmatprep.mubr.msk.f32.mxu1 %vm15765_vm2, %v19530_v40 }
 0x62d   :  { %v4299_v56 = vpop.xlane.xlu1 %4298  ;;  %14775 = vmatprep.subr.mxu1 %v19530_v40  ;;  %v4324_v49 = vmul.f32 %v15528_v58, %v16792_v42 }
 0x62e   :  { %15533 = vrcp.f32 %v4299_v56 }
 0x62f   :  { %14768 = vmatmul.mubr.msk.f32.vlgmr.msra.gmra.mrb[64].mxu1 %vm285_vm3, %v4324_v49 }
 0x630   :  { %v15530_v53 = vpop.eup %15529  ;;  %14776 = vmatpush3.msra.mxu1 %v16739_v41  ;;  %14777 = vmatprep.mubr.msk.f32.mxu1 %vm15765_vm2, %v19530_v40 }
 0x631   :  { %v4305_v28 = vpop.xlane.xlu1 %4304  ;;  %14785 = vmatprep.subr.mxu1 %v19530_v40  ;;  %v4328_v4 = vmul.f32 %v15530_v53, %v16797_v62 }
 0x632   :  { %15535 = vrcp.f32 %v4305_v28 }
 0x633   :  { %14778 = vmatmul.mubr.msk.f32.vlgmr.msra.gmra.mrb[66].mxu1 %vm285_vm3, %v4328_v4 }
 0x634   :  { %v15532_v9 = vpop.eup %15531  ;;  %14786 = vmatpush3.msra.mxu1 %v16741_v26  ;;  %14787 = vmatprep.mubr.msk.f32.mxu1 %vm15765_vm2, %v19530_v40 }
 0x635   :  { %v4311_v42 = vpop.xlane.xlu1 %4310  ;;  %14795 = vmatprep.subr.mxu1 %v19530_v40  ;;  %v4332_v41 = vmul.f32 %v15532_v9, %v16802_v27 }
 0x636   :  { %15537 = vrcp.f32 %v4311_v42 }
 0x637   :  { %14788 = vmatmul.mubr.msk.f32.vlgmr.msra.gmra.mrb[68].mxu1 %vm285_vm3, %v4332_v41 }
 0x638   :  { %v15534_v13 = vpop.eup %15533  ;;  %14796 = vmatpush3.msra.mxu1 %v16822_v5  ;;  %14797 = vmatprep.mubr.msk.f32.mxu1 %vm15765_vm2, %v19530_v40 }
 0x639   :  { %v4314_v62 = vpop.xlane.xlu1 %4313  ;;  %14805 = vmatprep.subr.mxu1 %v19530_v40  ;;  %v4336_v26 = vmul.f32 %v15534_v13, %v16806_v59 }
 0x63a   :  { %15539 = vrcp.f32 %v4314_v62 }
 0x63b   :  { %14798 = vmatmul.mubr.msk.f32.vlgmr.msra.gmra.mrb[70].mxu1 %vm285_vm3, %v4336_v26 }
 0x63c   :  { %v15536_v3 = vpop.eup %15535  ;;  %14806 = vmatpush3.msra.mxu1 %v16832_v33  ;;  %14807 = vmatprep.mubr.msk.f32.mxu1 %vm15765_vm2, %v19530_v40 }
 0x63d   :  { %v5488_v27 = vpop.permute.xlu1 %5487  ;;  %14815 = vmatprep.subr.mxu1 %v19530_v40  ;;  %v4340_v5 = vmul.f32 %v15536_v3, %v16810_v60 }
 0x63e   :  { %14821 = vmatpush3.msra.mxu0 %v5488_v27 }
 0x63f   :  { %14808 = vmatmul.mubr.msk.f32.vlgmr.msra.gmra.mrb[72].mxu1 %vm285_vm3, %v4340_v5 }
 0x640   :  { %v15538_v7 = vpop.eup %15537  ;;  %14816 = vmatpush3.msra.mxu1 %v5412_v6  ;;  %14817 = vmatprep.mubr.msk.f32.mxu1 %vm15765_vm2, %v19530_v40 }
 0x641   :  { %v4344_v59 = vmul.f32 %v15538_v7, %v16814_v61  ;;  %v40_v61 = vld [vmem:[%s19461_s1 + $0x38] sm:$0xff] }
 0x642   :  { %v15335_v57 = vpack.c.bf16 %v40_v61, %v39_v52 }
 0x643   :  { %14818 = vmatmul.mubr.msk.f32.vlgmr.msra.gmra.mrb[74].mxu1 %vm285_vm3, %v4344_v59 }
 0x644   :  { %v15540_v33 = vpop.eup %15539  ;;  %15337 = vmatprep.subr.msk.bf16.mxu1 %vm15805_vm1, %v15335_v57 }
 0x645   :  { %v4346_v63 = vmul.f32 %v15540_v33, %v16818_v38 }
 0x647   :  { %14823 = vmatmul.mubr.msk.f32.vlgmr.msra.gmra.mrb[66].mxu0 %vm285_vm3, %v4346_v63  ;;  %15340 = vmatpush3.bf16.xpose.msk.msra.mxu1 %vm15805_vm1, %v15335_v57 }
 0x693   :  { %v4495_v51 = vpop.f32.mrb[52].mxu0 }
 0x694   :  { %v14754_v60 = vpop.f32.mrb[53].mxu0  ;;  %5581 = vrot.lane.b32.xlu1 %v4495_v51, %s15771_s14 }
 0x6c9   :  { %v4419_v38 = vpop.f32.mrb[60].mxu1 }
 0x6ca   :  { %5579 = vrot.lane.b32.xlu0 %v4419_v38, %s15771_s14  ;;  %v14749_v24 = vpop.f32.mrb[61].mxu1 }
 0x6d1   :  { %v4647_v22 = vpop.f32.mrb[54].mxu0 }
 0x6d2   :  { %v14764_v54 = vpop.f32.mrb[55].mxu0  ;;  %5585 = vrot.lane.b32.xlu1 %v4647_v22, %s15771_s14 }
 0x6d5   :  { %v4799_v44 = vpop.f32.mrb[56].mxu0 }
 0x6d6   :  { %v14774_v35 = vpop.f32.mrb[57].mxu0  ;;  %5589 = vrot.lane.b32.xlu1 %v4799_v44, %s15771_s14 }
 0x6d9   :  { %v4951_v21 = vpop.f32.mrb[58].mxu0 }
 0x6da   :  { %v14784_v25 = vpop.f32.mrb[59].mxu0  ;;  %5593 = vrot.lane.b32.xlu1 %v4951_v21, %s15771_s14 }
 0x6dd   :  { %v5103_v37 = vpop.f32.mrb[60].mxu0 }
 0x6de   :  { %v14794_v47 = vpop.f32.mrb[61].mxu0  ;;  %5597 = vrot.lane.b32.xlu1 %v5103_v37, %s15771_s14  ;;  %v15746_v37 = vld [vmem:[%s19462_s0 + $0x8] sm:$0xff] }
 0x6e1   :  { %v5255_v55 = vpop.f32.mrb[62].mxu0 }
 0x6e2   :  { %5601 = vrot.lane.b32.xlu1 %v5255_v55, %s15771_s14  ;;  %v14804_v30 = vpop.f32.mrb[63].mxu0  ;;  %v15747_v55 = vld [vmem:[%s19462_s0] sm:$0xff] }
 0x6e5   :  { %v5407_v17 = vpop.f32.mrb[64].mxu0 }
 0x6e6   :  { %5605 = vrot.lane.b32.xlu1 %v5407_v17, %s15771_s14  ;;  %v14814_v1 = vpop.f32.mrb[65].mxu0 }
 0x6fe   :  { %v4571_v43 = vpop.f32.mrb[62].mxu1 }
 0x6ff   :  { %5583 = vrot.lane.b32.xlu0 %v4571_v43, %s15771_s14  ;;  %v14759_v48 = vpop.f32.mrb[63].mxu1 }
 0x702   :  { %v4723_v23 = vpop.f32.mrb[64].mxu1 }
 0x703   :  { %5587 = vrot.lane.b32.xlu0 %v4723_v23, %s15771_s14  ;;  %v14769_v45 = vpop.f32.mrb[65].mxu1 }
 0x706   :  { %v4875_v8 = vpop.f32.mrb[66].mxu1  ;;  %v5582_v13 = vpop.permute.xlu1 %5581 }
 0x707   :  { %5591 = vrot.lane.b32.xlu0 %v4875_v8, %s15771_s14  ;;  %v14779_v19 = vpop.f32.mrb[67].mxu1  ;;  %v5628_v3 = vsel %vm285_vm3, %v16622_v12, %v5582_v13  ;;  %v15748_v8 = vld [vmem:[%s19462_s0 + $0x10] sm:$0xff] }
 0x70a   :  { %v5027_v36 = vpop.f32.mrb[68].mxu1 }
 0x70b   :  { %5595 = vrot.lane.b32.xlu0 %v5027_v36, %s15771_s14  ;;  %v14789_v58 = vpop.f32.mrb[69].mxu1 }
 0x70c   :  { %v15749_v58 = vld [vmem:[%s19462_s0 + $0x18] sm:$0xff] }
 0x70e   :  { %v5179_v56 = vpop.f32.mrb[70].mxu1 }
 0x70f   :  { %5599 = vrot.lane.b32.xlu0 %v5179_v56, %s15771_s14  ;;  %v14799_v49 = vpop.f32.mrb[71].mxu1 }
 0x712   :  { %v5331_v53 = vpop.f32.mrb[72].mxu1 }
 0x713   :  { %5603 = vrot.lane.b32.xlu0 %v5331_v53, %s15771_s14  ;;  %v14809_v28 = vpop.f32.mrb[73].mxu1 }
 0x716   :  { %v5483_v4 = vpop.f32.mrb[74].mxu1 }
 0x717   :  { %5607 = vrot.lane.b32.xlu0 %v5483_v4, %s15771_s14  ;;  %v14819_v9 = vpop.f32.mrb[75].mxu1 }
 0x718   :  { %v15750_v9 = vld [vmem:[%s19462_s0 + $0x20] sm:$0xff] }
 0x71a   :  { %v5559_v42 = vpop.f32.mrb[66].mxu0 }
 0x71b   :  { %5609 = vrot.lane.b32.xlu1 %v5559_v42, %s15771_s14  ;;  %v14824_v41 = vpop.f32.mrb[67].mxu0 }
 0x73c   :  { %v5580_v62 = vpop.permute.xlu0 %5579 }
 0x73d   :  { %v5627_v26 = vsel %vm285_vm3, %v16620_v0, %v5580_v62 }
 0x73e   :  { %14829 = vmatprep.mubr.msk.f32.mxu1 %vm54_vm0, %v5627_v26  ;;  %v15751_v26 = vld [vmem:[%s19462_s0 + $0x28] sm:$0xff] }
 0x73f   :  { %14830 = vmatmul.mubr.msk.f32.vlgmr.msra.gmra.mrb[76].mxu1 %vm54_vm0, %v5628_v3 }
 0x744   :  { %v5586_v27 = vpop.permute.xlu1 %5585 }
 0x745   :  { %v5630_v33 = vsel %vm285_vm3, %v16626_v31, %v5586_v27 }
 0x748   :  { %v5590_v5 = vpop.permute.xlu1 %5589 }
 0x749   :  { %v5632_v63 = vsel %vm285_vm3, %v16630_v14, %v5590_v5 }
 0x74c   :  { %v5594_v7 = vpop.permute.xlu1 %5593 }
 0x74d   :  { %v5634_v60 = vsel %vm285_vm3, %v16636_v29, %v5594_v7  ;;  %v15752_v7 = vld [vmem:[%s19462_s0 + $0x30] sm:$0xff] }
 0x750   :  { %v5598_v51 = vpop.permute.xlu1 %5597 }
 0x751   :  { %v5636_v61 = vsel %vm285_vm3, %v16638_v10, %v5598_v51 }
 0x754   :  { %v5602_v52 = vpop.permute.xlu1 %5601 }
 0x755   :  { %v5638_v57 = vsel %vm285_vm3, %v16642_v50, %v5602_v52 }
 0x758   :  { %v5606_v38 = vpop.permute.xlu1 %5605 }
 0x759   :  { %v5640_v24 = vsel %vm285_vm3, %v16644_v11, %v5606_v38  ;;  %v16990_v11 = vld [vmem:[%s19463_s2] sm:$0xff] }
 0x771   :  { %v5584_v6 = vpop.permute.xlu0 %5583 }
 0x772   :  { %v5629_v59 = vsel %vm285_vm3, %v16624_v15, %v5584_v6 }
 0x773   :  { %14832 = vmatprep.mubr.msk.f32.mxu1 %vm54_vm0, %v5629_v59 }
 0x774   :  { %14833 = vmatmul.mubr.msk.f32.gmra.mrb[78].mxu1 %vm54_vm0, %v5630_v33 }
 0x775   :  { %v5588_v0 = vpop.permute.xlu0 %5587 }
 0x776   :  { %v5631_v12 = vsel %vm285_vm3, %v16628_v18, %v5588_v0 }
 0x777   :  { %14835 = vmatprep.mubr.msk.f32.mxu1 %vm54_vm0, %v5631_v12 }
 0x778   :  { %14836 = vmatmul.mubr.msk.f32.gmra.mrb[80].mxu1 %vm54_vm0, %v5632_v63  ;;  %v15753_v63 = vld [vmem:[%s19462_s0 + $0x38] sm:$0xff] }
 0x779   :  { %v5592_v15 = vpop.permute.xlu0 %5591 }
 0x77a   :  { %v5633_v31 = vsel %vm285_vm3, %v16632_v2, %v5592_v15 }
 0x77b   :  { %14838 = vmatprep.mubr.msk.f32.mxu1 %vm54_vm0, %v5633_v31 }
 0x77c   :  { %14839 = vmatmul.mubr.msk.f32.gmra.mrb[82].mxu1 %vm54_vm0, %v5634_v60 }
 0x77d   :  { %v5596_v18 = vpop.permute.xlu0 %5595 }
 0x77e   :  { %v5635_v14 = vsel %vm285_vm3, %v16634_v20, %v5596_v18  ;;  %v15754_v18 = vld [vmem:[%s19462_s0 + $0x40] sm:$0xff] }
 0x77f   :  { %14841 = vmatprep.mubr.msk.f32.mxu1 %vm54_vm0, %v5635_v14 }
 0x780   :  { %14842 = vmatmul.mubr.msk.f32.gmra.mrb[84].mxu1 %vm54_vm0, %v5636_v61  ;;  %v15755_v61 = vld [vmem:[%s19462_s0 + $0x48] sm:$0xff] }
 0x781   :  { %v5600_v2 = vpop.permute.xlu0 %5599 }
 0x782   :  { %v5637_v29 = vsel %vm285_vm3, %v16640_v16, %v5600_v2 }
 0x783   :  { %14844 = vmatprep.mubr.msk.f32.mxu1 %vm54_vm0, %v5637_v29 }
 0x784   :  { %14845 = vmatmul.mubr.msk.f32.gmra.mrb[86].mxu1 %vm54_vm0, %v5638_v57 }
 0x785   :  { %v5604_v20 = vpop.permute.xlu0 %5603 }
 0x786   :  { %v5639_v10 = vsel %vm285_vm3, %v16658_v34, %v5604_v20  ;;  %v19542_v34 = vld [vmem:[#allocation3_spill] sm:$0xff] }
 0x787   :  { %14847 = vmatprep.mubr.msk.f32.mxu1 %vm54_vm0, %v5639_v10  ;;  %v16985_v44 = vsub.s32 1, %v19542_v34 }
 0x788   :  { %14848 = vmatmul.mubr.msk.f32.gmra.mrb[88].mxu1 %vm54_vm0, %v5640_v24  ;;  %v15756_v24 = vld [vmem:[%s19462_s0 + $0x50] sm:$0xff] }
 0x789   :  { %v5608_v16 = vpop.permute.xlu0 %5607  ;;  %19543 = vst [vmem:[#allocation5_spill] sm:$0xff] %v16985_v44  ;;  %v16994_v35 = vrot.slane %v16990_v11, %v16985_v44 }
 0x78a   :  { %v5641_v50 = vsel %vm285_vm3, %v16662_v39, %v5608_v16 }
 0x78b   :  { %14850 = vmatprep.mubr.msk.f32.mxu1 %vm54_vm0, %v5641_v50 }
 0x78d   :  { %v5610_v22 = vpop.permute.xlu1 %5609 }
 0x78e   :  { %v5642_v54 = vsel %vm285_vm3, %v16646_v32, %v5610_v22 }
 0x78f   :  { %14851 = vmatmul.mubr.msk.f32.gmra.mrb[90].mxu1 %vm54_vm0, %v5642_v54 }
 0x812   :  { %v14831_v39 = vpop.f32.mrb[76].mxu1 }
 0x813   :  { %v5773_v21 = vadd.f32 %v14831_v39, %v16994_v35  ;;  %v5767_v25 = vpop.f32.mrb[77].mxu1  ;;  %v15757_v39 = vld [vmem:[%s19462_s0 + $0x58] sm:$0xff] }
 0x814   :  { %v5768_v32 = vadd.f32 %v5767_v25, %v16994_v35 }
 0x815   :  { %v17001_v47 = vadd.f32 %v15746_v37, %v5773_v21 }
 0x816   :  { %v17006_v30 = vadd.f32 %v15747_v55, %v5768_v32  ;;  %v15758_v55 = vld [vmem:[%s19462_s0 + $0x60] sm:$0xff] }
 0x817   :  { %v5865_v17 = vsel %vm54_vm0, %v17001_v47, 0.0 }
 0x818   :  { %5866 = vadd.xlane.f32.xlu1 %v5865_v17  ;;  %v5862_v1 = vsel %vm54_vm0, %v17006_v30, 0.0 }
 0x819   :  { %5863 = vadd.xlane.f32.xlu0 %v5862_v1  ;;  %v15759_v1 = vld [vmem:[%s19462_s0 + $0x68] sm:$0xff] }
 0x847   :  { %v14834_v43 = vpop.f32.mrb[78].mxu1 }
 0x848   :  { %v5783_v48 = vadd.f32 %v14834_v43, %v16994_v35  ;;  %v5777_v23 = vpop.f32.mrb[79].mxu1 }
 0x849   :  { %v5778_v45 = vadd.f32 %v5777_v23, %v16994_v35 }
 0x84a   :  { %v17022_v56 = vadd.f32 %v15749_v58, %v5783_v48 }
 0x84b   :  { %v17017_v19 = vadd.f32 %v15748_v8, %v5778_v45  ;;  %v14837_v36 = vpop.f32.mrb[80].mxu1 }
 0x84c   :  { %v5787_v49 = vpop.f32.mrb[81].mxu1  ;;  %v5793_v53 = vadd.f32 %v14837_v36, %v16994_v35  ;;  %v5871_v62 = vsel %vm54_vm0, %v17022_v56, 0.0 }
 0x84d   :  { %v5788_v28 = vadd.f32 %v5787_v49, %v16994_v35  ;;  %v5868_v4 = vsel %vm54_vm0, %v17017_v19, 0.0  ;;  %v15760_v49 = vld [vmem:[%s19462_s0 + $0x78] sm:$0xff] }
 0x84e   :  { %5869 = vadd.xlane.f32.xlu0 %v5868_v4  ;;  %v17038_v3 = vadd.f32 %v15751_v26, %v5793_v53  ;;  %v15761_v4 = vld [vmem:[%s19462_s0 + $0x70] sm:$0xff] }
 0x84f   :  { %v17031_v42 = vadd.f32 %v15750_v9, %v5788_v28  ;;  %v14840_v41 = vpop.f32.mrb[82].mxu1 }
 0x850   :  { %v5797_v13 = vpop.f32.mrb[83].mxu1  ;;  %v5803_v27 = vadd.f32 %v14840_v41, %v16994_v35  ;;  %v5877_v60 = vsel %vm54_vm0, %v17038_v3, 0.0 }
 0x851   :  { %v5798_v5 = vadd.f32 %v5797_v13, %v16994_v35  ;;  %v5874_v6 = vsel %vm54_vm0, %v17031_v42, 0.0 }
 0x852   :  { %5875 = vadd.xlane.f32.xlu1 %v5874_v6  ;;  %5872 = vadd.xlane.f32.xlu0 %v5871_v62  ;;  %v17053_v51 = vadd.f32 %v15753_v63, %v5803_v27 }
 0x853   :  { %v17047_v59 = vadd.f32 %v15752_v7, %v5798_v5  ;;  %v14843_v33 = vpop.f32.mrb[84].mxu1 }
 0x854   :  { %v5813_v0 = vadd.f32 %v14843_v33, %v16994_v35  ;;  %v5807_v12 = vpop.f32.mrb[85].mxu1  ;;  %v5883_v10 = vsel %vm54_vm0, %v17053_v51, 0.0 }
 0x855   :  { %v5808_v15 = vadd.f32 %v5807_v12, %v16994_v35  ;;  %v5880_v31 = vsel %vm54_vm0, %v17047_v59, 0.0 }
 0x856   :  { %5881 = vadd.xlane.f32.xlu1 %v5880_v31  ;;  %5878 = vadd.xlane.f32.xlu0 %v5877_v60  ;;  %v17068_v2 = vadd.f32 %v15755_v61, %v5813_v0  ;;  %v44_v31 = vld [vmem:[%s19461_s1 + $0x58] sm:$0xff] }
 0x857   :  { %v17063_v52 = vadd.f32 %v15754_v18, %v5808_v15  ;;  %v14846_v14 = vpop.f32.mrb[86].mxu1  ;;  %v43_v15 = vld [vmem:[%s19461_s1 + $0x50] sm:$0xff] }
 0x858   :  { %v5817_v29 = vpop.f32.mrb[87].mxu1  ;;  %v5823_v57 = vadd.f32 %v14846_v14, %v16994_v35  ;;  %v5889_v54 = vsel %vm54_vm0, %v17068_v2, 0.0  ;;  %v15347_v60 = vpack.c.bf16 %v44_v31, %v43_v15 }
 0x859   :  { %v5818_v38 = vadd.f32 %v5817_v29, %v16994_v35  ;;  %v5886_v20 = vsel %vm54_vm0, %v17063_v52, 0.0 }
 0x85a   :  { %5887 = vadd.xlane.f32.xlu1 %v5886_v20  ;;  %5884 = vadd.xlane.f32.xlu0 %v5883_v10  ;;  %v17086_v21 = vadd.f32 %v15757_v39, %v5823_v57 }
 0x85b   :  { %v17079_v16 = vadd.f32 %v15756_v24, %v5818_v38  ;;  %v14849_v50 = vpop.f32.mrb[88].mxu1 }
 0x85c   :  { %v5827_v22 = vpop.f32.mrb[89].mxu1  ;;  %v5833_v25 = vadd.f32 %v14849_v50, %v16994_v35  ;;  %v5895_v23 = vsel %vm54_vm0, %v17086_v21, 0.0 }
 0x85d   :  { %v5828_v32 = vadd.f32 %v5827_v22, %v16994_v35  ;;  %v5892_v37 = vsel %vm54_vm0, %v17079_v16, 0.0 }
 0x85e   :  { %5893 = vadd.xlane.f32.xlu1 %v5892_v37  ;;  %5890 = vadd.xlane.f32.xlu0 %v5889_v54  ;;  %v17100_v43 = vadd.f32 %v15759_v1, %v5833_v25 }
 0x85f   :  { %v17095_v17 = vadd.f32 %v15758_v55, %v5828_v32 }
 0x860   :  { %v5901_v28 = vsel %vm54_vm0, %v17100_v43, 0.0 }
 0x861   :  { %v5898_v48 = vsel %vm54_vm0, %v17095_v17, 0.0 }
 0x862   :  { %v14852_v45 = vpop.f32.mrb[90].mxu1  ;;  %5899 = vadd.xlane.f32.xlu1 %v5898_v48  ;;  %5896 = vadd.xlane.f32.xlu0 %v5895_v23 }
 0x863   :  { %v5843_v8 = vadd.f32 %v14852_v45, %v16994_v35  ;;  %v5837_v36 = vpop.f32.mrb[91].mxu1 }
 0x864   :  { %v5838_v58 = vadd.f32 %v5837_v36, %v16994_v35 }
 0x865   :  { %v17111_v53 = vadd.f32 %v15760_v49, %v5843_v8 }
 0x866   :  { %v17118_v9 = vadd.f32 %v15761_v4, %v5838_v58  ;;  %5902 = vadd.xlane.f32.xlu0 %v5901_v28 }
 0x867   :  { %v5907_v35 = vsel %vm54_vm0, %v17111_v53, 0.0 }
 0x868   :  { %v5904_v41 = vsel %vm54_vm0, %v17118_v9, 0.0 }
 0x869   :  { %5905 = vadd.xlane.f32.xlu1 %v5904_v41 }
 0x86a   :  { %5908 = vadd.xlane.f32.xlu0 %v5907_v35 }
 0x8a5   :  { %v5867_v13 = vpop.xlane.xlu1 %5866 }
 0x8a6   :  { %v5912_v62 = vmul.f32 0.0625, %v5867_v13  ;;  %v5864_v26 = vpop.xlane.xlu0 %5863 }
 0x8a7   :  { %v5911_v27 = vmul.f32 0.0625, %v5864_v26 }
 0x8a8   :  { %v17125_v5 = vsub.f32 %v17001_v47, %v5912_v62  ;;  %v41_v47 = vld [vmem:[%s19461_s1 + $0x40] sm:$0xff] }
 0x8a9   :  { %v17128_v6 = vsub.f32 %v17006_v30, %v5911_v27  ;;  %v42_v30 = vld [vmem:[%s19461_s1 + $0x48] sm:$0xff] }
 0x8aa   :  { %v5944_v7 = vmul.f32 %v17125_v5, %v17125_v5  ;;  %v15341_v63 = vpack.c.bf16 %v42_v30, %v41_v47 }
 0x8ab   :  { %v5943_v33 = vmul.f32 %v17128_v6, %v17128_v6 }
 0x8ac   :  { %v5962_v0 = vsel %vm54_vm0, %v5944_v7, 0.0  ;;  %15343 = vmatprep.subr.msk.bf16.mxu0 %vm15805_vm1, %v15341_v63 }
 0x8ad   :  { %5963 = vadd.xlane.f32.xlu0 %v5962_v0  ;;  %v5959_v12 = vsel %vm54_vm0, %v5943_v33, 0.0  ;;  %15346 = vmatpush3.bf16.xpose.msk.msra.mxu0 %vm15805_vm1, %v15341_v63 }
 0x8ae   :  { %5960 = vadd.xlane.f32.xlu1 %v5959_v12  ;;  %15349 = vmatprep.subr.msk.bf16.mxu0 %vm15805_vm1, %v15347_v60 }
 0x8b5   :  { %15352 = vmatpush3.bf16.xpose.msk.msra.mxu0 %vm15805_vm1, %v15347_v60 }
 0x8db   :  { %v5870_v18 = vpop.xlane.xlu0 %5869 }
 0x8dc   :  { %v5913_v14 = vmul.f32 0.0625, %v5870_v18 }
 0x8de   :  { %v17157_v61 = vsub.f32 %v17017_v19, %v5913_v14 }
 0x8df   :  { %v5876_v29 = vpop.xlane.xlu1 %5875  ;;  %v5873_v57 = vpop.xlane.xlu0 %5872 }
 0x8e0   :  { %v5915_v38 = vmul.f32 0.0625, %v5876_v29  ;;  %v5914_v20 = vmul.f32 0.0625, %v5873_v57  ;;  %v5945_v10 = vmul.f32 %v17157_v61, %v17157_v61 }
 0x8e2   :  { %v17162_v24 = vsub.f32 %v17031_v42, %v5915_v38  ;;  %v17165_v50 = vsub.f32 %v17022_v56, %v5914_v20  ;;  %v5965_v22 = vsel %vm54_vm0, %v5945_v10, 0.0 }
 0x8e3   :  { %v5882_v54 = vpop.xlane.xlu1 %5881  ;;  %5966 = vadd.xlane.f32.xlu1 %v5965_v22  ;;  %v5879_v39 = vpop.xlane.xlu0 %5878 }
 0x8e4   :  { %v5917_v19 = vmul.f32 0.0625, %v5882_v54  ;;  %v5916_v25 = vmul.f32 0.0625, %v5879_v39  ;;  %v5947_v32 = vmul.f32 %v17162_v24, %v17162_v24  ;;  %v5946_v37 = vmul.f32 %v17165_v50, %v17165_v50 }
 0x8e6   :  { %v17173_v55 = vsub.f32 %v17047_v59, %v5917_v19  ;;  %v17176_v42 = vsub.f32 %v17038_v3, %v5916_v25  ;;  %v5971_v56 = vsel %vm54_vm0, %v5947_v32, 0.0  ;;  %v5968_v1 = vsel %vm54_vm0, %v5946_v37, 0.0 }
 0x8e7   :  { %v5888_v48 = vpop.xlane.xlu1 %5887  ;;  %5972 = vadd.xlane.f32.xlu1 %v5971_v56  ;;  %5969 = vadd.xlane.f32.xlu0 %v5968_v1  ;;  %v5885_v23 = vpop.xlane.xlu0 %5884 }
 0x8e8   :  { %v5919_v45 = vmul.f32 0.0625, %v5888_v48  ;;  %v5918_v8 = vmul.f32 0.0625, %v5885_v23  ;;  %v5949_v36 = vmul.f32 %v17173_v55, %v17173_v55  ;;  %v5948_v59 = vmul.f32 %v17176_v42, %v17176_v42 }
 0x8ea   :  { %v17185_v58 = vsub.f32 %v17063_v52, %v5919_v45  ;;  %v17188_v3 = vsub.f32 %v17053_v51, %v5918_v8  ;;  %v5977_v49 = vsel %vm54_vm0, %v5949_v36, 0.0  ;;  %v5974_v28 = vsel %vm54_vm0, %v5948_v59, 0.0 }
 0x8eb   :  { %v5894_v4 = vpop.xlane.xlu1 %5893  ;;  %5978 = vadd.xlane.f32.xlu1 %v5977_v49  ;;  %5975 = vadd.xlane.f32.xlu0 %v5974_v28  ;;  %v5891_v41 = vpop.xlane.xlu0 %5890  ;;  %v19478_v49 = vsub.s32 4, %v19542_v34  ;;  %v19477_v28 = vsub.s32 5, %v19542_v34 }
 0x8ec   :  { %v5921_v35 = vmul.f32 0.0625, %v5894_v4  ;;  %v5920_v13 = vmul.f32 0.0625, %v5891_v41  ;;  %v5951_v62 = vmul.f32 %v17185_v58, %v17185_v58  ;;  %v5950_v52 = vmul.f32 %v17188_v3, %v17188_v3 }
 0x8ed   :  { %v17251_v4 = vrot.slane %v16990_v11, %v19478_v49 }
 0x8ee   :  { %v17197_v26 = vsub.f32 %v17079_v16, %v5921_v35  ;;  %v17200_v51 = vsub.f32 %v17068_v2, %v5920_v13  ;;  %v5983_v27 = vsel %vm54_vm0, %v5951_v62, 0.0  ;;  %v5980_v7 = vsel %vm54_vm0, %v5950_v52, 0.0 }
 0x8ef   :  { %v5900_v33 = vpop.xlane.xlu1 %5899  ;;  %5984 = vadd.xlane.f32.xlu1 %v5983_v27  ;;  %5981 = vadd.xlane.f32.xlu0 %v5980_v7  ;;  %v5897_v0 = vpop.xlane.xlu0 %5896  ;;  %v17258_v52 = vrot.slane %v16990_v11, %v19477_v28 }
 0x8f0   :  { %v5923_v12 = vmul.f32 0.0625, %v5900_v33  ;;  %v5922_v47 = vmul.f32 0.0625, %v5897_v0  ;;  %v5953_v30 = vmul.f32 %v17197_v26, %v17197_v26  ;;  %v5952_v16 = vmul.f32 %v17200_v51, %v17200_v51 }
 0x8f2   :  { %v17209_v63 = vsub.f32 %v17095_v17, %v5923_v12  ;;  %v17212_v2 = vsub.f32 %v17086_v21, %v5922_v47  ;;  %v5989_v15 = vsel %vm54_vm0, %v5953_v30, 0.0  ;;  %v5986_v31 = vsel %vm54_vm0, %v5952_v16, 0.0 }
 0x8f3   :  { %5990 = vadd.xlane.f32.xlu1 %v5989_v15  ;;  %5987 = vadd.xlane.f32.xlu0 %v5986_v31  ;;  %v5903_v60 = vpop.xlane.xlu0 %5902 }
 0x8f4   :  { %v5924_v18 = vmul.f32 0.0625, %v5903_v60  ;;  %v5955_v14 = vmul.f32 %v17209_v63, %v17209_v63  ;;  %v5954_v29 = vmul.f32 %v17212_v2, %v17212_v2 }
 0x8f6   :  { %v17221_v17 = vsub.f32 %v17100_v43, %v5924_v18  ;;  %v5906_v57 = vpop.xlane.xlu1 %5905  ;;  %v5995_v21 = vsel %vm54_vm0, %v5955_v14, 0.0  ;;  %v5992_v38 = vsel %vm54_vm0, %v5954_v29, 0.0 }
 0x8f7   :  { %v5925_v20 = vmul.f32 0.0625, %v5906_v57  ;;  %5996 = vadd.xlane.f32.xlu1 %v5995_v21  ;;  %5993 = vadd.xlane.f32.xlu0 %v5992_v38  ;;  %v5909_v10 = vpop.xlane.xlu0 %5908 }
 0x8f8   :  { %v5926_v22 = vmul.f32 0.0625, %v5909_v10  ;;  %v5956_v54 = vmul.f32 %v17221_v17, %v17221_v17 }
 0x8f9   :  { %v17228_v39 = vsub.f32 %v17118_v9, %v5925_v20  ;;  %v46_v9 = vld [vmem:[%s19461_s1 + $0x68] sm:$0xff] }
 0x8fa   :  { %v17231_v19 = vsub.f32 %v17111_v53, %v5926_v22  ;;  %v5998_v43 = vsel %vm54_vm0, %v5956_v54, 0.0  ;;  %v45_v53 = vld [vmem:[%s19461_s1 + $0x60] sm:$0xff] }
 0x8fb   :  { %5999 = vadd.xlane.f32.xlu0 %v5998_v43  ;;  %v5957_v25 = vmul.f32 %v17228_v39, %v17228_v39  ;;  %v15353_v1 = vpack.c.bf16 %v46_v9, %v45_v53 }
 0x8fc   :  { %v5958_v32 = vmul.f32 %v17231_v19, %v17231_v19 }
 0x8fd   :  { %v6001_v37 = vsel %vm54_vm0, %v5957_v25, 0.0  ;;  %15354 = vmatprep.subr.bf16.mxu1 %v15353_v1 }
 0x8fe   :  { %6002 = vadd.xlane.f32.xlu1 %v6001_v37  ;;  %v6004_v56 = vsel %vm54_vm0, %v5958_v32, 0.0  ;;  %15356 = vmatpush3.bf16.msra.mxu1 %v15353_v1 }
 0x8ff   :  { %6005 = vadd.xlane.f32.xlu0 %v6004_v56 }
 0x93a   :  { %v5964_v48 = vpop.xlane.xlu0 %5963 }
 0x93b   :  { %v6008_v23 = vmul.f32 0.0625, %v5964_v48  ;;  %v5961_v45 = vpop.xlane.xlu1 %5960 }
 0x93c   :  { %v6007_v8 = vmul.f32 0.0625, %v5961_v45 }
 0x93d   :  { %v6024_v36 = vadd.f32 1e-05, %v6008_v23 }
 0x93e   :  { %v6023_v59 = vadd.f32 1e-05, %v6007_v8 }
 0x93f   :  { %15541 = vrsqrt.f32 %v6024_v36 }
 0x940   :  { %15543 = vrsqrt.f32 %v6023_v59 }
 0x949   :  { %v15542_v41 = vpop.eup %15541 }
 0x94a   :  { %v15544_v35 = vpop.eup %15543  ;;  %v6056_v13 = vmul.f32 %v15542_v41, %v17125_v5 }
 0x94b   :  { %v6055_v62 = vmul.f32 %v15544_v35, %v17128_v6 }
 0x94c   :  { %v6076_v27 = vmul.f32 %v17251_v4, %v6056_v13 }
 0x94d   :  { %v6075_v7 = vmul.f32 %v17251_v4, %v6055_v62 }
 0x94e   :  { %v17266_v0 = vadd.f32 %v17258_v52, %v6076_v27 }
 0x94f   :  { %v17263_v33 = vadd.f32 %v17258_v52, %v6075_v7 }
 0x951   :  { %14861 = vmatprep.mubr.msk.f32.mxu0 %vm54_vm0, %v17263_v33 }
 0x952   :  { %14862 = vmatmul.mubr.msk.f32.vlgmr.msra.gmra.mrb[68].mxu0 %vm54_vm0, %v17266_v0 }
 0x970   :  { %v5967_v5 = vpop.xlane.xlu1 %5966 }
 0x971   :  { %v6009_v6 = vmul.f32 0.0625, %v5967_v5 }
 0x973   :  { %v6025_v12 = vadd.f32 1e-05, %v6009_v6 }
 0x974   :  { %v5973_v47 = vpop.xlane.xlu1 %5972  ;;  %v5970_v30 = vpop.xlane.xlu0 %5969 }
 0x975   :  { %15545 = vrsqrt.f32 %v6025_v12  ;;  %v6011_v16 = vmul.f32 0.0625, %v5973_v47  ;;  %v6010_v15 = vmul.f32 0.0625, %v5970_v30 }
 0x977   :  { %v6027_v31 = vadd.f32 1e-05, %v6011_v16  ;;  %v6026_v60 = vadd.f32 1e-05, %v6010_v15 }
 0x978   :  { %v5979_v18 = vpop.xlane.xlu1 %5978  ;;  %v5976_v14 = vpop.xlane.xlu0 %5975 }
 0x979   :  { %15547 = vrsqrt.f32 %v6027_v31  ;;  %v6013_v29 = vmul.f32 0.0625, %v5979_v18  ;;  %v6012_v57 = vmul.f32 0.0625, %v5976_v14 }
 0x97a   :  { %15549 = vrsqrt.f32 %v6026_v60 }
 0x97b   :  { %v6029_v21 = vadd.f32 1e-05, %v6013_v29  ;;  %v6028_v38 = vadd.f32 1e-05, %v6012_v57 }
 0x97c   :  { %v5985_v20 = vpop.xlane.xlu1 %5984  ;;  %v5982_v10 = vpop.xlane.xlu0 %5981 }
 0x97d   :  { %15551 = vrsqrt.f32 %v6029_v21  ;;  %v6015_v22 = vmul.f32 0.0625, %v5985_v20  ;;  %v6014_v54 = vmul.f32 0.0625, %v5982_v10 }
 0x97e   :  { %15553 = vrsqrt.f32 %v6028_v38 }
 0x97f   :  { %v15546_v43 = vpop.eup %15545  ;;  %v6031_v25 = vadd.f32 1e-05, %v6015_v22  ;;  %v6030_v32 = vadd.f32 1e-05, %v6014_v54 }
 0x980   :  { %v5991_v37 = vpop.xlane.xlu1 %5990  ;;  %v5988_v56 = vpop.xlane.xlu0 %5987  ;;  %v6057_v53 = vmul.f32 %v15546_v43, %v17157_v61 }
 0x981   :  { %15555 = vrsqrt.f32 %v6031_v25  ;;  %v6017_v9 = vmul.f32 0.0625, %v5991_v37  ;;  %v6016_v1 = vmul.f32 0.0625, %v5988_v56 }
 0x982   :  { %15557 = vrsqrt.f32 %v6030_v32  ;;  %v6077_v48 = vmul.f32 %v17251_v4, %v6057_v53 }
 0x983   :  { %v15548_v23 = vpop.eup %15547  ;;  %v6033_v45 = vadd.f32 1e-05, %v6017_v9  ;;  %v6032_v8 = vadd.f32 1e-05, %v6016_v1 }
 0x984   :  { %v15550_v36 = vpop.eup %15549  ;;  %v5997_v59 = vpop.xlane.xlu1 %5996  ;;  %v17275_v35 = vadd.f32 %v17258_v52, %v6077_v48  ;;  %v6059_v13 = vmul.f32 %v15548_v23, %v17162_v24 }
 0x985   :  { %v5994_v41 = vpop.xlane.xlu0 %5993  ;;  %15559 = vrsqrt.f32 %v6033_v45  ;;  %v6019_v62 = vmul.f32 0.0625, %v5997_v59  ;;  %v6058_v27 = vmul.f32 %v15550_v36, %v17165_v50 }
 0x986   :  { %v6018_v61 = vmul.f32 0.0625, %v5994_v41  ;;  %15561 = vrsqrt.f32 %v6032_v8  ;;  %14864 = vmatprep.mubr.msk.f32.mxu0 %vm54_vm0, %v17275_v35  ;;  %v6079_v7 = vmul.f32 %v17251_v4, %v6059_v13 }
 0x987   :  { %v15552_v5 = vpop.eup %15551  ;;  %v6035_v6 = vadd.f32 1e-05, %v6019_v62  ;;  %v6078_v47 = vmul.f32 %v17251_v4, %v6058_v27 }
 0x988   :  { %v6034_v12 = vadd.f32 1e-05, %v6018_v61  ;;  %v15554_v30 = vpop.eup %15553  ;;  %v17284_v24 = vadd.f32 %v17258_v52, %v6079_v7  ;;  %v6061_v15 = vmul.f32 %v15552_v5, %v17173_v55 }
 0x989   :  { %v6000_v16 = vpop.xlane.xlu0 %5999  ;;  %15563 = vrsqrt.f32 %v6035_v6  ;;  %v17288_v31 = vadd.f32 %v17258_v52, %v6078_v47  ;;  %v6060_v60 = vmul.f32 %v15554_v30, %v17176_v42 }
 0x98a   :  { %v6020_v50 = vmul.f32 0.0625, %v6000_v16  ;;  %15565 = vrsqrt.f32 %v6034_v12  ;;  %v6081_v18 = vmul.f32 %v17251_v4, %v6061_v15 }
 0x98b   :  { %v15556_v14 = vpop.eup %15555  ;;  %14865 = vmatmul.mubr.msk.f32.gmra.mrb[70].mxu0 %vm54_vm0, %v17288_v31  ;;  %v6003_v57 = vpop.xlane.xlu1 %6002  ;;  %v6080_v21 = vmul.f32 %v17251_v4, %v6060_v60 }
 0x98c   :  { %v6036_v29 = vadd.f32 1e-05, %v6020_v50  ;;  %v15558_v38 = vpop.eup %15557  ;;  %v6021_v55 = vmul.f32 0.0625, %v6003_v57  ;;  %14867 = vmatprep.mubr.msk.f32.mxu0 %vm54_vm0, %v17284_v24  ;;  %v17298_v10 = vadd.f32 %v17258_v52, %v6081_v18  ;;  %v6063_v42 = vmul.f32 %v15556_v14, %v17185_v58 }
 0x98d   :  { %v6006_v20 = vpop.xlane.xlu0 %6005  ;;  %v17302_v54 = vadd.f32 %v17258_v52, %v6080_v21  ;;  %v6062_v43 = vmul.f32 %v15558_v38, %v17188_v3 }
 0x98e   :  { %15567 = vrsqrt.f32 %v6036_v29  ;;  %v6022_v22 = vmul.f32 0.0625, %v6006_v20  ;;  %v6037_v25 = vadd.f32 1e-05, %v6021_v55  ;;  %v6083_v32 = vmul.f32 %v17251_v4, %v6063_v42 }
 0x98f   :  { %v15560_v37 = vpop.eup %15559  ;;  %14868 = vmatmul.mubr.msk.f32.gmra.mrb[72].mxu0 %vm54_vm0, %v17302_v54  ;;  %v6082_v53 = vmul.f32 %v17251_v4, %v6062_v43 }
 0x990   :  { %v6038_v56 = vadd.f32 1e-05, %v6022_v22  ;;  %v15562_v9 = vpop.eup %15561  ;;  %15569 = vrsqrt.f32 %v6037_v25  ;;  %14870 = vmatprep.mubr.msk.f32.mxu0 %vm54_vm0, %v17298_v10  ;;  %v17312_v58 = vadd.f32 %v17258_v52, %v6083_v32  ;;  %v6065_v3 = vmul.f32 %v15560_v37, %v17197_v26 }
 0x991   :  { %v17316_v1 = vadd.f32 %v17258_v52, %v6082_v53  ;;  %v6064_v48 = vmul.f32 %v15562_v9, %v17200_v51 }
 0x992   :  { %15571 = vrsqrt.f32 %v6038_v56  ;;  %v6085_v23 = vmul.f32 %v17251_v4, %v6065_v3 }
 0x993   :  { %v15564_v45 = vpop.eup %15563  ;;  %14871 = vmatmul.mubr.msk.f32.gmra.mrb[74].mxu0 %vm54_vm0, %v17316_v1  ;;  %v6084_v8 = vmul.f32 %v17251_v4, %v6064_v48 }
 0x994   :  { %v15566_v36 = vpop.eup %15565  ;;  %14873 = vmatprep.mubr.msk.f32.mxu0 %vm54_vm0, %v17312_v58  ;;  %v17326_v26 = vadd.f32 %v17258_v52, %v6085_v23  ;;  %v6067_v59 = vmul.f32 %v15564_v45, %v17209_v63 }
 0x995   :  { %v17330_v41 = vadd.f32 %v17258_v52, %v6084_v8  ;;  %v6066_v51 = vmul.f32 %v15566_v36, %v17212_v2 }
 0x996   :  { %v6087_v13 = vmul.f32 %v17251_v4, %v6067_v59 }
 0x997   :  { %14874 = vmatmul.mubr.msk.f32.gmra.mrb[76].mxu0 %vm54_vm0, %v17330_v41  ;;  %v6086_v61 = vmul.f32 %v17251_v4, %v6066_v51 }
 0x998   :  { %v15568_v62 = vpop.eup %15567  ;;  %14876 = vmatprep.mubr.msk.f32.mxu0 %vm54_vm0, %v17326_v26  ;;  %v17340_v27 = vadd.f32 %v17258_v52, %v6087_v13 }
 0x999   :  { %v6068_v63 = vmul.f32 %v15568_v62, %v17221_v17  ;;  %v17344_v7 = vadd.f32 %v17258_v52, %v6086_v61 }
 0x99a   :  { %v15570_v2 = vpop.eup %15569 }
 0x99b   :  { %v6088_v5 = vmul.f32 %v17251_v4, %v6068_v63  ;;  %14877 = vmatmul.mubr.msk.f32.gmra.mrb[78].mxu0 %vm54_vm0, %v17344_v7  ;;  %v6069_v12 = vmul.f32 %v15570_v2, %v17228_v39 }
 0x99c   :  { %v15572_v6 = vpop.eup %15571  ;;  %14879 = vmatprep.mubr.msk.f32.mxu0 %vm54_vm0, %v17340_v27 }
 0x99d   :  { %v17353_v47 = vadd.f32 %v17258_v52, %v6088_v5  ;;  %v6070_v17 = vmul.f32 %v15572_v6, %v17231_v19  ;;  %v6089_v30 = vmul.f32 %v17251_v4, %v6069_v12  ;;  %v47_v19 = vld [vmem:[%s19461_s1 + $0x70] sm:$0xff] }
 0x99f   :  { %v6090_v16 = vmul.f32 %v17251_v4, %v6070_v17  ;;  %14880 = vmatmul.mubr.msk.f32.gmra.mrb[80].mxu0 %vm54_vm0, %v17353_v47  ;;  %v17361_v15 = vadd.f32 %v17258_v52, %v6089_v30  ;;  %v48_v4 = vld [vmem:[%s19461_s1 + $0x78] sm:$0xff] }
 0x9a0   :  { %v15357_v50 = vpack.c.bf16 %v48_v4, %v47_v19 }
 0x9a1   :  { %v17364_v39 = vadd.f32 %v17258_v52, %v6090_v16  ;;  %14882 = vmatprep.mubr.msk.f32.mxu0 %vm54_vm0, %v17361_v15  ;;  %v19476_v52 = vsub.s32 2, %v19542_v34 }
 0x9a2   :  { %15358 = vmatprep.subr.bf16.mxu1 %v15357_v50 }
 0x9a3   :  { %14883 = vmatmul.mubr.msk.f32.gmra.mrb[82].mxu0 %vm54_vm0, %v17364_v39  ;;  %15360 = vmatpush3.bf16.msra.mxu1 %v15357_v50  ;;  %v6114_v60 = vrot.slane %v16990_v11, %v19476_v52 }
 0x9a4   :  { %14953 = vmatprep.subr.mxu1 %v19530_v40 }
 0xa25   :  { %v14863_v18 = vpop.f32.mrb[68].mxu0 }
 0xa26   :  { %v6247_v14 = vadd.f32 %v14863_v18, %v6114_v60  ;;  %v6241_v29 = vpop.f32.mrb[69].mxu0 }
 0xa27   :  { %v6242_v57 = vadd.f32 %v6241_v29, %v6114_v60 }
 0xa28   :  { %v6321_v38 = vmax.f32 %v6247_v14, 0.0 }
 0xa29   :  { %v6320_v21 = vmax.f32 %v6242_v57, 0.0 }
 0xa2b   :  { %14893 = vmatprep.mubr.msk.f32.mxu1 %vm6340_vm4, %v6320_v21 }
 0xa2c   :  { %14894 = vmatmul.mubr.msk.f32.vlgmr.msra.gmra.mrb[92].mxu1 %vm6340_vm4, %v6321_v38 }
 0xa5e   :  { %v14866_v55 = vpop.f32.mrb[70].mxu0 }
 0xa5f   :  { %v6257_v20 = vadd.f32 %v14866_v55, %v6114_v60  ;;  %v6251_v42 = vpop.f32.mrb[71].mxu0 }
 0xa60   :  { %v6252_v22 = vadd.f32 %v6251_v42, %v6114_v60 }
 0xa61   :  { %v6323_v32 = vmax.f32 %v6257_v20, 0.0 }
 0xa62   :  { %v6322_v43 = vmax.f32 %v6252_v22, 0.0  ;;  %v14869_v25 = vpop.f32.mrb[72].mxu0  ;;  %v19475_v22 = vsub.s32 3, %v19542_v34 }
 0xa63   :  { %v6267_v37 = vadd.f32 %v14869_v25, %v6114_v60  ;;  %v6261_v56 = vpop.f32.mrb[73].mxu0 }
 0xa64   :  { %v6262_v53 = vadd.f32 %v6261_v56, %v6114_v60  ;;  %14896 = vmatprep.mubr.msk.f32.mxu1 %vm6340_vm4, %v6322_v43  ;;  %v17403_v43 = vrot.slane %v16990_v11, %v19475_v22 }
 0xa65   :  { %14897 = vmatmul.mubr.msk.f32.gmra.mrb[94].mxu1 %vm6340_vm4, %v6323_v32  ;;  %v6325_v48 = vmax.f32 %v6267_v37, 0.0 }
 0xa66   :  { %v6324_v9 = vmax.f32 %v6262_v53, 0.0  ;;  %v14872_v3 = vpop.f32.mrb[74].mxu0 }
 0xa67   :  { %v6277_v23 = vadd.f32 %v14872_v3, %v6114_v60  ;;  %v6271_v45 = vpop.f32.mrb[75].mxu0 }
 0xa68   :  { %v6272_v8 = vadd.f32 %v6271_v45, %v6114_v60  ;;  %14899 = vmatprep.mubr.msk.f32.mxu1 %vm6340_vm4, %v6324_v9 }
 0xa69   :  { %14900 = vmatmul.mubr.msk.f32.gmra.mrb[96].mxu1 %vm6340_vm4, %v6325_v48  ;;  %v6327_v51 = vmax.f32 %v6277_v23, 0.0 }
 0xa6a   :  { %v6326_v36 = vmax.f32 %v6272_v8, 0.0  ;;  %v14875_v59 = vpop.f32.mrb[76].mxu0 }
 0xa6b   :  { %v6287_v13 = vadd.f32 %v14875_v59, %v6114_v60  ;;  %v6281_v62 = vpop.f32.mrb[77].mxu0 }
 0xa6c   :  { %v6282_v61 = vadd.f32 %v6281_v62, %v6114_v60  ;;  %14902 = vmatprep.mubr.msk.f32.mxu1 %vm6340_vm4, %v6326_v36 }
 0xa6d   :  { %14903 = vmatmul.mubr.msk.f32.gmra.mrb[98].mxu1 %vm6340_vm4, %v6327_v51  ;;  %v6329_v5 = vmax.f32 %v6287_v13, 0.0 }
 0xa6e   :  { %v6328_v63 = vmax.f32 %v6282_v61, 0.0  ;;  %v14878_v2 = vpop.f32.mrb[78].mxu0 }
 0xa6f   :  { %v6297_v6 = vadd.f32 %v14878_v2, %v6114_v60  ;;  %v6291_v12 = vpop.f32.mrb[79].mxu0 }
 0xa70   :  { %v6292_v17 = vadd.f32 %v6291_v12, %v6114_v60  ;;  %14905 = vmatprep.mubr.msk.f32.mxu1 %vm6340_vm4, %v6328_v63 }
 0xa71   :  { %14906 = vmatmul.mubr.msk.f32.gmra.mrb[100].mxu1 %vm6340_vm4, %v6329_v5  ;;  %v6331_v19 = vmax.f32 %v6297_v6, 0.0 }
 0xa72   :  { %v6330_v30 = vmax.f32 %v6292_v17, 0.0  ;;  %v14881_v16 = vpop.f32.mrb[80].mxu0 }
 0xa73   :  { %v6307_v4 = vadd.f32 %v14881_v16, %v6114_v60  ;;  %v6301_v50 = vpop.f32.mrb[81].mxu0 }
 0xa74   :  { %v6302_v18 = vadd.f32 %v6301_v50, %v6114_v60  ;;  %14908 = vmatprep.mubr.msk.f32.mxu1 %vm6340_vm4, %v6330_v30 }
 0xa75   :  { %14909 = vmatmul.mubr.msk.f32.gmra.mrb[102].mxu1 %vm6340_vm4, %v6331_v19  ;;  %v6333_v57 = vmax.f32 %v6307_v4, 0.0 }
 0xa76   :  { %v6332_v14 = vmax.f32 %v6302_v18, 0.0  ;;  %v14884_v29 = vpop.f32.mrb[82].mxu0 }
 0xa77   :  { %v6317_v21 = vadd.f32 %v14884_v29, %v6114_v60  ;;  %v6311_v38 = vpop.f32.mrb[83].mxu0 }
 0xa78   :  { %v6312_v55 = vadd.f32 %v6311_v38, %v6114_v60  ;;  %14911 = vmatprep.mubr.msk.f32.mxu1 %vm6340_vm4, %v6332_v14 }
 0xa79   :  { %14912 = vmatmul.mubr.msk.f32.gmra.mrb[104].mxu1 %vm6340_vm4, %v6333_v57  ;;  %v6335_v42 = vmax.f32 %v6317_v21, 0.0 }
 0xa7a   :  { %v6334_v20 = vmax.f32 %v6312_v55, 0.0 }
 0xa7c   :  { %14914 = vmatprep.mubr.msk.f32.mxu1 %vm6340_vm4, %v6334_v20 }
 0xa7d   :  { %14915 = vmatmul.mubr.msk.f32.gmra.mrb[106].mxu1 %vm6340_vm4, %v6335_v42 }
 0xa7e   :  { %14955 = vmatprep.mubr.msk.f32.mxu1 %vm15765_vm2, %v19530_v40 }
 0xaff   :  { %v14895_v60 = vpop.f32.mrb[92].mxu1 }
 0xb00   :  { %v6461_v25 = vadd.f32 %v14895_v60, %v17403_v43  ;;  %v6455_v32 = vpop.f32.mrb[93].mxu1 }
 0xb01   :  { %v6456_v37 = vadd.f32 %v6455_v32, %v17403_v43 }
 0xb02   :  { %v17408_v56 = vadd.f32 %v6461_v25, %v17266_v0 }
 0xb03   :  { %v17411_v53 = vadd.f32 %v6456_v37, %v17263_v33 }
 0xb04   :  { %v6553_v9 = vsel %vm54_vm0, %v17408_v56, 0.0 }
 0xb05   :  { %6554 = vadd.xlane.f32.xlu0 %v6553_v9  ;;  %v6550_v11 = vsel %vm54_vm0, %v17411_v53, 0.0 }
 0xb06   :  { %6551 = vadd.xlane.f32.xlu1 %v6550_v11 }
 0xb38   :  { %v14898_v3 = vpop.f32.mrb[94].mxu1 }
 0xb39   :  { %v6471_v48 = vadd.f32 %v14898_v3, %v17403_v43  ;;  %v6465_v23 = vpop.f32.mrb[95].mxu1 }
 0xb3a   :  { %v6466_v45 = vadd.f32 %v6465_v23, %v17403_v43 }
 0xb3b   :  { %v17420_v0 = vadd.f32 %v6471_v48, %v17288_v31 }
 0xb3c   :  { %v17423_v33 = vadd.f32 %v6466_v45, %v17275_v35  ;;  %v14901_v8 = vpop.f32.mrb[96].mxu1 }
 0xb3d   :  { %v6481_v36 = vadd.f32 %v14901_v8, %v17403_v43  ;;  %v6475_v59 = vpop.f32.mrb[97].mxu1  ;;  %v6559_v51 = vsel %vm54_vm0, %v17420_v0, 0.0 }
 0xb3e   :  { %v6476_v13 = vadd.f32 %v6475_v59, %v17403_v43  ;;  %6560 = vadd.xlane.f32.xlu0 %v6559_v51  ;;  %v6556_v62 = vsel %vm54_vm0, %v17423_v33, 0.0 }
 0xb3f   :  { %v17432_v61 = vadd.f32 %v6481_v36, %v17302_v54  ;;  %6557 = vadd.xlane.f32.xlu1 %v6556_v62 }
 0xb40   :  { %v17435_v35 = vadd.f32 %v6476_v13, %v17284_v24  ;;  %v14904_v31 = vpop.f32.mrb[98].mxu1 }
 0xb41   :  { %v6491_v63 = vadd.f32 %v14904_v31, %v17403_v43  ;;  %v6485_v2 = vpop.f32.mrb[99].mxu1  ;;  %v6565_v5 = vsel %vm54_vm0, %v17432_v61, 0.0 }
 0xb42   :  { %v6486_v6 = vadd.f32 %v6485_v2, %v17403_v43  ;;  %6566 = vadd.xlane.f32.xlu0 %v6565_v5  ;;  %v6562_v12 = vsel %vm54_vm0, %v17435_v35, 0.0 }
 0xb43   :  { %v17444_v54 = vadd.f32 %v6491_v63, %v17316_v1  ;;  %6563 = vadd.xlane.f32.xlu1 %v6562_v12 }
 0xb44   :  { %v17447_v24 = vadd.f32 %v6486_v6, %v17298_v10  ;;  %v14907_v17 = vpop.f32.mrb[100].mxu1 }
 0xb45   :  { %v6501_v30 = vadd.f32 %v14907_v17, %v17403_v43  ;;  %v6495_v16 = vpop.f32.mrb[101].mxu1  ;;  %v6571_v19 = vsel %vm54_vm0, %v17444_v54, 0.0  ;;  %v13934_v17 = vld [vmem:[%s19461_s1 + $0xa0] sm:$0xff] }
 0xb46   :  { %v6496_v4 = vadd.f32 %v6495_v16, %v17403_v43  ;;  %6572 = vadd.xlane.f32.xlu0 %v6571_v19  ;;  %v6568_v50 = vsel %vm54_vm0, %v17447_v24, 0.0 }
 0xb47   :  { %v17456_v1 = vadd.f32 %v6501_v30, %v17330_v41  ;;  %6569 = vadd.xlane.f32.xlu1 %v6568_v50  ;;  %v13935_v30 = vld [vmem:[%s19461_s1 + $0xa8] sm:$0xff] }
 0xb48   :  { %v17459_v10 = vadd.f32 %v6496_v4, %v17312_v58  ;;  %v14910_v18 = vpop.f32.mrb[102].mxu1  ;;  %v15373_v16 = vpack.c.bf16 %v13935_v30, %v13934_v17 }
 0xb49   :  { %v6511_v14 = vadd.f32 %v14910_v18, %v17403_v43  ;;  %v6505_v29 = vpop.f32.mrb[103].mxu1  ;;  %v6577_v57 = vsel %vm54_vm0, %v17456_v1, 0.0 }
 0xb4a   :  { %v6506_v21 = vadd.f32 %v6505_v29, %v17403_v43  ;;  %6578 = vadd.xlane.f32.xlu0 %v6577_v57  ;;  %v6574_v38 = vsel %vm54_vm0, %v17459_v10, 0.0 }
 0xb4b   :  { %v17468_v41 = vadd.f32 %v6511_v14, %v17344_v7  ;;  %6575 = vadd.xlane.f32.xlu1 %v6574_v38 }
 0xb4c   :  { %v17471_v58 = vadd.f32 %v6506_v21, %v17326_v26  ;;  %v14913_v55 = vpop.f32.mrb[104].mxu1 }
 0xb4d   :  { %v6521_v20 = vadd.f32 %v14913_v55, %v17403_v43  ;;  %v6515_v42 = vpop.f32.mrb[105].mxu1  ;;  %v6583_v60 = vsel %vm54_vm0, %v17468_v41, 0.0 }
 0xb4e   :  { %v6516_v25 = vadd.f32 %v6515_v42, %v17403_v43  ;;  %6584 = vadd.xlane.f32.xlu0 %v6583_v60  ;;  %v6580_v32 = vsel %vm54_vm0, %v17471_v58, 0.0 }
 0xb4f   :  { %v17480_v7 = vadd.f32 %v6521_v20, %v17353_v47  ;;  %6581 = vadd.xlane.f32.xlu1 %v6580_v32 }
 0xb50   :  { %v17483_v26 = vadd.f32 %v6516_v25, %v17340_v27  ;;  %v14916_v37 = vpop.f32.mrb[106].mxu1 }
 0xb51   :  { %v6531_v9 = vadd.f32 %v14916_v37, %v17403_v43  ;;  %v6525_v11 = vpop.f32.mrb[107].mxu1  ;;  %v6589_v3 = vsel %vm54_vm0, %v17480_v7, 0.0 }
 0xb52   :  { %v6526_v48 = vadd.f32 %v6525_v11, %v17403_v43  ;;  %6590 = vadd.xlane.f32.xlu0 %v6589_v3  ;;  %v6586_v23 = vsel %vm54_vm0, %v17483_v26, 0.0  ;;  %v13930_v43 = vld [vmem:[%s19461_s1 + $0x80] sm:$0xff] }
 0xb53   :  { %v17492_v47 = vadd.f32 %v6531_v9, %v17364_v39  ;;  %6587 = vadd.xlane.f32.xlu1 %v6586_v23  ;;  %v13931_v39 = vld [vmem:[%s19461_s1 + $0x88] sm:$0xff] }
 0xb54   :  { %v17495_v27 = vadd.f32 %v6526_v48, %v17361_v15  ;;  %v15361_v36 = vpack.c.bf16 %v13931_v39, %v13930_v43 }
 0xb55   :  { %v6595_v45 = vsel %vm54_vm0, %v17492_v47, 0.0 }
 0xb56   :  { %6596 = vadd.xlane.f32.xlu0 %v6595_v45  ;;  %v6592_v8 = vsel %vm54_vm0, %v17495_v27, 0.0  ;;  %15363 = vmatprep.subr.msk.bf16.mxu0 %vm15805_vm1, %v15361_v36 }
 0xb57   :  { %6593 = vadd.xlane.f32.xlu1 %v6592_v8  ;;  %15366 = vmatpush3.bf16.xpose.msk.msra.mxu0 %vm15805_vm1, %v15361_v36 }
 0xb92   :  { %v6555_v15 = vpop.xlane.xlu0 %6554 }
 0xb93   :  { %v6599_v59 = vmul.f32 0.0625, %v6555_v15  ;;  %v6552_v51 = vpop.xlane.xlu1 %6551 }
 0xb94   :  { %v6598_v13 = vmul.f32 0.0625, %v6552_v51 }
 0xb95   :  { %v17512_v62 = vsub.f32 %v17408_v56, %v6599_v59  ;;  %v13932_v56 = vld [vmem:[%s19461_s1 + $0x90] sm:$0xff] }
 0xb96   :  { %v17515_v31 = vsub.f32 %v17411_v53, %v6598_v13  ;;  %v13933_v53 = vld [vmem:[%s19461_s1 + $0x98] sm:$0xff] }
 0xb97   :  { %v6631_v63 = vmul.f32 %v17512_v62, %v17512_v62  ;;  %v15367_v12 = vpack.c.bf16 %v13933_v53, %v13932_v56 }
 0xb98   :  { %v6630_v2 = vmul.f32 %v17515_v31, %v17515_v31 }
 0xb99   :  { %v6649_v5 = vsel %vm54_vm0, %v6631_v63, 0.0  ;;  %15369 = vmatprep.subr.msk.bf16.mxu0 %vm15805_vm1, %v15367_v12 }
 0xb9a   :  { %6650 = vadd.xlane.f32.xlu0 %v6649_v5  ;;  %v6646_v6 = vsel %vm54_vm0, %v6630_v2, 0.0  ;;  %15372 = vmatpush3.bf16.xpose.msk.msra.mxu0 %vm15805_vm1, %v15367_v12 }
 0xb9b   :  { %6647 = vadd.xlane.f32.xlu1 %v6646_v6  ;;  %15375 = vmatprep.subr.msk.bf16.mxu0 %vm15805_vm1, %v15373_v16 }
 0xba2   :  { %15378 = vmatpush3.bf16.xpose.msk.msra.mxu0 %vm15805_vm1, %v15373_v16 }
 0xba3   :  { %14968 = vmatprep.subr.mxu0 %v19530_v40 }
 0xbcb   :  { %v6561_v19 = vpop.xlane.xlu0 %6560 }
 0xbcc   :  { %v6601_v4 = vmul.f32 0.0625, %v6561_v19  ;;  %v6558_v50 = vpop.xlane.xlu1 %6557 }
 0xbcd   :  { %v6600_v18 = vmul.f32 0.0625, %v6558_v50 }
 0xbce   :  { %v17545_v14 = vsub.f32 %v17420_v0, %v6601_v4 }
 0xbcf   :  { %v17548_v29 = vsub.f32 %v17423_v33, %v6600_v18  ;;  %v6567_v57 = vpop.xlane.xlu0 %6566 }
 0xbd0   :  { %v6603_v21 = vmul.f32 0.0625, %v6567_v57  ;;  %v6564_v38 = vpop.xlane.xlu1 %6563  ;;  %v6633_v55 = vmul.f32 %v17545_v14, %v17545_v14 }
 0xbd1   :  { %v6602_v20 = vmul.f32 0.0625, %v6564_v38  ;;  %v6632_v42 = vmul.f32 %v17548_v29, %v17548_v29 }
 0xbd2   :  { %v17555_v60 = vsub.f32 %v17432_v61, %v6603_v21  ;;  %v6655_v25 = vsel %vm54_vm0, %v6633_v55, 0.0 }
 0xbd3   :  { %v17559_v0 = vsub.f32 %v17435_v35, %v6602_v20  ;;  %6656 = vadd.xlane.f32.xlu0 %v6655_v25  ;;  %v6573_v33 = vpop.xlane.xlu0 %6572  ;;  %v6652_v32 = vsel %vm54_vm0, %v6632_v42, 0.0 }
 0xbd4   :  { %v6605_v37 = vmul.f32 0.0625, %v6573_v33  ;;  %v6570_v9 = vpop.xlane.xlu1 %6569  ;;  %6653 = vadd.xlane.f32.xlu1 %v6652_v32  ;;  %v6635_v11 = vmul.f32 %v17555_v60, %v17555_v60 }
 0xbd5   :  { %v6604_v3 = vmul.f32 0.0625, %v6570_v9  ;;  %v6634_v61 = vmul.f32 %v17559_v0, %v17559_v0 }
 0xbd6   :  { %v17567_v48 = vsub.f32 %v17444_v54, %v6605_v37  ;;  %v6661_v35 = vsel %vm54_vm0, %v6635_v11, 0.0 }
 0xbd7   :  { %v17571_v23 = vsub.f32 %v17447_v24, %v6604_v3  ;;  %6662 = vadd.xlane.f32.xlu0 %v6661_v35  ;;  %v6579_v45 = vpop.xlane.xlu0 %6578  ;;  %v6658_v8 = vsel %vm54_vm0, %v6634_v61, 0.0 }
 0xbd8   :  { %v6607_v43 = vmul.f32 0.0625, %v6579_v45  ;;  %v6576_v39 = vpop.xlane.xlu1 %6575  ;;  %6659 = vadd.xlane.f32.xlu1 %v6658_v8  ;;  %v6637_v36 = vmul.f32 %v17567_v48, %v17567_v48 }
 0xbd9   :  { %v6606_v15 = vmul.f32 0.0625, %v6576_v39  ;;  %v6636_v54 = vmul.f32 %v17571_v23, %v17571_v23  ;;  %v19474_v39 = vsub.s32 6, %v19542_v34 }
 0xbda   :  { %v17579_v59 = vsub.f32 %v17456_v1, %v6607_v43  ;;  %v6667_v24 = vsel %vm54_vm0, %v6637_v36, 0.0  ;;  %v17630_v36 = vsub.s32 7, %v19542_v34 }
 0xbdb   :  { %v17583_v51 = vsub.f32 %v17459_v10, %v6606_v15  ;;  %6668 = vadd.xlane.f32.xlu0 %v6667_v24  ;;  %v6585_v13 = vpop.xlane.xlu0 %6584  ;;  %v6664_v63 = vsel %vm54_vm0, %v6636_v54, 0.0  ;;  %v15762_v15 = vld [vmem:[%s19463_s2] sm:$0xff] }
 0xbdc   :  { %v6609_v2 = vmul.f32 0.0625, %v6585_v13  ;;  %v6582_v5 = vpop.xlane.xlu1 %6581  ;;  %6665 = vadd.xlane.f32.xlu1 %v6664_v63  ;;  %v6639_v6 = vmul.f32 %v17579_v59, %v17579_v59  ;;  %19544 = vst [vmem:[#allocation7_spill] sm:$0xff] %v17630_v36  ;;  %v17637_v54 = vrot.slane %v15762_v15, %v19474_v39 }
 0xbdd   :  { %v6608_v56 = vmul.f32 0.0625, %v6582_v5  ;;  %v6638_v1 = vmul.f32 %v17583_v51, %v17583_v51  ;;  %v17642_v5 = vrot.slane %v15762_v15, %v17630_v36 }
 0xbde   :  { %v17591_v53 = vsub.f32 %v17468_v41, %v6609_v2  ;;  %v6673_v10 = vsel %vm54_vm0, %v6639_v6, 0.0 }
 0xbdf   :  { %v17595_v12 = vsub.f32 %v17471_v58, %v6608_v56  ;;  %6674 = vadd.xlane.f32.xlu0 %v6673_v10  ;;  %v6591_v17 = vpop.xlane.xlu0 %6590  ;;  %v6670_v30 = vsel %vm54_vm0, %v6638_v1, 0.0 }
 0xbe0   :  { %v6611_v16 = vmul.f32 0.0625, %v6591_v17  ;;  %v6588_v19 = vpop.xlane.xlu1 %6587  ;;  %6671 = vadd.xlane.f32.xlu1 %v6670_v30  ;;  %v6641_v4 = vmul.f32 %v17591_v53, %v17591_v53 }
 0xbe1   :  { %v6610_v50 = vmul.f32 0.0625, %v6588_v19  ;;  %v6640_v41 = vmul.f32 %v17595_v12, %v17595_v12 }
 0xbe2   :  { %v17603_v18 = vsub.f32 %v17480_v7, %v6611_v16  ;;  %v6679_v58 = vsel %vm54_vm0, %v6641_v4, 0.0 }
 0xbe3   :  { %v17607_v57 = vsub.f32 %v17483_v26, %v6610_v50  ;;  %6680 = vadd.xlane.f32.xlu0 %v6679_v58  ;;  %v6597_v21 = vpop.xlane.xlu0 %6596  ;;  %v6676_v38 = vsel %vm54_vm0, %v6640_v41, 0.0 }
 0xbe4   :  { %v6613_v55 = vmul.f32 0.0625, %v6597_v21  ;;  %6677 = vadd.xlane.f32.xlu1 %v6676_v38  ;;  %v6594_v20 = vpop.xlane.xlu1 %6593  ;;  %v6643_v42 = vmul.f32 %v17603_v18, %v17603_v18 }
 0xbe5   :  { %v6612_v25 = vmul.f32 0.0625, %v6594_v20  ;;  %v6642_v7 = vmul.f32 %v17607_v57, %v17607_v57 }
 0xbe6   :  { %v17615_v33 = vsub.f32 %v17492_v47, %v6613_v55  ;;  %v6685_v26 = vsel %vm54_vm0, %v6643_v42, 0.0 }
 0xbe7   :  { %v17619_v32 = vsub.f32 %v17495_v27, %v6612_v25  ;;  %6686 = vadd.xlane.f32.xlu0 %v6685_v26  ;;  %v6682_v37 = vsel %vm54_vm0, %v6642_v7, 0.0 }
 0xbe8   :  { %6683 = vadd.xlane.f32.xlu1 %v6682_v37  ;;  %v6645_v9 = vmul.f32 %v17615_v33, %v17615_v33 }
 0xbe9   :  { %v6644_v11 = vmul.f32 %v17619_v32, %v17619_v32 }
 0xbea   :  { %v6691_v3 = vsel %vm54_vm0, %v6645_v9, 0.0 }
 0xbeb   :  { %6692 = vadd.xlane.f32.xlu0 %v6691_v3  ;;  %v6688_v47 = vsel %vm54_vm0, %v6644_v11, 0.0 }
 0xbec   :  { %6689 = vadd.xlane.f32.xlu1 %v6688_v47 }
 0xc27   :  { %v6651_v61 = vpop.xlane.xlu0 %6650 }
 0xc28   :  { %v6695_v35 = vmul.f32 0.0625, %v6651_v61  ;;  %v6648_v27 = vpop.xlane.xlu1 %6647 }
 0xc29   :  { %v6694_v45 = vmul.f32 0.0625, %v6648_v27 }
 0xc2a   :  { %v6711_v8 = vadd.f32 1e-05, %v6695_v35 }
 0xc2b   :  { %v6710_v43 = vadd.f32 1e-05, %v6694_v45 }
 0xc2c   :  { %15573 = vrsqrt.f32 %v6711_v8 }
 0xc2d   :  { %15575 = vrsqrt.f32 %v6710_v43 }
 0xc36   :  { %v15574_v24 = vpop.eup %15573 }
 0xc37   :  { %v15576_v13 = vpop.eup %15575  ;;  %v6743_v63 = vmul.f32 %v15574_v24, %v17512_v62 }
 0xc38   :  { %v6742_v2 = vmul.f32 %v15576_v13, %v17515_v31 }
 0xc39   :  { %v6763_v6 = vmul.f32 %v17637_v54, %v6743_v63 }
 0xc3a   :  { %v6762_v56 = vmul.f32 %v17637_v54, %v6742_v2 }
 0xc3b   :  { %v17650_v10 = vadd.f32 %v17642_v5, %v6763_v6 }
 0xc3c   :  { %v17647_v1 = vadd.f32 %v17642_v5, %v6762_v56 }
 0xc3d   :  { %19546 = vst [vmem:[#allocation8_spill] sm:$0xff] %v17650_v10 }
 0xc3e   :  { %19545 = vst [vmem:[#allocation6_spill] sm:$0xff] %v17647_v1  ;;  %14929 = vmatprep.mubr.msk.f32.mxu0 %vm54_vm0, %v17647_v1 }
 0xc3f   :  { %14930 = vmatmul.mubr.msk.f32.vlgmr.msra.gmra.mrb[84].mxu0 %vm54_vm0, %v17650_v10 }
 0xc60   :  { %v6657_v62 = vpop.xlane.xlu0 %6656 }
 0xc61   :  { %v6697_v31 = vmul.f32 0.0625, %v6657_v62  ;;  %v6654_v17 = vpop.xlane.xlu1 %6653 }
 0xc62   :  { %v6696_v30 = vmul.f32 0.0625, %v6654_v17 }
 0xc63   :  { %v6713_v16 = vadd.f32 1e-05, %v6697_v31 }
 0xc64   :  { %v6712_v19 = vadd.f32 1e-05, %v6696_v30  ;;  %v6663_v4 = vpop.xlane.xlu0 %6662 }
 0xc65   :  { %15577 = vrsqrt.f32 %v6713_v16  ;;  %v6699_v50 = vmul.f32 0.0625, %v6663_v4  ;;  %v6660_v41 = vpop.xlane.xlu1 %6659 }
 0xc66   :  { %15579 = vrsqrt.f32 %v6712_v19  ;;  %v6698_v58 = vmul.f32 0.0625, %v6660_v41 }
 0xc67   :  { %v6715_v21 = vadd.f32 1e-05, %v6699_v50 }
 0xc68   :  { %v6714_v38 = vadd.f32 1e-05, %v6698_v58  ;;  %v6669_v55 = vpop.xlane.xlu0 %6668 }
 0xc69   :  { %15581 = vrsqrt.f32 %v6715_v21  ;;  %v6701_v20 = vmul.f32 0.0625, %v6669_v55  ;;  %v6666_v42 = vpop.xlane.xlu1 %6665 }
 0xc6a   :  { %15583 = vrsqrt.f32 %v6714_v38  ;;  %v6700_v25 = vmul.f32 0.0625, %v6666_v42 }
 0xc6b   :  { %v6717_v7 = vadd.f32 1e-05, %v6701_v20 }
 0xc6c   :  { %v6716_v26 = vadd.f32 1e-05, %v6700_v25  ;;  %v6675_v37 = vpop.xlane.xlu0 %6674 }
 0xc6d   :  { %15585 = vrsqrt.f32 %v6717_v7  ;;  %v6703_v9 = vmul.f32 0.0625, %v6675_v37  ;;  %v6672_v11 = vpop.xlane.xlu1 %6671 }
 0xc6e   :  { %15587 = vrsqrt.f32 %v6716_v26  ;;  %v6702_v3 = vmul.f32 0.0625, %v6672_v11 }
 0xc6f   :  { %v15578_v47 = vpop.eup %15577  ;;  %v6719_v61 = vadd.f32 1e-05, %v6703_v9 }
 0xc70   :  { %v15580_v35 = vpop.eup %15579  ;;  %v6718_v27 = vadd.f32 1e-05, %v6702_v3  ;;  %v6681_v45 = vpop.xlane.xlu0 %6680  ;;  %v6745_v8 = vmul.f32 %v15578_v47, %v17545_v14 }
 0xc71   :  { %15589 = vrsqrt.f32 %v6719_v61  ;;  %v6705_v43 = vmul.f32 0.0625, %v6681_v45  ;;  %v6678_v15 = vpop.xlane.xlu1 %6677  ;;  %v6744_v24 = vmul.f32 %v15580_v35, %v17548_v29 }
 0xc72   :  { %15591 = vrsqrt.f32 %v6718_v27  ;;  %v6704_v13 = vmul.f32 0.0625, %v6678_v15  ;;  %v6765_v63 = vmul.f32 %v17637_v54, %v6745_v8 }
 0xc73   :  { %v15582_v2 = vpop.eup %15581  ;;  %v6721_v6 = vadd.f32 1e-05, %v6705_v43  ;;  %v6764_v56 = vmul.f32 %v17637_v54, %v6744_v24 }
 0xc74   :  { %v15584_v62 = vpop.eup %15583  ;;  %v6720_v31 = vadd.f32 1e-05, %v6704_v13  ;;  %v6687_v17 = vpop.xlane.xlu0 %6686  ;;  %v6747_v30 = vmul.f32 %v15582_v2, %v17555_v60  ;;  %v17666_v50 = vadd.f32 %v17642_v5, %v6765_v63 }
 0xc75   :  { %15593 = vrsqrt.f32 %v6721_v6  ;;  %v6707_v14 = vmul.f32 0.0625, %v6687_v17  ;;  %v6684_v16 = vpop.xlane.xlu1 %6683  ;;  %v17662_v19 = vadd.f32 %v17642_v5, %v6764_v56  ;;  %v6746_v29 = vmul.f32 %v15584_v62, %v17559_v0 }
 0xc76   :  { %15595 = vrsqrt.f32 %v6720_v31  ;;  %v6706_v4 = vmul.f32 0.0625, %v6684_v16  ;;  %19548 = vst [vmem:[#allocation10_spill] sm:$0xff] %v17666_v50  ;;  %v6767_v41 = vmul.f32 %v17637_v54, %v6747_v30 }
 0xc77   :  { %19547 = vst [vmem:[#allocation9_spill] sm:$0xff] %v17662_v19  ;;  %v15586_v58 = vpop.eup %15585  ;;  %v6723_v21 = vadd.f32 1e-05, %v6707_v14  ;;  %14932 = vmatprep.mubr.msk.f32.mxu0 %vm54_vm0, %v17662_v19  ;;  %v6766_v60 = vmul.f32 %v17637_v54, %v6746_v29 }
 0xc78   :  { %v15588_v38 = vpop.eup %15587  ;;  %v6722_v55 = vadd.f32 1e-05, %v6706_v4  ;;  %14933 = vmatmul.mubr.msk.f32.gmra.mrb[86].mxu0 %vm54_vm0, %v17666_v50  ;;  %v6693_v0 = vpop.xlane.xlu0 %6692  ;;  %v6749_v20 = vmul.f32 %v15586_v58, %v17567_v48  ;;  %v17680_v9 = vadd.f32 %v17642_v5, %v6767_v41 }
 0xc79   :  { %15597 = vrsqrt.f32 %v6723_v21  ;;  %v6709_v42 = vmul.f32 0.0625, %v6693_v0  ;;  %v6690_v25 = vpop.xlane.xlu1 %6689  ;;  %v17676_v7 = vadd.f32 %v17642_v5, %v6766_v60  ;;  %v6748_v26 = vmul.f32 %v15588_v38, %v17571_v23 }
 0xc7a   :  { %15599 = vrsqrt.f32 %v6722_v55  ;;  %v6708_v37 = vmul.f32 0.0625, %v6690_v25  ;;  %19550 = vst [vmem:[#allocation14_spill] sm:$0xff] %v17680_v9  ;;  %v6769_v11 = vmul.f32 %v17637_v54, %v6749_v20 }
 0xc7b   :  { %19549 = vst [vmem:[#allocation12_spill] sm:$0xff] %v17676_v7  ;;  %v15590_v3 = vpop.eup %15589  ;;  %v6725_v47 = vadd.f32 1e-05, %v6709_v42  ;;  %14935 = vmatprep.mubr.msk.f32.mxu0 %vm54_vm0, %v17676_v7  ;;  %v6768_v48 = vmul.f32 %v17637_v54, %v6748_v26 }
 0xc7c   :  { %v15592_v61 = vpop.eup %15591  ;;  %v6724_v35 = vadd.f32 1e-05, %v6708_v37  ;;  %14936 = vmatmul.mubr.msk.f32.gmra.mrb[88].mxu0 %vm54_vm0, %v17680_v9  ;;  %v6751_v23 = vmul.f32 %v15590_v3, %v17579_v59  ;;  %v17694_v8 = vadd.f32 %v17642_v5, %v6769_v11 }
 0xc7d   :  { %15601 = vrsqrt.f32 %v6725_v47  ;;  %v17690_v27 = vadd.f32 %v17642_v5, %v6768_v48  ;;  %v6750_v45 = vmul.f32 %v15592_v61, %v17583_v51 }
 0xc7e   :  { %15603 = vrsqrt.f32 %v6724_v35  ;;  %19552 = vst [vmem:[#allocation11_spill] sm:$0xff] %v17694_v8  ;;  %v6771_v43 = vmul.f32 %v17637_v54, %v6751_v23 }
 0xc7f   :  { %19551 = vst [vmem:[#allocation13_spill] sm:$0xff] %v17690_v27  ;;  %v15594_v15 = vpop.eup %15593  ;;  %14938 = vmatprep.mubr.msk.f32.mxu0 %vm54_vm0, %v17690_v27  ;;  %v6770_v24 = vmul.f32 %v17637_v54, %v6750_v45 }
 0xc80   :  { %v15596_v13 = vpop.eup %15595  ;;  %14939 = vmatmul.mubr.msk.f32.gmra.mrb[90].mxu0 %vm54_vm0, %v17694_v8  ;;  %v6753_v59 = vmul.f32 %v15594_v15, %v17591_v53  ;;  %v17708_v2 = vadd.f32 %v17642_v5, %v6771_v43 }
 0xc81   :  { %v17704_v51 = vadd.f32 %v17642_v5, %v6770_v24  ;;  %v6752_v63 = vmul.f32 %v15596_v13, %v17595_v12 }
 0xc82   :  { %19554 = vst [vmem:[#allocation16_spill] sm:$0xff] %v17708_v2  ;;  %v6773_v6 = vmul.f32 %v17637_v54, %v6753_v59 }
 0xc83   :  { %19553 = vst [vmem:[#allocation15_spill] sm:$0xff] %v17704_v51  ;;  %v15598_v56 = vpop.eup %15597  ;;  %14941 = vmatprep.mubr.msk.f32.mxu0 %vm54_vm0, %v17704_v51  ;;  %v6772_v62 = vmul.f32 %v17637_v54, %v6752_v63 }
 0xc84   :  { %v15600_v31 = vpop.eup %15599  ;;  %14942 = vmatmul.mubr.msk.f32.gmra.mrb[92].mxu0 %vm54_vm0, %v17708_v2  ;;  %v6755_v53 = vmul.f32 %v15598_v56, %v17603_v18  ;;  %v17722_v30 = vadd.f32 %v17642_v5, %v6773_v6 }
 0xc85   :  { %v17718_v17 = vadd.f32 %v17642_v5, %v6772_v62  ;;  %v6754_v12 = vmul.f32 %v15600_v31, %v17607_v57 }
 0xc86   :  { %19556 = vst [vmem:[#allocation18_spill] sm:$0xff] %v17722_v30  ;;  %v6775_v14 = vmul.f32 %v17637_v54, %v6755_v53 }
 0xc87   :  { %19555 = vst [vmem:[#allocation17_spill] sm:$0xff] %v17718_v17  ;;  %v15602_v16 = vpop.eup %15601  ;;  %14944 = vmatprep.mubr.msk.f32.mxu0 %vm54_vm0, %v17718_v17  ;;  %v6774_v29 = vmul.f32 %v17637_v54, %v6754_v12 }
 0xc88   :  { %v15604_v4 = vpop.eup %15603  ;;  %14945 = vmatmul.mubr.msk.f32.gmra.mrb[94].mxu0 %vm54_vm0, %v17722_v30  ;;  %v6757_v18 = vmul.f32 %v15602_v16, %v17615_v33  ;;  %v17736_v58 = vadd.f32 %v17642_v5, %v6775_v14 }
 0xc89   :  { %v17732_v41 = vadd.f32 %v17642_v5, %v6774_v29  ;;  %v6756_v57 = vmul.f32 %v15604_v4, %v17619_v32  ;;  %v13946_v32 = vld [vmem:[%s19463_s2 + $0x8] sm:$0xff] }
 0xc8a   :  { %19558 = vst [vmem:[#allocation20_spill] sm:$0xff] %v17736_v58  ;;  %v6777_v21 = vmul.f32 %v17637_v54, %v6757_v18 }
 0xc8b   :  { %19557 = vst [vmem:[#allocation19_spill] sm:$0xff] %v17732_v41  ;;  %14947 = vmatprep.mubr.msk.f32.mxu0 %vm54_vm0, %v17732_v41  ;;  %v6776_v60 = vmul.f32 %v17637_v54, %v6756_v57  ;;  %v19561_v54 = vld [vmem:[#allocation4_spill] sm:$0xff] }
 0xc8c   :  { %14948 = vmatmul.mubr.msk.f32.gmra.mrb[96].mxu0 %vm54_vm0, %v17736_v58  ;;  %v17748_v38 = vadd.f32 %v17642_v5, %v6777_v21  ;;  %v6820_v55 = vrot.slane %v13946_v32, %v19561_v54 }
 0xc8d   :  { %v17745_v33 = vadd.f32 %v17642_v5, %v6776_v60 }
 0xc8e   :  { %19560 = vst [vmem:[#allocation22_spill] sm:$0xff] %v17748_v38 }
 0xc8f   :  { %19559 = vst [vmem:[#allocation21_spill] sm:$0xff] %v17745_v33  ;;  %14950 = vmatprep.mubr.msk.f32.mxu0 %vm54_vm0, %v17745_v33 }
 0xc90   :  { %14951 = vmatmul.mubr.msk.f32.gmra.mrb[98].mxu0 %vm54_vm0, %v17748_v38 }
 0xc91   :  { %14970 = vmatprep.mubr.msk.f32.mxu0 %vm15765_vm2, %v19530_v40 }
 0xd12   :  { %v14931_v0 = vpop.f32.mrb[84].mxu0 }
 0xd13   :  { %v17760_v20 = vadd.f32 %v14931_v0, %v6820_v55  ;;  %v6953_v5 = vpop.f32.mrb[85].mxu0 }
 0xd14   :  { %v17762_v42 = vadd.f32 %v6953_v5, %v6820_v55 }
 0xd15   :  { %7130 = vrot.lane.b32.xlu0 %v17760_v20, %s15766_s9 }
 0xd16   :  { %7051 = vrot.lane.b32.xlu1 %v17762_v42, %s15766_s9  ;;  %v7032_v57 = vmul.f32 0.35355338, %v17762_v42 }
 0xd18   :  { %v7049_v21 = vrot.slane %v7032_v57, 7 }
 0xd4b   :  { %v14934_v25 = vpop.f32.mrb[86].mxu0 }
 0xd4c   :  { %v6963_v26 = vpop.f32.mrb[87].mxu0  ;;  %v17772_v47 = vadd.f32 %v14934_v25, %v6820_v55 }
 0xd4d   :  { %v17768_v37 = vadd.f32 %v6963_v26, %v6820_v55 }
 0xd4f   :  { %19562 = vst [vmem:[#allocation23_spill] sm:$0xff] %v17768_v37  ;;  %7209 = vrot.lane.b32.xlu1 %v17768_v37, %s15766_s9  ;;  %v14937_v11 = vpop.f32.mrb[88].mxu0  ;;  %v7034_v32 = vmul.f32 0.35355338, %v17768_v37 }
 0xd50   :  { %v6973_v3 = vpop.f32.mrb[89].mxu0  ;;  %v17780_v23 = vadd.f32 %v14937_v11, %v6820_v55 }
 0xd51   :  { %v17774_v48 = vadd.f32 %v6973_v3, %v6820_v55  ;;  %v7207_v5 = vrot.slane %v7034_v32, 7  ;;  %v7035_v3 = vmul.f32 0.35355338, %v17772_v47 }
 0xd52   :  { %19564 = vst [vmem:[#allocation25_spill] sm:$0xff] %v17780_v23 }
 0xd53   :  { %19563 = vst [vmem:[#allocation24_spill] sm:$0xff] %v17774_v48  ;;  %7288 = vrot.lane.b32.xlu1 %v17772_v47, %s15766_s9  ;;  %7367 = vrot.lane.b32.xlu0 %v17774_v48, %s15766_s9  ;;  %v14940_v61 = vpop.f32.mrb[90].mxu0  ;;  %v7036_v26 = vmul.f32 0.35355338, %v17774_v48 }
 0xd54   :  { %v6983_v35 = vpop.f32.mrb[91].mxu0  ;;  %v17788_v24 = vadd.f32 %v14940_v61, %v6820_v55  ;;  %v7286_v61 = vrot.slane %v7035_v3, 7 }
 0xd55   :  { %v17782_v45 = vadd.f32 %v6983_v35, %v6820_v55  ;;  %v7365_v11 = vrot.slane %v7036_v26, 7  ;;  %v7037_v35 = vmul.f32 0.35355338, %v17780_v23 }
 0xd56   :  { %19565 = vst [vmem:[#allocation26_spill] sm:$0xff] %v17788_v24  ;;  %v17912_v57 = vmul.f32 0.35355338, %v17788_v24 }
 0xd57   :  { %7446 = vrot.lane.b32.xlu1 %v17780_v23, %s15766_s9  ;;  %7525 = vrot.lane.b32.xlu0 %v17782_v45, %s15766_s9  ;;  %v14943_v43 = vpop.f32.mrb[92].mxu0 }
 0xd58   :  { %v6993_v15 = vpop.f32.mrb[93].mxu0  ;;  %v17796_v6 = vadd.f32 %v14943_v43, %v6820_v55  ;;  %v7444_v43 = vrot.slane %v7037_v35, 7 }
 0xd59   :  { %v17790_v13 = vadd.f32 %v6993_v15, %v6820_v55 }
 0xd5b   :  { %7604 = vrot.lane.b32.xlu1 %v17788_v24, %s15766_s9  ;;  %7683 = vrot.lane.b32.xlu0 %v17790_v13, %s15766_s9  ;;  %v14946_v59 = vpop.f32.mrb[94].mxu0 }
 0xd5c   :  { %v7003_v63 = vpop.f32.mrb[95].mxu0  ;;  %v17804_v53 = vadd.f32 %v14946_v59, %v6820_v55 }
 0xd5d   :  { %v17798_v56 = vadd.f32 %v7003_v63, %v6820_v55 }
 0xd5e   :  { %v17954_v35 = vmul.f32 0.35355338, %v17804_v53 }
 0xd5f   :  { %7762 = vrot.lane.b32.xlu1 %v17796_v6, %s15766_s9  ;;  %7841 = vrot.lane.b32.xlu0 %v17798_v56, %s15766_s9  ;;  %v14949_v62 = vpop.f32.mrb[96].mxu0 }
 0xd60   :  { %v7013_v31 = vpop.f32.mrb[97].mxu0  ;;  %v17812_v29 = vadd.f32 %v14949_v62, %v6820_v55  ;;  %v17899_v62 = vmul.f32 0.35355338, %v17782_v45 }
 0xd61   :  { %v17806_v12 = vadd.f32 %v7013_v31, %v6820_v55 }
 0xd63   :  { %7920 = vrot.lane.b32.xlu1 %v17804_v53, %s15766_s9  ;;  %7999 = vrot.lane.b32.xlu0 %v17806_v12, %s15766_s9  ;;  %v14952_v14 = vpop.f32.mrb[98].mxu0 }
 0xd64   :  { %v7023_v16 = vpop.f32.mrb[99].mxu0  ;;  %v17820_v18 = vadd.f32 %v14952_v14, %v6820_v55 }
 0xd65   :  { %v17814_v4 = vadd.f32 %v7023_v16, %v6820_v55  ;;  %v7033_v55 = vmul.f32 0.35355338, %v17760_v20  ;;  %v19487_v16 = vrot.slane %v17899_v62, 7 }
 0xd67   :  { %8078 = vrot.lane.b32.xlu1 %v17812_v29, %s15766_s9  ;;  %8157 = vrot.lane.b32.xlu0 %v17814_v4, %s15766_s9  ;;  %v7128_v25 = vrot.slane %v7033_v55, 7  ;;  %v19488_v55 = vrot.slane %v17912_v57, 7 }
 0xd6b   :  { %8236 = vrot.lane.b32.xlu1 %v17820_v18, %s15766_s9  ;;  %8565 = vrot.lane.b32.xlu0 %v17760_v20, %s15767_s10 }
 0xd6f   :  { %8489 = vrot.lane.b32.xlu1 %v17762_v42, %s15767_s10  ;;  %8641 = vrot.lane.b32.xlu0 %v17768_v37, %s15767_s10 }
 0xd73   :  { %8717 = vrot.lane.b32.xlu1 %v17772_v47, %s15767_s10  ;;  %8793 = vrot.lane.b32.xlu0 %v17774_v48, %s15767_s10 }
 0xd77   :  { %8869 = vrot.lane.b32.xlu1 %v17780_v23, %s15767_s10  ;;  %9097 = vrot.lane.b32.xlu0 %v17790_v13, %s15767_s10 }
 0xd7b   :  { %8945 = vrot.lane.b32.xlu1 %v17782_v45, %s15767_s10  ;;  %9249 = vrot.lane.b32.xlu0 %v17798_v56, %s15767_s10 }
 0xd7f   :  { %9021 = vrot.lane.b32.xlu1 %v17788_v24, %s15767_s10  ;;  %9401 = vrot.lane.b32.xlu0 %v17806_v12, %s15767_s10 }
 0xd83   :  { %9173 = vrot.lane.b32.xlu1 %v17796_v6, %s15767_s10  ;;  %9707 = vrot.lane.b32.xlu0 %v17762_v42, %s15768_s11 }
 0xd87   :  { %9325 = vrot.lane.b32.xlu1 %v17804_v53, %s15767_s10  ;;  %9705 = vrot.lane.b32.xlu0 %v7049_v21, %s15769_s12  ;;  %v7131_v0 = vpop.permute.xlu0 %7130 }
 0xd88   :  { %v7052_v60 = vpop.permute.xlu1 %7051 }
 0xd89   :  { %14954 = vmatpush3.xpose.msk.msra.mxu1 %vm285_vm3, %v7052_v60 }
 0xd8a   :  { %14958 = vmatprep.subr.mxu1 %v19530_v40 }
 0xd8b   :  { %9477 = vrot.lane.b32.xlu1 %v17812_v29, %s15767_s10  ;;  %9863 = vrot.lane.b32.xlu0 %v17768_v37, %s15768_s11 }
 0xd8c   :  { %14956 = vmatmul.mubr.msk.f32.vlgmr.msra.gmra.mrb[108].mxu1 %vm285_vm3, %v7049_v21  ;;  %v17915_v21 = vmul.f32 0.35355338, %v17790_v13 }
 0xd8d   :  { %14959 = vmatpush3.xpose.msk.msra.mxu1 %vm285_vm3, %v7131_v0  ;;  %14960 = vmatprep.mubr.msk.f32.mxu1 %vm15765_vm2, %v19530_v40 }
 0xd8e   :  { %14963 = vmatprep.subr.mxu1 %v19530_v40  ;;  %v19486_v0 = vrot.slane %v17915_v21, 7 }
 0xd8f   :  { %9629 = vrot.lane.b32.xlu1 %v17820_v18, %s15767_s10  ;;  %9861 = vrot.lane.b32.xlu0 %v7207_v5, %s15769_s12 }
 0xd90   :  { %14961 = vmatmul.mubr.msk.f32.vlgmr.msra.gmra.mrb[110].mxu1 %vm285_vm3, %v7128_v25 }
 0xd91   :  { %14965 = vmatprep.mubr.msk.f32.mxu1 %vm15765_vm2, %v19530_v40 }
 0xd93   :  { %9785 = vrot.lane.b32.xlu1 %v17760_v20, %s15768_s11  ;;  %10019 = vrot.lane.b32.xlu0 %v17774_v48, %s15768_s11 }
 0xd97   :  { %9783 = vrot.lane.b32.xlu1 %v7128_v25, %s15769_s12  ;;  %10017 = vrot.lane.b32.xlu0 %v7365_v11, %s15769_s12  ;;  %v17935_v25 = vmul.f32 0.35355338, %v17798_v56 }
 0xd9b   :  { %9941 = vrot.lane.b32.xlu1 %v17772_v47, %s15768_s11  ;;  %9553 = vrot.lane.b32.xlu0 %v17814_v4, %s15767_s10 }
 0xd9f   :  { %9939 = vrot.lane.b32.xlu1 %v7286_v61, %s15769_s12 }
 0xda3   :  { %10097 = vrot.lane.b32.xlu1 %v17780_v23, %s15768_s11 }
 0xda7   :  { %10095 = vrot.lane.b32.xlu1 %v7444_v43, %s15769_s12 }
 0xdc1   :  { %v7210_v15 = vpop.permute.xlu1 %7209 }
 0xdc2   :  { %14964 = vmatpush3.xpose.msk.msra.mxu1 %vm285_vm3, %v7210_v15 }
 0xdc3   :  { %14973 = vmatprep.subr.mxu1 %v19530_v40 }
 0xdc5   :  { %v7289_v59 = vpop.permute.xlu1 %7288  ;;  %14966 = vmatmul.mubr.msk.f32.vlgmr.msra.gmra.mrb[112].mxu1 %vm285_vm3, %v7207_v5  ;;  %v7368_v63 = vpop.permute.xlu0 %7367  ;;  %v17932_v5 = vmul.f32 0.35355338, %v17796_v6 }
 0xdc6   :  { %14969 = vmatpush3.xpose.msk.msra.mxu0 %vm285_vm3, %v7289_v59  ;;  %14974 = vmatpush3.xpose.msk.msra.mxu1 %vm285_vm3, %v7368_v63  ;;  %v19481_v63 = vrot.slane %v17954_v35, 7 }
 0xdc7   :  { %14975 = vmatprep.mubr.msk.f32.mxu1 %vm15765_vm2, %v19530_v40  ;;  %14978 = vmatprep.subr.mxu0 %v19530_v40  ;;  %v19482_v3 = vrot.slane %v17932_v5, 7 }
 0xdc8   :  { %14983 = vmatprep.subr.mxu1 %v19530_v40 }
 0xdc9   :  { %v7447_v31 = vpop.permute.xlu1 %7446  ;;  %14971 = vmatmul.mubr.msk.f32.vlgmr.msra.gmra.mrb[100].mxu0 %vm285_vm3, %v7286_v61  ;;  %14976 = vmatmul.mubr.msk.f32.vlgmr.msra.gmra.mrb[114].mxu1 %vm285_vm3, %v7365_v11  ;;  %v7526_v14 = vpop.permute.xlu0 %7525  ;;  %v19485_v61 = vrot.slane %v17935_v25, 7 }
 0xdca   :  { %14979 = vmatpush3.xpose.msk.msra.mxu0 %vm285_vm3, %v7447_v31  ;;  %14984 = vmatpush3.xpose.msk.msra.mxu1 %vm285_vm3, %v7526_v14  ;;  %v17976_v14 = vmul.f32 0.35355338, %v17812_v29 }
 0xdcb   :  { %14980 = vmatprep.mubr.msk.f32.mxu0 %vm15765_vm2, %v19530_v40  ;;  %14985 = vmatprep.mubr.msk.f32.mxu1 %vm15765_vm2, %v19530_v40 }
 0xdcc   :  { %14988 = vmatprep.subr.mxu0 %v19530_v40  ;;  %14993 = vmatprep.subr.mxu1 %v19530_v40 }
 0xdcd   :  { %v7605_v60 = vpop.permute.xlu1 %7604  ;;  %14981 = vmatmul.mubr.msk.f32.vlgmr.msra.gmra.mrb[102].mxu0 %vm285_vm3, %v7444_v43  ;;  %14986 = vmatmul.mubr.msk.f32.vlgmr.msra.gmra.mrb[116].mxu1 %vm285_vm3, %v19487_v16  ;;  %v7684_v32 = vpop.permute.xlu0 %7683  ;;  %v17957_v43 = vmul.f32 0.35355338, %v17806_v12 }
 0xdce   :  { %14989 = vmatpush3.xpose.msk.msra.mxu0 %vm285_vm3, %v7605_v60  ;;  %14994 = vmatpush3.xpose.msk.msra.mxu1 %vm285_vm3, %v7684_v32  ;;  %v17979_v60 = vmul.f32 0.35355338, %v17814_v4 }
 0xdcf   :  { %14990 = vmatprep.mubr.msk.f32.mxu0 %vm15765_vm2, %v19530_v40  ;;  %14995 = vmatprep.mubr.msk.f32.mxu1 %vm15765_vm2, %v19530_v40  ;;  %v19484_v31 = vrot.slane %v17957_v43, 7 }
 0xdd0   :  { %14998 = vmatprep.subr.mxu0 %v19530_v40  ;;  %15003 = vmatprep.subr.mxu1 %v19530_v40 }
 0xdd1   :  { %v7763_v26 = vpop.permute.xlu1 %7762  ;;  %14991 = vmatmul.mubr.msk.f32.vlgmr.msra.gmra.mrb[104].mxu0 %vm285_vm3, %v19488_v55  ;;  %14996 = vmatmul.mubr.msk.f32.vlgmr.msra.gmra.mrb[118].mxu1 %vm285_vm3, %v19486_v0  ;;  %v7842_v11 = vpop.permute.xlu0 %7841 }
 0xdd2   :  { %14999 = vmatpush3.xpose.msk.msra.mxu0 %vm285_vm3, %v7763_v26  ;;  %15004 = vmatpush3.xpose.msk.msra.mxu1 %vm285_vm3, %v7842_v11  ;;  %v19480_v11 = vrot.slane %v17976_v14, 7 }
 0xdd3   :  { %15000 = vmatprep.mubr.msk.f32.mxu0 %vm15765_vm2, %v19530_v40  ;;  %15005 = vmatprep.mubr.msk.f32.mxu1 %vm15765_vm2, %v19530_v40 }
 0xdd4   :  { %15008 = vmatprep.subr.mxu0 %v19530_v40  ;;  %15013 = vmatprep.subr.mxu1 %v19530_v40 }
 0xdd5   :  { %v7921_v15 = vpop.permute.xlu1 %7920  ;;  %15001 = vmatmul.mubr.msk.f32.vlgmr.msra.gmra.mrb[106].mxu0 %vm285_vm3, %v19482_v3  ;;  %15006 = vmatmul.mubr.msk.f32.vlgmr.msra.gmra.mrb[120].mxu1 %vm285_vm3, %v19485_v61  ;;  %v8000_v59 = vpop.permute.xlu0 %7999 }
 0xdd6   :  { %15009 = vmatpush3.xpose.msk.msra.mxu0 %vm285_vm3, %v7921_v15  ;;  %15014 = vmatpush3.xpose.msk.msra.mxu1 %vm285_vm3, %v8000_v59  ;;  %v19483_v15 = vrot.slane %v17979_v60, 7  ;;  %v17998_v59 = vmul.f32 0.35355338, %v17820_v18 }
 0xdd7   :  { %15010 = vmatprep.mubr.msk.f32.mxu0 %vm15765_vm2, %v19530_v40  ;;  %15015 = vmatprep.mubr.msk.f32.mxu1 %vm15765_vm2, %v19530_v40 }
 0xdd8   :  { %15018 = vmatprep.subr.mxu0 %v19530_v40  ;;  %15023 = vmatprep.subr.mxu1 %v19530_v40 }
 0xdd9   :  { %v8079_v32 = vpop.permute.xlu1 %8078  ;;  %15011 = vmatmul.mubr.msk.f32.vlgmr.msra.gmra.mrb[108].mxu0 %vm285_vm3, %v19481_v63  ;;  %15016 = vmatmul.mubr.msk.f32.vlgmr.msra.gmra.mrb[122].mxu1 %vm285_vm3, %v19484_v31  ;;  %v8158_v26 = vpop.permute.xlu0 %8157 }
 0xdda   :  { %15019 = vmatpush3.xpose.msk.msra.mxu0 %vm285_vm3, %v8079_v32  ;;  %15024 = vmatpush3.xpose.msk.msra.mxu1 %vm285_vm3, %v8158_v26  ;;  %v19479_v26 = vrot.slane %v17998_v59, 7 }
 0xddb   :  { %15020 = vmatprep.mubr.msk.f32.mxu0 %vm15765_vm2, %v19530_v40  ;;  %15025 = vmatprep.mubr.msk.f32.mxu1 %vm15765_vm2, %v19530_v40 }
 0xddc   :  { %15028 = vmatprep.subr.mxu0 %v19530_v40  ;;  %15033 = vmatprep.subr.mxu1 %v19530_v40 }
 0xddd   :  { %15021 = vmatmul.mubr.msk.f32.vlgmr.msra.gmra.mrb[110].mxu0 %vm285_vm3, %v19480_v11  ;;  %v8237_v32 = vpop.permute.xlu1 %8236  ;;  %15026 = vmatmul.mubr.msk.f32.vlgmr.msra.gmra.mrb[124].mxu1 %vm285_vm3, %v19483_v15  ;;  %v8566_v39 = vpop.permute.xlu0 %8565 }
 0xdde   :  { %15029 = vmatpush3.xpose.msk.msra.mxu0 %vm285_vm3, %v8237_v32  ;;  %15030 = vmatprep.mubr.msk.f32.mxu0 %vm15765_vm2, %v19530_v40 }
 0xddf   :  { %15038 = vmatprep.subr.mxu0 %v19530_v40  ;;  %15035 = vmatprep.mubr.msk.f32.mxu1 %vm15765_vm2, %v19530_v40 }
 0xde1   :  { %v8490_v22 = vpop.permute.xlu1 %8489  ;;  %15031 = vmatmul.mubr.msk.f32.vlgmr.msra.gmra.mrb[112].mxu0 %vm285_vm3, %v19479_v26 }
 0xde2   :  { %15034 = vmatpush3.msra.mxu1 %v8490_v22  ;;  %15039 = vmatpush3.msra.mxu0 %v8566_v39 }
 0xde3   :  { %15043 = vmatprep.subr.mxu1 %v19530_v40  ;;  %15040 = vmatprep.mubr.msk.f32.mxu0 %vm15765_vm2, %v19530_v40 }
 0xde4   :  { %15048 = vmatprep.subr.mxu0 %v19530_v40 }
 0xe5f   :  { %v18022_v32 = vpop.f32.mrb[108].mxu1 }
 0xe60   :  { %v14957_v52 = vpop.f32.mrb[109].mxu1  ;;  %v8313_v28 = vsel %vm8312_vm5, %v18022_v32, -inf }
 0xe61   :  { %8314 = vmax.xlane.f32.xlu0 %v8313_v28 }
 0xe63   :  { %v18026_v49 = vpop.f32.mrb[110].mxu1 }
 0xe64   :  { %v14962_v26 = vpop.f32.mrb[111].mxu1  ;;  %v8316_v22 = vsel %vm8312_vm5, %v18026_v49, -inf }
 0xe65   :  { %8317 = vmax.xlane.f32.xlu1 %v8316_v22 }
 0xe98   :  { %v18030_v39 = vpop.f32.mrb[112].mxu1 }
 0xe99   :  { %v14967_v11 = vpop.f32.mrb[113].mxu1  ;;  %v8319_v55 = vsel %vm8312_vm5, %v18030_v39, -inf }
 0xe9c   :  { %v18032_v63 = vpop.f32.mrb[100].mxu0  ;;  %v18034_v3 = vpop.f32.mrb[114].mxu1 }
 0xe9d   :  { %v14972_v15 = vpop.f32.mrb[101].mxu0  ;;  %v14977_v52 = vpop.f32.mrb[115].mxu1  ;;  %v8322_v31 = vsel %vm8312_vm5, %v18032_v63, -inf  ;;  %v8325_v28 = vsel %vm8312_vm5, %v18034_v3, -inf }
 0xe9e   :  { %8323 = vmax.xlane.f32.xlu0 %v8322_v31  ;;  %8326 = vmax.xlane.f32.xlu1 %v8325_v28 }
 0xea0   :  { %v18040_v26 = vpop.f32.mrb[102].mxu0  ;;  %v18042_v22 = vpop.f32.mrb[116].mxu1 }
 0xea1   :  { %v14982_v61 = vpop.f32.mrb[103].mxu0  ;;  %v14987_v11 = vpop.f32.mrb[117].mxu1  ;;  %v8328_v0 = vsel %vm8312_vm5, %v18040_v26, -inf  ;;  %v8331_v15 = vsel %vm8312_vm5, %v18042_v22, -inf }
 0xea2   :  { %8329 = vmax.xlane.f32.xlu0 %v8328_v0  ;;  %8332 = vmax.xlane.f32.xlu1 %v8331_v15  ;;  %v18056_v11 = vpop.permute.xlu0 %8641 }
 0xea4   :  { %v18048_v52 = vpop.f32.mrb[104].mxu0  ;;  %v18050_v16 = vpop.f32.mrb[118].mxu1 }
 0xea5   :  { %v14992_v31 = vpop.f32.mrb[105].mxu0  ;;  %v14997_v28 = vpop.f32.mrb[119].mxu1  ;;  %v8337_v61 = vsel %vm8312_vm5, %v18050_v16, -inf }
 0xea6   :  { %8320 = vmax.xlane.f32.xlu0 %v8319_v55  ;;  %8338 = vmax.xlane.f32.xlu1 %v8337_v61  ;;  %v8334_v31 = vsel %vm8312_vm5, %v18048_v52, -inf  ;;  %v18072_v8 = vpop.permute.xlu0 %8793 }
 0xea8   :  { %v18058_v54 = vpop.f32.mrb[106].mxu0  ;;  %v18060_v0 = vpop.f32.mrb[120].mxu1 }
 0xea9   :  { %v15002_v15 = vpop.f32.mrb[107].mxu0  ;;  %v15007_v36 = vpop.f32.mrb[121].mxu1  ;;  %v8343_v28 = vsel %vm8312_vm5, %v18060_v0, -inf  ;;  %v8340_v51 = vsel %vm8312_vm5, %v18058_v54, -inf }
 0xeaa   :  { %8335 = vmax.xlane.f32.xlu0 %v8334_v31  ;;  %8344 = vmax.xlane.f32.xlu1 %v8343_v28  ;;  %v18080_v28 = vpop.permute.xlu0 %9097 }
 0xeac   :  { %v18066_v34 = vpop.f32.mrb[108].mxu0  ;;  %v18068_v55 = vpop.f32.mrb[122].mxu1 }
 0xead   :  { %v15012_v61 = vpop.f32.mrb[109].mxu0  ;;  %v15017_v1 = vpop.f32.mrb[123].mxu1  ;;  %v8346_v31 = vsel %vm8312_vm5, %v18066_v34, -inf  ;;  %v8349_v38 = vsel %vm8312_vm5, %v18068_v55, -inf }
 0xeae   :  { %8341 = vmax.xlane.f32.xlu0 %v8340_v51  ;;  %v18088_v50 = vpop.permute.xlu0 %9249 }
 0xeb0   :  { %v18074_v36 = vpop.f32.mrb[110].mxu0  ;;  %v18076_v15 = vpop.f32.mrb[124].mxu1 }
 0xeb1   :  { %v15022_v27 = vpop.f32.mrb[111].mxu0  ;;  %v15027_v9 = vpop.f32.mrb[125].mxu1  ;;  %v8352_v7 = vsel %vm8312_vm5, %v18074_v36, -inf  ;;  %v8355_v58 = vsel %vm8312_vm5, %v18076_v15, -inf }
 0xeb2   :  { %8347 = vmax.xlane.f32.xlu0 %v8346_v31  ;;  %v18092_v9 = vpop.permute.xlu0 %9401 }
 0xeb3   :  { %19566 = vst [vmem:[#allocation27_spill] sm:$0xff] %v18092_v9 }
 0xeb4   :  { %v18082_v61 = vpop.f32.mrb[112].mxu0 }
 0xeb5   :  { %v15032_v1 = vpop.f32.mrb[113].mxu0  ;;  %v8358_v51 = vsel %vm8312_vm5, %v18082_v61, -inf }
 0xeb6   :  { %8353 = vmax.xlane.f32.xlu0 %v8352_v7  ;;  %v18094_v27 = vpop.permute.xlu0 %9707  ;;  %v18102_v7 = vpop.permute.xlu1 %8717 }
 0xeb7   :  { %19567 = vst [vmem:[#allocation28_spill] sm:$0xff] %v18094_v27 }
 0xeba   :  { %8359 = vmax.xlane.f32.xlu0 %v8358_v51  ;;  %v18096_v31 = vpop.permute.xlu0 %9705  ;;  %v18106_v10 = vpop.permute.xlu1 %8869 }
 0xebb   :  { %10253 = vrot.lane.b32.xlu1 %v17788_v24, %s15768_s11  ;;  %19568 = vst [vmem:[#allocation29_spill] sm:$0xff] %v18096_v31 }
 0xebe   :  { %v18100_v1 = vpop.permute.xlu0 %9863  ;;  %v18112_v33 = vpop.permute.xlu1 %8945 }
 0xebf   :  { %19569 = vst [vmem:[#allocation30_spill] sm:$0xff] %v18100_v1 }
 0xec2   :  { %v18104_v19 = vpop.permute.xlu0 %9861  ;;  %v18118_v30 = vpop.permute.xlu1 %9021 }
 0xec3   :  { %19570 = vst [vmem:[#allocation31_spill] sm:$0xff] %v18104_v19 }
 0xec6   :  { %v18108_v51 = vpop.permute.xlu0 %10019  ;;  %v18122_v2 = vpop.permute.xlu1 %9173 }
 0xec7   :  { %19571 = vst [vmem:[#allocation32_spill] sm:$0xff] %v18108_v51 }
 0xeca   :  { %v18116_v41 = vpop.permute.xlu0 %10017 }
 0xecb   :  { %19572 = vst [vmem:[#allocation33_spill] sm:$0xff] %v18116_v41 }
 0xece   :  { %v18120_v17 = vpop.permute.xlu0 %9553 }
 0xecf   :  { %19573 = vst [vmem:[#allocation34_spill] sm:$0xff] %v18120_v17 }
 0xed0   :  { %10175 = vrot.lane.b32.xlu0 %v17782_v45, %s15768_s11 }
 0xedf   :  { %8350 = vmax.xlane.f32.xlu1 %v8349_v38  ;;  %v18125_v38 = vpop.permute.xlu1 %9325 }
 0xee3   :  { %8356 = vmax.xlane.f32.xlu1 %v8355_v58  ;;  %v18127_v19 = vpop.permute.xlu1 %9477 }
 0xee4   :  { %19574 = vst [vmem:[#allocation35_spill] sm:$0xff] %v18127_v19 }
 0xee7   :  { %v18133_v41 = vpop.permute.xlu1 %9629 }
 0xee8   :  { %19575 = vst [vmem:[#allocation36_spill] sm:$0xff] %v18133_v41 }
 0xeeb   :  { %v18135_v31 = vpop.permute.xlu1 %9785 }
 0xeec   :  { %19576 = vst [vmem:[#allocation37_spill] sm:$0xff] %v18135_v31 }
 0xeee   :  { %v8315_v44 = vpop.xlane.xlu0 %8314 }
 0xeef   :  { %v8361_v46 = vsub.f32 %v18022_v32, %v8315_v44  ;;  %v18137_v27 = vpop.permute.xlu1 %9783 }
 0xef0   :  { %19577 = vst [vmem:[#allocation38_spill] sm:$0xff] %v18137_v27 }
 0xef1   :  { %v8377_v51 = vmul.f32 1.442695, %v8361_v46 }
 0xef3   :  { %15605 = vpow2.f32 %v8377_v51  ;;  %v18139_v17 = vpop.permute.xlu1 %9941 }
 0xef4   :  { %19578 = vst [vmem:[#allocation39_spill] sm:$0xff] %v18139_v17 }
 0xef7   :  { %v18141_v46 = vpop.permute.xlu1 %9939 }
 0xef8   :  { %19579 = vst [vmem:[#allocation40_spill] sm:$0xff] %v18141_v46 }
 0xefb   :  { %v18143_v44 = vpop.permute.xlu1 %10097 }
 0xefc   :  { %19580 = vst [vmem:[#allocation41_spill] sm:$0xff] %v18143_v44 }
 0xefd   :  { %v18129_v1 = vpop.eup %15605 }
 0xefe   :  { %v8409_v58 = vsel %vm8312_vm5, %v18129_v1, 0.0 }
 0xeff   :  { %8410 = vadd.xlane.f32.xlu1 %v8409_v58  ;;  %v18145_v32 = vpop.permute.xlu1 %10095 }
 0xf00   :  { %19581 = vst [vmem:[#allocation42_spill] sm:$0xff] %v18145_v32 }
 0xf03   :  { %v8318_v51 = vpop.xlane.xlu1 %8317 }
 0xf04   :  { %v8362_v9 = vsub.f32 %v18026_v49, %v8318_v51 }
 0xf06   :  { %v8379_v48 = vmul.f32 1.442695, %v8362_v9 }
 0xf2b   :  { %v8324_v24 = vpop.xlane.xlu0 %8323  ;;  %v8327_v23 = vpop.xlane.xlu1 %8326 }
 0xf2c   :  { %v8364_v58 = vsub.f32 %v18032_v63, %v8324_v24  ;;  %v8365_v46 = vsub.f32 %v18034_v3, %v8327_v23 }
 0xf2e   :  { %v8383_v41 = vmul.f32 1.442695, %v8364_v58  ;;  %v8385_v49 = vmul.f32 1.442695, %v8365_v46 }
 0xf2f   :  { %v8330_v31 = vpop.xlane.xlu0 %8329  ;;  %v8333_v17 = vpop.xlane.xlu1 %8332 }
 0xf30   :  { %v8366_v27 = vsub.f32 %v18040_v26, %v8330_v31  ;;  %15607 = vpow2.f32 %v8383_v41  ;;  %v8367_v51 = vsub.f32 %v18042_v22, %v8333_v17 }
 0xf31   :  { %15609 = vpow2.f32 %v8379_v48 }
 0xf32   :  { %v8387_v44 = vmul.f32 1.442695, %v8366_v27  ;;  %v8389_v48 = vmul.f32 1.442695, %v8367_v51 }
 0xf33   :  { %v8321_v19 = vpop.xlane.xlu0 %8320  ;;  %v8339_v63 = vpop.xlane.xlu1 %8338 }
 0xf34   :  { %v8363_v32 = vsub.f32 %v18030_v39, %v8321_v19  ;;  %15611 = vpow2.f32 %v8387_v44  ;;  %v8369_v23 = vsub.f32 %v18050_v16, %v8339_v63 }
 0xf36   :  { %v8381_v37 = vmul.f32 1.442695, %v8363_v32 }
 0xf37   :  { %v8336_v24 = vpop.xlane.xlu0 %8335 }
 0xf38   :  { %v8368_v9 = vsub.f32 %v18048_v52, %v8336_v24  ;;  %15613 = vpow2.f32 %v8381_v37  ;;  %v8393_v37 = vmul.f32 1.442695, %v8369_v23 }
 0xf39   :  { %15615 = vpow2.f32 %v8385_v49 }
 0xf3a   :  { %v8391_v26 = vmul.f32 1.442695, %v8368_v9  ;;  %v18154_v41 = vpop.eup %15607 }
 0xf3b   :  { %v8342_v3 = vpop.xlane.xlu0 %8341  ;;  %v8418_v39 = vsel %vm8312_vm5, %v18154_v41, 0.0  ;;  %v18160_v17 = vpop.eup %15609 }
 0xf3c   :  { %v8370_v19 = vsub.f32 %v18058_v54, %v8342_v3  ;;  %15617 = vpow2.f32 %v8391_v26  ;;  %8419 = vadd.xlane.f32.xlu0 %v8418_v39  ;;  %v8412_v16 = vsel %vm8312_vm5, %v18160_v17, 0.0 }
 0xf3d   :  { %15619 = vpow2.f32 %v8389_v48 }
 0xf3e   :  { %v8395_v22 = vmul.f32 1.442695, %v8370_v19  ;;  %v18165_v31 = vpop.eup %15611 }
 0xf3f   :  { %v8348_v52 = vpop.xlane.xlu0 %8347  ;;  %v8424_v58 = vsel %vm8312_vm5, %v18165_v31, 0.0 }
 0xf40   :  { %15621 = vpow2.f32 %v8395_v22  ;;  %v8372_v27 = vsub.f32 %v18066_v34, %v8348_v52  ;;  %8413 = vadd.xlane.f32.xlu0 %v8412_v16  ;;  %v8345_v16 = vpop.xlane.xlu1 %8344 }
 0xf41   :  { %15623 = vpow2.f32 %v8393_v37 }
 0xf42   :  { %v8399_v54 = vmul.f32 1.442695, %v8372_v27  ;;  %v18167_v46 = vpop.eup %15613  ;;  %v19582_v27 = vrot.slane %v17912_v57, 7 }
 0xf43   :  { %v8354_v44 = vpop.xlane.xlu0 %8353  ;;  %v8415_v34 = vsel %vm8312_vm5, %v18167_v46, 0.0  ;;  %v18174_v49 = vpop.eup %15615 }
 0xf44   :  { %15625 = vpow2.f32 %v8399_v54  ;;  %v8374_v32 = vsub.f32 %v18074_v36, %v8354_v44  ;;  %8425 = vadd.xlane.f32.xlu0 %v8424_v58  ;;  %8416 = vadd.xlane.f32.xlu1 %v8415_v34  ;;  %v8421_v63 = vsel %vm8312_vm5, %v18174_v49, 0.0  ;;  %v19583_v54 = vrot.slane %v17899_v62, 7  ;;  %v18208_v44 = vpop.permute.xlu1 %10253 }
 0xf46   :  { %v8403_v51 = vmul.f32 1.442695, %v8374_v32  ;;  %v18176_v24 = vpop.eup %15617  ;;  %v8371_v32 = vsub.f32 %v18060_v0, %v8345_v16 }
 0xf47   :  { %v8430_v36 = vsel %vm8312_vm5, %v18176_v24, 0.0  ;;  %v18182_v9 = vpop.eup %15619  ;;  %v8360_v58 = vpop.xlane.xlu0 %8359 }
 0xf48   :  { %15627 = vpow2.f32 %v8403_v51  ;;  %8422 = vadd.xlane.f32.xlu1 %v8421_v63  ;;  %8431 = vadd.xlane.f32.xlu0 %v8430_v36  ;;  %v8427_v23 = vsel %vm8312_vm5, %v18182_v9, 0.0  ;;  %v8376_v51 = vsub.f32 %v18082_v61, %v8360_v58  ;;  %v8397_v63 = vmul.f32 1.442695, %v8371_v32 }
 0xf49   :  { %v19586_v58 = vrot.slane %v17957_v43, 7 }
 0xf4a   :  { %v18184_v26 = vpop.eup %15621  ;;  %15629 = vpow2.f32 %v8397_v63 }
 0xf4b   :  { %v8436_v48 = vsel %vm8312_vm5, %v18184_v26, 0.0  ;;  %v18190_v3 = vpop.eup %15623  ;;  %v18262_v43 = vpop.permute.xlu0 %10175 }
 0xf4c   :  { %8428 = vadd.xlane.f32.xlu1 %v8427_v23  ;;  %8437 = vadd.xlane.f32.xlu0 %v8436_v48  ;;  %v8433_v22 = vsel %vm8312_vm5, %v18190_v3, 0.0  ;;  %v8407_v48 = vmul.f32 1.442695, %v8376_v51  ;;  %v19588_v51 = vrot.slane %v17932_v5, 7 }
 0xf4e   :  { %v18192_v19 = vpop.eup %15625  ;;  %15631 = vpow2.f32 %v8407_v48 }
 0xf4f   :  { %v8442_v39 = vsel %vm8312_vm5, %v18192_v19, 0.0 }
 0xf50   :  { %8434 = vadd.xlane.f32.xlu1 %v8433_v22  ;;  %8443 = vadd.xlane.f32.xlu0 %v8442_v39 }
 0xf52   :  { %v18198_v37 = vpop.eup %15627 }
 0xf53   :  { %v8448_v52 = vsel %vm8312_vm5, %v18198_v37, 0.0 }
 0xf54   :  { %8449 = vadd.xlane.f32.xlu0 %v8448_v52  ;;  %v18213_v23 = vpop.eup %15629 }
 0xf55   :  { %v8439_v39 = vsel %vm8312_vm5, %v18213_v23, 0.0 }
 0xf58   :  { %v18215_v62 = vpop.eup %15631 }
 0xf61   :  { %10251 = vrot.lane.b32.xlu1 %v19582_v27, %s15769_s12 }
 0xf6a   :  { %10173 = vrot.lane.b32.xlu0 %v19583_v54, %s15769_s12  ;;  %v19584_v54 = vrot.slane %v17915_v21, 7 }
 0xf6c   :  { %v8351_v34 = vpop.xlane.xlu1 %8350 }
 0xf6d   :  { %v8373_v36 = vsub.f32 %v18068_v55, %v8351_v34  ;;  %v8454_v55 = vsel %vm8312_vm5, %v18215_v62, 0.0 }
 0xf6f   :  { %v8401_v57 = vmul.f32 1.442695, %v8373_v36 }
 0xf70   :  { %v8357_v22 = vpop.xlane.xlu1 %8356 }
 0xf71   :  { %15633 = vpow2.f32 %v8401_v57 }
 0xf7b   :  { %v18219_v0 = vpop.eup %15633 }
 0xf7c   :  { %v8445_v61 = vsel %vm8312_vm5, %v18219_v0, 0.0 }
 0xf85   :  { %8440 = vadd.xlane.f32.xlu1 %v8439_v39 }
 0xf89   :  { %8446 = vadd.xlane.f32.xlu1 %v8445_v61  ;;  %8455 = vadd.xlane.f32.xlu0 %v8454_v55 }
 0xf8c   :  { %v8411_v52 = vpop.xlane.xlu1 %8410 }
 0xf8d   :  { %15635 = vrcp.f32 %v8411_v52 }
 0xf97   :  { %v15636_v27 = vpop.eup %15635 }
 0xf98   :  { %v8458_v16 = vmul.f32 %v15636_v27, %v18129_v1  ;;  %v8375_v1 = vsub.f32 %v18076_v15, %v8357_v22  ;;  %v19587_v15 = vrot.slane %v17979_v60, 7  ;;  %v19590_v27 = vrot.slane %v17976_v14, 7 }
 0xf9a   :  { %15036 = vmatmul.mubr.msk.f32.vlgmr.msra.gmra.mrb[126].mxu1 %vm285_vm3, %v8458_v16  ;;  %10409 = vrot.lane.b32.xlu1 %v17796_v6, %s15768_s11  ;;  %v8405_v32 = vmul.f32 1.442695, %v8375_v1 }
 0xf9b   :  { %15044 = vmatpush3.msra.mxu1 %v18056_v11  ;;  %15045 = vmatprep.mubr.msk.f32.mxu1 %vm15765_vm2, %v19530_v40  ;;  %v19585_v11 = vrot.slane %v17935_v25, 7 }
 0xf9c   :  { %15053 = vmatprep.subr.mxu1 %v19530_v40  ;;  %15637 = vpow2.f32 %v8405_v32 }
 0xf9f   :  { %10331 = vrot.lane.b32.xlu0 %v17790_v13, %s15768_s11 }
 0xfa3   :  { %10329 = vrot.lane.b32.xlu0 %v19584_v54, %s15769_s12 }
 0xfa6   :  { %v18251_v21 = vpop.eup %15637 }
 0xfa7   :  { %10487 = vrot.lane.b32.xlu0 %v17798_v56, %s15768_s11  ;;  %v8451_v25 = vsel %vm8312_vm5, %v18251_v21, 0.0 }
 0xfab   :  { %10485 = vrot.lane.b32.xlu0 %v19585_v11, %s15769_s12 }
 0xfaf   :  { %10643 = vrot.lane.b32.xlu0 %v17806_v12, %s15768_s11 }
 0xfb3   :  { %10641 = vrot.lane.b32.xlu0 %v19586_v58, %s15769_s12 }
 0xfb7   :  { %10799 = vrot.lane.b32.xlu0 %v17814_v4, %s15768_s11 }
 0xfbb   :  { %10797 = vrot.lane.b32.xlu0 %v19587_v15, %s15769_s12 }
 0xfbe   :  { %8452 = vadd.xlane.f32.xlu1 %v8451_v25 }
 0xfbf   :  { %11205 = vrot.lane.b32.xlu0 %v17760_v20, %s15770_s13 }
 0xfc3   :  { %11357 = vrot.lane.b32.xlu0 %v17772_v47, %s15770_s13 }
 0xfc7   :  { %11585 = vrot.lane.b32.xlu0 %v17782_v45, %s15770_s13 }
 0xfc9   :  { %v8420_v34 = vpop.xlane.xlu0 %8419 }
 0xfcb   :  { %11737 = vrot.lane.b32.xlu0 %v17790_v13, %s15770_s13  ;;  %v19589_v13 = vrot.slane %v17954_v35, 7 }
 0xfcd   :  { %v8414_v60 = vpop.xlane.xlu0 %8413 }
 0xfce   :  { %15639 = vrcp.f32 %v8414_v60  ;;  %v19598_v60 = vld [vmem:[#allocation27_spill] sm:$0xff] }
 0xfcf   :  { %10407 = vrot.lane.b32.xlu1 %v19588_v51, %s15769_s12  ;;  %15641 = vrcp.f32 %v8420_v34 }
 0xfd1   :  { %v8417_v20 = vpop.xlane.xlu1 %8416  ;;  %v8426_v63 = vpop.xlane.xlu0 %8425 }
 0xfd2   :  { %15643 = vrcp.f32 %v8417_v20 }
 0xfd3   :  { %10565 = vrot.lane.b32.xlu1 %v17804_v53, %s15768_s11  ;;  %15645 = vrcp.f32 %v8426_v63  ;;  %v19599_v63 = vld [vmem:[#allocation34_spill] sm:$0xff] }
 0xfd5   :  { %v8423_v47 = vpop.xlane.xlu1 %8422  ;;  %v8432_v45 = vpop.xlane.xlu0 %8431 }
 0xfd6   :  { %15647 = vrcp.f32 %v8423_v47  ;;  %v19603_v47 = vld [vmem:[#allocation40_spill] sm:$0xff] }
 0xfd7   :  { %10563 = vrot.lane.b32.xlu1 %v19589_v13, %s15769_s12  ;;  %15649 = vrcp.f32 %v8432_v45  ;;  %v19604_v45 = vld [vmem:[#allocation41_spill] sm:$0xff]  ;;  %v19605_v13 = vld [vmem:[#allocation42_spill] sm:$0xff] }
 0xfd8   :  { %v15640_v36 = vpop.eup %15639 }
 0xfd9   :  { %v8429_v48 = vpop.xlane.xlu1 %8428  ;;  %v8438_v5 = vpop.xlane.xlu0 %8437  ;;  %v8460_v57 = vmul.f32 %v15640_v36, %v18160_v17 }
 0xfda   :  { %15651 = vrcp.f32 %v8429_v48  ;;  %v15642_v39 = vpop.eup %15641 }
 0xfdb   :  { %10721 = vrot.lane.b32.xlu1 %v17812_v29, %s15768_s11  ;;  %15041 = vmatmul.mubr.msk.f32.vlgmr.msra.gmra.mrb[114].mxu0 %vm285_vm3, %v8460_v57  ;;  %15653 = vrcp.f32 %v8438_v5  ;;  %v8464_v55 = vmul.f32 %v15642_v39, %v18154_v41 }
 0xfdc   :  { %v15644_v22 = vpop.eup %15643  ;;  %15049 = vmatpush3.msra.mxu0 %v18102_v7  ;;  %15050 = vmatprep.mubr.msk.f32.mxu0 %vm15765_vm2, %v19530_v40 }
 0xfdd   :  { %v8435_v35 = vpop.xlane.xlu1 %8434  ;;  %v8444_v61 = vpop.xlane.xlu0 %8443  ;;  %15058 = vmatprep.subr.mxu0 %v19530_v40  ;;  %v8462_v17 = vmul.f32 %v15644_v22, %v18167_v46 }
 0xfde   :  { %15655 = vrcp.f32 %v8435_v35  ;;  %v15646_v52 = vpop.eup %15645 }
 0xfdf   :  { %10719 = vrot.lane.b32.xlu1 %v19590_v27, %s15769_s12  ;;  %15046 = vmatmul.mubr.msk.f32.vlgmr.msra.gmra.mrb[128].mxu1 %vm285_vm3, %v8462_v17  ;;  %15657 = vrcp.f32 %v8444_v61  ;;  %v8468_v14 = vmul.f32 %v15646_v52, %v18165_v31 }
 0xfe0   :  { %v15648_v7 = vpop.eup %15647  ;;  %15051 = vmatmul.mubr.msk.f32.vlgmr.msra.gmra.mrb[116].mxu0 %vm285_vm3, %v8464_v55  ;;  %15054 = vmatpush3.msra.mxu1 %v18072_v8 }
 0xfe1   :  { %15059 = vmatpush3.msra.mxu0 %v18106_v10  ;;  %15055 = vmatprep.mubr.msk.f32.mxu1 %vm15765_vm2, %v19530_v40  ;;  %v8466_v46 = vmul.f32 %v15648_v7, %v18174_v49  ;;  %v15650_v41 = vpop.eup %15649  ;;  %v8450_v16 = vpop.xlane.xlu0 %8449  ;;  %v19606_v7 = vld [vmem:[#allocation28_spill] sm:$0xff] }
 0xfe2   :  { %15060 = vmatprep.mubr.msk.f32.mxu0 %vm15765_vm2, %v19530_v40  ;;  %15063 = vmatprep.subr.mxu1 %v19530_v40  ;;  %15659 = vrcp.f32 %v8450_v16  ;;  %v8472_v49 = vmul.f32 %v15650_v41, %v18176_v24  ;;  %v19608_v41 = vld [vmem:[#allocation30_spill] sm:$0xff] }
 0xfe3   :  { %15068 = vmatprep.subr.mxu0 %v19530_v40  ;;  %10877 = vrot.lane.b32.xlu1 %v17820_v18, %s15768_s11 }
 0xfe4   :  { %v15652_v10 = vpop.eup %15651  ;;  %15056 = vmatmul.mubr.msk.f32.vlgmr.msra.gmra.mrb[130].mxu1 %vm285_vm3, %v8466_v46  ;;  %15061 = vmatmul.mubr.msk.f32.vlgmr.msra.gmra.mrb[118].mxu0 %vm285_vm3, %v8468_v14 }
 0xfe5   :  { %15064 = vmatpush3.msra.mxu1 %v18112_v33  ;;  %15069 = vmatpush3.msra.mxu0 %v18118_v30  ;;  %v8470_v8 = vmul.f32 %v15652_v10, %v18182_v9  ;;  %v15654_v31 = vpop.eup %15653  ;;  %v19591_v30 = vrot.slane %v17998_v59, 7  ;;  %v19592_v9 = vld [vmem:[#allocation23_spill] sm:$0xff]  ;;  %v18364_v1 = vpop.permute.xlu0 %10173 }
 0xfe6   :  { %15065 = vmatprep.mubr.msk.f32.mxu1 %vm15765_vm2, %v19530_v40  ;;  %15070 = vmatprep.mubr.msk.f32.mxu0 %vm15765_vm2, %v19530_v40  ;;  %v8476_v59 = vmul.f32 %v15654_v31, %v18184_v26  ;;  %v19595_v26 = vld [vmem:[#allocation36_spill] sm:$0xff]  ;;  %v19609_v10 = vld [vmem:[#allocation31_spill] sm:$0xff] }
 0xfe7   :  { %15073 = vmatprep.subr.mxu1 %v19530_v40  ;;  %15078 = vmatprep.subr.mxu0 %v19530_v40  ;;  %v19610_v31 = vld [vmem:[#allocation32_spill] sm:$0xff] }
 0xfe8   :  { %v15656_v54 = vpop.eup %15655  ;;  %10875 = vrot.lane.b32.xlu1 %v19591_v30, %s15769_s12  ;;  %15066 = vmatmul.mubr.msk.f32.vlgmr.msra.gmra.mrb[132].mxu1 %vm285_vm3, %v8470_v8 }
 0xfe9   :  { %15071 = vmatmul.mubr.msk.f32.vlgmr.msra.gmra.mrb[120].mxu0 %vm285_vm3, %v8472_v49  ;;  %15074 = vmatpush3.msra.mxu1 %v18080_v28  ;;  %v8474_v33 = vmul.f32 %v15656_v54, %v18190_v3  ;;  %v15658_v24 = vpop.eup %15657  ;;  %v19596_v3 = vld [vmem:[#allocation25_spill] sm:$0xff] }
 0xfea   :  { %15079 = vmatpush3.msra.mxu0 %v18122_v2  ;;  %15075 = vmatprep.mubr.msk.f32.mxu1 %vm15765_vm2, %v19530_v40  ;;  %v8480_v2 = vmul.f32 %v15658_v24, %v18192_v19  ;;  %v19597_v19 = vld [vmem:[#allocation26_spill] sm:$0xff]  ;;  %v19611_v54 = vld [vmem:[#allocation33_spill] sm:$0xff] }
 0xfeb   :  { %15080 = vmatprep.mubr.msk.f32.mxu0 %vm15765_vm2, %v19530_v40  ;;  %15083 = vmatprep.subr.mxu1 %v19530_v40 }
 0xfec   :  { %15088 = vmatprep.subr.mxu0 %v19530_v40  ;;  %11129 = vrot.lane.b32.xlu1 %v17762_v42, %s15770_s13  ;;  %v15660_v28 = vpop.eup %15659 }
 0xfed   :  { %15076 = vmatmul.mubr.msk.f32.vlgmr.msra.gmra.mrb[134].mxu1 %vm285_vm3, %v8474_v33  ;;  %15081 = vmatmul.mubr.msk.f32.vlgmr.msra.gmra.mrb[122].mxu0 %vm285_vm3, %v8476_v59  ;;  %v8484_v42 = vmul.f32 %v15660_v28, %v18198_v37  ;;  %v10252_v37 = vpop.permute.xlu1 %10251 }
 0xfee   :  { %15084 = vmatpush3.msra.mxu1 %v18088_v50  ;;  %15089 = vmatpush3.msra.mxu0 %v18125_v38  ;;  %v19593_v50 = vld [vmem:[#allocation35_spill] sm:$0xff]  ;;  %v19594_v38 = vld [vmem:[#allocation24_spill] sm:$0xff] }
 0xfef   :  { %15090 = vmatprep.mubr.msk.f32.mxu0 %vm15765_vm2, %v19530_v40  ;;  %15098 = vmatprep.subr.mxu0 %v19530_v40 }
 0xff0   :  { %11281 = vrot.lane.b32.xlu1 %v19592_v9, %s15770_s13  ;;  %15085 = vmatprep.mubr.msk.f32.mxu1 %vm15765_vm2, %v19530_v40 }
 0xff1   :  { %15091 = vmatmul.mubr.msk.f32.vlgmr.msra.gmra.mrb[124].mxu0 %vm285_vm3, %v8480_v2  ;;  %15093 = vmatprep.subr.mxu1 %v19530_v40 }
 0xff2   :  { %15099 = vmatpush3.msra.mxu0 %v19593_v50  ;;  %15100 = vmatprep.mubr.msk.f32.mxu0 %vm15765_vm2, %v19530_v40 }
 0xff3   :  { %15108 = vmatprep.subr.mxu0 %v19530_v40 }
 0xff4   :  { %11433 = vrot.lane.b32.xlu1 %v19594_v38, %s15770_s13 }
 0xff5   :  { %15101 = vmatmul.mubr.msk.f32.vlgmr.msra.gmra.mrb[126].mxu0 %vm285_vm3, %v8484_v42 }
 0xff6   :  { %15109 = vmatpush3.msra.mxu0 %v19595_v26  ;;  %15110 = vmatprep.mubr.msk.f32.mxu0 %vm15765_vm2, %v19530_v40 }
 0xff7   :  { %15118 = vmatprep.subr.mxu0 %v19530_v40 }
 0xff8   :  { %11509 = vrot.lane.b32.xlu1 %v19596_v3, %s15770_s13 }
 0xffc   :  { %11661 = vrot.lane.b32.xlu1 %v19597_v19, %s15770_s13 }
0x1000   :  { %11813 = vrot.lane.b32.xlu1 %v17796_v6, %s15770_s13 }
0x1012   :  { %v8441_v11 = vpop.xlane.xlu1 %8440 }
0x1013   :  { %15661 = vrcp.f32 %v8441_v11 }
0x1016   :  { %v8447_v32 = vpop.xlane.xlu1 %8446  ;;  %v8456_v58 = vpop.xlane.xlu0 %8455 }
0x1017   :  { %15663 = vrcp.f32 %v8447_v32 }
0x1018   :  { %15665 = vrcp.f32 %v8456_v58 }
0x101a   :  { %v10410_v36 = vpop.permute.xlu1 %10409  ;;  %v10332_v48 = vpop.permute.xlu0 %10331 }
0x101d   :  { %v15662_v15 = vpop.eup %15661 }
0x101e   :  { %v8478_v25 = vmul.f32 %v15662_v15, %v18213_v23  ;;  %v19600_v23 = vld [vmem:[#allocation37_spill] sm:$0xff]  ;;  %v10330_v5 = vpop.permute.xlu0 %10329 }
0x1020   :  { %15086 = vmatmul.mubr.msk.f32.vlgmr.msra.gmra.mrb[136].mxu1 %vm285_vm3, %v8478_v25 }
0x1021   :  { %v15664_v34 = vpop.eup %15663  ;;  %15094 = vmatpush3.msra.mxu1 %v19598_v60  ;;  %15095 = vmatprep.mubr.msk.f32.mxu1 %vm15765_vm2, %v19530_v40 }
0x1022   :  { %v15666_v6 = vpop.eup %15665  ;;  %v8482_v51 = vmul.f32 %v15664_v34, %v18219_v0  ;;  %15103 = vmatprep.subr.mxu1 %v19530_v40  ;;  %v19602_v0 = vld [vmem:[#allocation39_spill] sm:$0xff]  ;;  %v10488_v57 = vpop.permute.xlu0 %10487 }
0x1023   :  { %v8488_v20 = vmul.f32 %v15666_v6, %v18215_v62  ;;  %v19601_v62 = vld [vmem:[#allocation38_spill] sm:$0xff] }
0x1024   :  { %15096 = vmatmul.mubr.msk.f32.vlgmr.msra.gmra.mrb[138].mxu1 %vm285_vm3, %v8482_v51 }
0x1025   :  { %15104 = vmatpush3.msra.mxu1 %v19599_v63  ;;  %15111 = vmatmul.mubr.msk.f32.vlgmr.msra.gmra.mrb[128].mxu0 %vm285_vm3, %v8488_v20 }
0x1026   :  { %15119 = vmatpush3.xpose.msk.msra.mxu0 %vm285_vm3, %v19600_v23  ;;  %15120 = vmatprep.mubr.msk.f32.mxu0 %vm15765_vm2, %v19530_v40  ;;  %v10486_v39 = vpop.permute.xlu0 %10485 }
0x1027   :  { %15128 = vmatprep.subr.mxu0 %v19530_v40  ;;  %15105 = vmatprep.mubr.msk.f32.mxu1 %vm15765_vm2, %v19530_v40 }
0x1028   :  { %15113 = vmatprep.subr.mxu1 %v19530_v40 }
0x1029   :  { %15121 = vmatmul.mubr.msk.f32.vlgmr.msra.gmra.mrb[130].mxu0 %vm285_vm3, %v19601_v62 }
0x102a   :  { %15129 = vmatpush3.xpose.msk.msra.mxu0 %vm285_vm3, %v19602_v0  ;;  %15130 = vmatprep.mubr.msk.f32.mxu0 %vm15765_vm2, %v19530_v40  ;;  %v10644_v35 = vpop.permute.xlu0 %10643 }
0x102b   :  { %15138 = vmatprep.subr.mxu0 %v19530_v40 }
0x102d   :  { %15131 = vmatmul.mubr.msk.f32.vlgmr.msra.gmra.mrb[132].mxu0 %vm285_vm3, %v19603_v47 }
0x102e   :  { %15139 = vmatpush3.xpose.msk.msra.mxu0 %vm285_vm3, %v19604_v45  ;;  %15140 = vmatprep.mubr.msk.f32.mxu0 %vm15765_vm2, %v19530_v40  ;;  %v10642_v55 = vpop.permute.xlu0 %10641 }
0x102f   :  { %15148 = vmatprep.subr.mxu0 %v19530_v40 }
0x1031   :  { %15141 = vmatmul.mubr.msk.f32.vlgmr.msra.gmra.mrb[134].mxu0 %vm285_vm3, %v19605_v13 }
0x1032   :  { %15149 = vmatpush3.xpose.msk.msra.mxu0 %vm285_vm3, %v18208_v44  ;;  %15150 = vmatprep.mubr.msk.f32.mxu0 %vm15765_vm2, %v19530_v40  ;;  %v10800_v14 = vpop.permute.xlu0 %10799 }
0x1033   :  { %15158 = vmatprep.subr.mxu0 %v19530_v40 }
0x1035   :  { %15151 = vmatmul.mubr.msk.f32.vlgmr.msra.gmra.mrb[136].mxu0 %vm285_vm3, %v10252_v37 }
0x1036   :  { %15159 = vmatpush3.xpose.msk.msra.mxu0 %vm285_vm3, %v10410_v36  ;;  %15160 = vmatprep.mubr.msk.f32.mxu0 %vm15765_vm2, %v19530_v40  ;;  %v10798_v8 = vpop.permute.xlu0 %10797 }
0x1037   :  { %15168 = vmatprep.subr.mxu0 %v19530_v40 }
0x103a   :  { %v11206_v33 = vpop.permute.xlu0 %11205 }
0x104b   :  { %v8453_v44 = vpop.xlane.xlu1 %8452 }
0x104c   :  { %15667 = vrcp.f32 %v8453_v44 }
0x104f   :  { %v10408_v22 = vpop.permute.xlu1 %10407 }
0x1050   :  { %15161 = vmatmul.mubr.msk.f32.vlgmr.msra.gmra.mrb[138].mxu0 %vm285_vm3, %v10408_v22 }
0x1051   :  { %15170 = vmatprep.mubr.msk.f32.mxu0 %vm15765_vm2, %v19530_v40 }
0x1053   :  { %v10566_v61 = vpop.permute.xlu1 %10565 }
0x1054   :  { %15169 = vmatpush3.xpose.msk.msra.mxu0 %vm285_vm3, %v10566_v61 }
0x1055   :  { %15178 = vmatprep.subr.mxu0 %v19530_v40 }
0x1056   :  { %v15668_v17 = vpop.eup %15667 }
0x1057   :  { %v8486_v52 = vmul.f32 %v15668_v17, %v18251_v21  ;;  %v10564_v27 = vpop.permute.xlu1 %10563  ;;  %v19607_v21 = vld [vmem:[#allocation29_spill] sm:$0xff] }
0x1058   :  { %15171 = vmatmul.mubr.msk.f32.vlgmr.msra.gmra.mrb[140].mxu0 %vm285_vm3, %v10564_v27 }
0x1059   :  { %15106 = vmatmul.mubr.msk.f32.vlgmr.msra.gmra.mrb[140].mxu1 %vm285_vm3, %v8486_v52  ;;  %15180 = vmatprep.mubr.msk.f32.mxu0 %vm15765_vm2, %v19530_v40 }
0x105a   :  { %15114 = vmatpush3.xpose.msk.msra.mxu1 %vm285_vm3, %v19606_v7  ;;  %15115 = vmatprep.mubr.msk.f32.mxu1 %vm15765_vm2, %v19530_v40 }
0x105b   :  { %v10722_v46 = vpop.permute.xlu1 %10721  ;;  %15123 = vmatprep.subr.mxu1 %v19530_v40 }
0x105c   :  { %15179 = vmatpush3.xpose.msk.msra.mxu0 %vm285_vm3, %v10722_v46 }
0x105d   :  { %15116 = vmatmul.mubr.msk.f32.vlgmr.msra.gmra.mrb[142].mxu1 %vm285_vm3, %v19607_v21  ;;  %15188 = vmatprep.subr.mxu0 %v19530_v40 }
0x105e   :  { %15124 = vmatpush3.xpose.msk.msra.mxu1 %vm285_vm3, %v19608_v41  ;;  %15125 = vmatprep.mubr.msk.f32.mxu1 %vm15765_vm2, %v19530_v40 }
0x105f   :  { %v10720_v16 = vpop.permute.xlu1 %10719  ;;  %15133 = vmatprep.subr.mxu1 %v19530_v40 }
0x1060   :  { %15181 = vmatmul.mubr.msk.f32.vlgmr.msra.gmra.mrb[142].mxu0 %vm285_vm3, %v10720_v16 }
0x1061   :  { %15126 = vmatmul.mubr.msk.f32.vlgmr.msra.gmra.mrb[144].mxu1 %vm285_vm3, %v19609_v10  ;;  %15190 = vmatprep.mubr.msk.f32.mxu0 %vm15765_vm2, %v19530_v40 }
0x1062   :  { %15134 = vmatpush3.xpose.msk.msra.mxu1 %vm285_vm3, %v19610_v31  ;;  %15135 = vmatprep.mubr.msk.f32.mxu1 %vm15765_vm2, %v19530_v40 }
0x1063   :  { %v10878_v49 = vpop.permute.xlu1 %10877  ;;  %15143 = vmatprep.subr.mxu1 %v19530_v40 }
0x1064   :  { %15189 = vmatpush3.xpose.msk.msra.mxu0 %vm285_vm3, %v10878_v49 }
0x1065   :  { %15136 = vmatmul.mubr.msk.f32.vlgmr.msra.gmra.mrb[146].mxu1 %vm285_vm3, %v19611_v54  ;;  %15198 = vmatprep.subr.mxu0 %v19530_v40 }
0x1066   :  { %15144 = vmatpush3.xpose.msk.msra.mxu1 %vm285_vm3, %v18262_v43  ;;  %15145 = vmatprep.mubr.msk.f32.mxu1 %vm15765_vm2, %v19530_v40 }
0x1067   :  { %v10876_v30 = vpop.permute.xlu1 %10875  ;;  %15153 = vmatprep.subr.mxu1 %v19530_v40 }
0x1068   :  { %15191 = vmatmul.mubr.msk.f32.vlgmr.msra.gmra.mrb[144].mxu0 %vm285_vm3, %v10876_v30 }
0x1069   :  { %15199 = vmatpush3.msra.mxu0 %v11206_v33  ;;  %15146 = vmatmul.mubr.msk.f32.vlgmr.msra.gmra.mrb[148].mxu1 %vm285_vm3, %v18364_v1 }
0x106a   :  { %15154 = vmatpush3.xpose.msk.msra.mxu1 %vm285_vm3, %v10332_v48  ;;  %15155 = vmatprep.mubr.msk.f32.mxu1 %vm15765_vm2, %v19530_v40 }
0x106b   :  { %15163 = vmatprep.subr.mxu1 %v19530_v40  ;;  %15200 = vmatprep.mubr.msk.f32.mxu0 %vm15765_vm2, %v19530_v40  ;;  %v11130_v24 = vpop.permute.xlu1 %11129 }
0x106c   :  { %15208 = vmatprep.subr.mxu0 %v19530_v40 }
0x106d   :  { %v18463_v43 = vpop.f32.mrb[126].mxu1  ;;  %15156 = vmatmul.mubr.msk.f32.vlgmr.msra.gmra.mrb[150].mxu1 %vm285_vm3, %v10330_v5 }
0x106e   :  { %v15037_v59 = vpop.f32.mrb[127].mxu1  ;;  %15164 = vmatpush3.xpose.msk.msra.mxu1 %vm285_vm3, %v10488_v57  ;;  %15165 = vmatprep.mubr.msk.f32.mxu1 %vm15765_vm2, %v19530_v40 }
0x106f   :  { %15173 = vmatprep.subr.mxu1 %v19530_v40 }
0x1071   :  { %15166 = vmatmul.mubr.msk.f32.vlgmr.msra.gmra.mrb[152].mxu1 %vm285_vm3, %v10486_v39 }
0x1072   :  { %15174 = vmatpush3.xpose.msk.msra.mxu1 %vm285_vm3, %v10644_v35  ;;  %15175 = vmatprep.mubr.msk.f32.mxu1 %vm15765_vm2, %v19530_v40 }
0x1073   :  { %15183 = vmatprep.subr.mxu1 %v19530_v40 }
0x1075   :  { %15176 = vmatmul.mubr.msk.f32.vlgmr.msra.gmra.mrb[154].mxu1 %vm285_vm3, %v10642_v55 }
0x1076   :  { %15184 = vmatpush3.xpose.msk.msra.mxu1 %vm285_vm3, %v10800_v14  ;;  %15185 = vmatprep.mubr.msk.f32.mxu1 %vm15765_vm2, %v19530_v40 }
0x1077   :  { %15193 = vmatprep.subr.mxu1 %v19530_v40 }
0x1079   :  { %15186 = vmatmul.mubr.msk.f32.vlgmr.msra.gmra.mrb[156].mxu1 %vm285_vm3, %v10798_v8 }
0x107a   :  { %15194 = vmatpush3.msra.mxu1 %v11130_v24  ;;  %15195 = vmatprep.mubr.msk.f32.mxu1 %vm15765_vm2, %v19530_v40 }
0x107b   :  { %15203 = vmatprep.subr.mxu1 %v19530_v40 }
0x10ae   :  { %v18485_v2 = vpop.f32.mrb[114].mxu0 }
0x10af   :  { %v15042_v28 = vpop.f32.mrb[115].mxu0 }
0x10b2   :  { %v18487_v9 = vpop.f32.mrb[128].mxu1 }
0x10b3   :  { %v18489_v50 = vpop.f32.mrb[116].mxu0  ;;  %v15047_v42 = vpop.f32.mrb[129].mxu1 }
0x10b4   :  { %v15052_v38 = vpop.f32.mrb[117].mxu0 }
0x10b7   :  { %v18491_v26 = vpop.f32.mrb[130].mxu1  ;;  %v18493_v3 = vpop.f32.mrb[118].mxu0 }
0x10b8   :  { %v15057_v19 = vpop.f32.mrb[131].mxu1  ;;  %v15062_v37 = vpop.f32.mrb[119].mxu0 }
0x10bb   :  { %v18495_v1 = vpop.f32.mrb[132].mxu1 }
0x10bc   :  { %v18497_v11 = vpop.f32.mrb[120].mxu0  ;;  %v15067_v32 = vpop.f32.mrb[133].mxu1 }
0x10bd   :  { %v15072_v58 = vpop.f32.mrb[121].mxu0 }
0x10c0   :  { %v18499_v15 = vpop.f32.mrb[134].mxu1  ;;  %v18501_v25 = vpop.f32.mrb[122].mxu0 }
0x10c1   :  { %v15077_v34 = vpop.f32.mrb[135].mxu1  ;;  %v15082_v60 = vpop.f32.mrb[123].mxu0 }
0x10c4   :  { %v18503_v6 = vpop.f32.mrb[124].mxu0 }
0x10c5   :  { %v15092_v51 = vpop.f32.mrb[125].mxu0 }
0x10c8   :  { %v18505_v20 = vpop.f32.mrb[126].mxu0 }
0x10c9   :  { %v15102_v63 = vpop.f32.mrb[127].mxu0 }
0x10f3   :  { %v18507_v23 = vpop.f32.mrb[136].mxu1 }
0x10f4   :  { %v15087_v62 = vpop.f32.mrb[137].mxu1 }
0x10f7   :  { %v18509_v0 = vpop.f32.mrb[138].mxu1 }
0x10f8   :  { %v18511_v47 = vpop.f32.mrb[128].mxu0  ;;  %v15097_v45 = vpop.f32.mrb[139].mxu1 }
0x10f9   :  { %v15112_v13 = vpop.f32.mrb[129].mxu0 }
0x10fc   :  { %v18513_v36 = vpop.f32.mrb[130].mxu0 }
0x10fd   :  { %v15122_v48 = vpop.f32.mrb[131].mxu0  ;;  %v10956_v5 = vsel %vm8312_vm5, %v18513_v36, -inf }
0x10fe   :  { %10957 = vmax.xlane.f32.xlu1 %v10956_v5 }
0x1100   :  { %v18517_v57 = vpop.f32.mrb[132].mxu0 }
0x1101   :  { %v15132_v39 = vpop.f32.mrb[133].mxu0  ;;  %v10962_v59 = vsel %vm8312_vm5, %v18517_v57, -inf }
0x1104   :  { %v18519_v44 = vpop.f32.mrb[134].mxu0 }
0x1105   :  { %v15142_v22 = vpop.f32.mrb[135].mxu0  ;;  %v10968_v37 = vsel %vm8312_vm5, %v18519_v44, -inf }
0x1108   :  { %v18521_v35 = vpop.f32.mrb[136].mxu0 }
0x1109   :  { %v15152_v61 = vpop.f32.mrb[137].mxu0  ;;  %v10974_v34 = vsel %vm8312_vm5, %v18521_v35, -inf }
0x1123   :  { %v18523_v17 = vpop.f32.mrb[138].mxu0 }
0x1124   :  { %v15162_v55 = vpop.f32.mrb[139].mxu0  ;;  %v10980_v62 = vsel %vm8312_vm5, %v18523_v17, -inf }
0x112b   :  { %v18525_v52 = vpop.f32.mrb[140].mxu0 }
0x112c   :  { %v18527_v27 = vpop.f32.mrb[140].mxu1  ;;  %v15172_v7 = vpop.f32.mrb[141].mxu0  ;;  %v10986_v5 = vsel %vm8312_vm5, %v18525_v52, -inf }
0x112d   :  { %v15107_v46 = vpop.f32.mrb[141].mxu1 }
0x1130   :  { %v18529_v14 = vpop.f32.mrb[142].mxu1 }
0x1131   :  { %v15117_v21 = vpop.f32.mrb[143].mxu1  ;;  %v10953_v41 = vsel %vm8312_vm5, %v18529_v14, -inf }
0x1132   :  { %10954 = vmax.xlane.f32.xlu0 %v10953_v41  ;;  %v18587_v21 = vpop.permute.xlu1 %11281 }
0x1133   :  { %v18533_v16 = vpop.f32.mrb[142].mxu0 }
0x1134   :  { %v18535_v10 = vpop.f32.mrb[144].mxu1  ;;  %v15182_v8 = vpop.f32.mrb[143].mxu0  ;;  %v10992_v55 = vsel %vm8312_vm5, %v18533_v16, -inf }
0x1135   :  { %v15127_v31 = vpop.f32.mrb[145].mxu1  ;;  %v10959_v49 = vsel %vm8312_vm5, %v18535_v10, -inf }
0x1136   :  { %10960 = vmax.xlane.f32.xlu0 %v10959_v49  ;;  %v18589_v41 = vpop.permute.xlu1 %11433 }
0x1138   :  { %v18539_v54 = vpop.f32.mrb[146].mxu1 }
0x1139   :  { %v15137_v30 = vpop.f32.mrb[147].mxu1  ;;  %v10965_v33 = vsel %vm8312_vm5, %v18539_v54, -inf }
0x113a   :  { %10966 = vmax.xlane.f32.xlu1 %v10965_v33  ;;  %10963 = vmax.xlane.f32.xlu0 %v10962_v59  ;;  %v18591_v8 = vpop.permute.xlu1 %11509 }
0x113b   :  { %v18545_v24 = vpop.f32.mrb[144].mxu0 }
0x113c   :  { %v18547_v28 = vpop.f32.mrb[148].mxu1  ;;  %v15192_v42 = vpop.f32.mrb[145].mxu0  ;;  %v10998_v46 = vsel %vm8312_vm5, %v18545_v24, -inf }
0x113d   :  { %v15147_v38 = vpop.f32.mrb[149].mxu1  ;;  %v10971_v19 = vsel %vm8312_vm5, %v18547_v28, -inf }
0x113e   :  { %10972 = vmax.xlane.f32.xlu1 %v10971_v19  ;;  %10969 = vmax.xlane.f32.xlu0 %v10968_v37  ;;  %v18593_v31 = vpop.permute.xlu1 %11661 }
0x1140   :  { %v18553_v32 = vpop.f32.mrb[150].mxu1 }
0x1141   :  { %v15157_v58 = vpop.f32.mrb[151].mxu1  ;;  %v10977_v60 = vsel %vm8312_vm5, %v18553_v32, -inf }
0x1142   :  { %10975 = vmax.xlane.f32.xlu0 %v10974_v34  ;;  %10978 = vmax.xlane.f32.xlu1 %v10977_v60  ;;  %v18595_v49 = vpop.permute.xlu1 %11813 }
0x1144   :  { %v18559_v51 = vpop.f32.mrb[152].mxu1 }
0x1145   :  { %v15167_v63 = vpop.f32.mrb[153].mxu1  ;;  %v10983_v45 = vsel %vm8312_vm5, %v18559_v51, -inf }
0x1146   :  { %10981 = vmax.xlane.f32.xlu0 %v10980_v62  ;;  %10984 = vmax.xlane.f32.xlu1 %v10983_v45 }
0x1148   :  { %v18565_v13 = vpop.f32.mrb[154].mxu1 }
0x1149   :  { %v15177_v48 = vpop.f32.mrb[155].mxu1  ;;  %v10989_v39 = vsel %vm8312_vm5, %v18565_v13, -inf }
0x114a   :  { %10987 = vmax.xlane.f32.xlu0 %v10986_v5  ;;  %10990 = vmax.xlane.f32.xlu1 %v10989_v39 }
0x114c   :  { %v18571_v22 = vpop.f32.mrb[156].mxu1 }
0x114d   :  { %v15187_v61 = vpop.f32.mrb[157].mxu1  ;;  %v10995_v7 = vsel %vm8312_vm5, %v18571_v22, -inf }
0x114e   :  { %10993 = vmax.xlane.f32.xlu0 %v10992_v55  ;;  %10996 = vmax.xlane.f32.xlu1 %v10995_v7 }
0x1152   :  { %10999 = vmax.xlane.f32.xlu0 %v10998_v46 }
0x115f   :  { %11965 = vrot.lane.b32.xlu1 %v17804_v53, %s15770_s13 }
0x1163   :  { %12117 = vrot.lane.b32.xlu1 %v17812_v29, %s15770_s13 }
0x1168   :  { %11889 = vrot.lane.b32.xlu0 %v17798_v56, %s15770_s13 }
0x116c   :  { %12041 = vrot.lane.b32.xlu0 %v17806_v12, %s15770_s13  ;;  %v18602_v12 = vpop.permute.xlu0 %11357 }
0x1170   :  { %v18604_v59 = vpop.permute.xlu0 %11585 }
0x1174   :  { %v18606_v42 = vpop.permute.xlu0 %11737 }
0x118b   :  { %v10958_v53 = vpop.xlane.xlu1 %10957 }
0x118c   :  { %v11002_v30 = vsub.f32 %v18513_v36, %v10958_v53 }
0x118e   :  { %v11019_v29 = vmul.f32 1.442695, %v11002_v30 }
0x1190   :  { %15669 = vpow2.f32 %v11019_v29 }
0x119a   :  { %v18598_v33 = vpop.eup %15669 }
0x119b   :  { %v11052_v56 = vsel %vm8312_vm5, %v18598_v33, 0.0 }
0x119c   :  { %11053 = vadd.xlane.f32.xlu0 %v11052_v56 }
0x11bf   :  { %v10955_v38 = vpop.xlane.xlu0 %10954 }
0x11c0   :  { %v11001_v19 = vsub.f32 %v18529_v14, %v10955_v38 }
0x11c2   :  { %v11017_v37 = vmul.f32 1.442695, %v11001_v19 }
0x11c3   :  { %v10961_v58 = vpop.xlane.xlu0 %10960 }
0x11c4   :  { %15671 = vpow2.f32 %v11017_v37  ;;  %v11003_v36 = vsub.f32 %v18535_v10, %v10961_v58 }
0x11c6   :  { %v11021_v34 = vmul.f32 1.442695, %v11003_v36 }
0x11c7   :  { %v10967_v60 = vpop.xlane.xlu1 %10966  ;;  %v10964_v63 = vpop.xlane.xlu0 %10963 }
0x11c8   :  { %15673 = vpow2.f32 %v11021_v34  ;;  %v11005_v62 = vsub.f32 %v18539_v54, %v10967_v60  ;;  %v11004_v45 = vsub.f32 %v18517_v57, %v10964_v63 }
0x11ca   :  { %v11025_v48 = vmul.f32 1.442695, %v11005_v62  ;;  %v11023_v5 = vmul.f32 1.442695, %v11004_v45 }
0x11cb   :  { %v10973_v39 = vpop.xlane.xlu1 %10972  ;;  %v10970_v61 = vpop.xlane.xlu0 %10969 }
0x11cc   :  { %15675 = vpow2.f32 %v11025_v48  ;;  %v11007_v14 = vsub.f32 %v18547_v28, %v10973_v39  ;;  %v11006_v55 = vsub.f32 %v18519_v44, %v10970_v61 }
0x11cd   :  { %15677 = vpow2.f32 %v11023_v5 }
0x11ce   :  { %v18614_v7 = vpop.eup %15671  ;;  %v11029_v10 = vmul.f32 1.442695, %v11007_v14  ;;  %v11027_v46 = vmul.f32 1.442695, %v11006_v55 }
0x11cf   :  { %v10979_v53 = vpop.xlane.xlu1 %10978  ;;  %v10976_v30 = vpop.xlane.xlu0 %10975  ;;  %v11049_v54 = vsel %vm8312_vm5, %v18614_v7, 0.0 }
0x11d0   :  { %15679 = vpow2.f32 %v11029_v10  ;;  %v11009_v57 = vsub.f32 %v18553_v32, %v10979_v53  ;;  %v11008_v29 = vsub.f32 %v18521_v35, %v10976_v30  ;;  %11050 = vadd.xlane.f32.xlu1 %v11049_v54 }
0x11d1   :  { %15681 = vpow2.f32 %v11027_v46 }
0x11d2   :  { %v18620_v28 = vpop.eup %15673  ;;  %v11033_v44 = vmul.f32 1.442695, %v11009_v57  ;;  %v11031_v56 = vmul.f32 1.442695, %v11008_v29 }
0x11d3   :  { %v10985_v38 = vpop.xlane.xlu1 %10984  ;;  %v10982_v19 = vpop.xlane.xlu0 %10981  ;;  %v11055_v37 = vsel %vm8312_vm5, %v18620_v28, 0.0 }
0x11d4   :  { %15683 = vpow2.f32 %v11033_v44  ;;  %v11011_v58 = vsub.f32 %v18559_v51, %v10985_v38  ;;  %v11010_v36 = vsub.f32 %v18523_v17, %v10982_v19  ;;  %11056 = vadd.xlane.f32.xlu1 %v11055_v37 }
0x11d5   :  { %15685 = vpow2.f32 %v11031_v56 }
0x11d6   :  { %v18626_v32 = vpop.eup %15675  ;;  %v11037_v35 = vmul.f32 1.442695, %v11011_v58  ;;  %v11035_v34 = vmul.f32 1.442695, %v11010_v36 }
0x11d7   :  { %v18628_v60 = vpop.eup %15677  ;;  %v10991_v63 = vpop.xlane.xlu1 %10990  ;;  %v11061_v45 = vsel %vm8312_vm5, %v18626_v32, 0.0 }
0x11d8   :  { %v10988_v62 = vpop.xlane.xlu0 %10987  ;;  %15687 = vpow2.f32 %v11037_v35  ;;  %v11013_v48 = vsub.f32 %v18565_v13, %v10991_v63  ;;  %11062 = vadd.xlane.f32.xlu1 %v11061_v45  ;;  %v11058_v17 = vsel %vm8312_vm5, %v18628_v60, 0.0 }
0x11d9   :  { %v11012_v51 = vsub.f32 %v18525_v52, %v10988_v62  ;;  %15689 = vpow2.f32 %v11035_v34  ;;  %11059 = vadd.xlane.f32.xlu0 %v11058_v17 }
0x11da   :  { %v18636_v5 = vpop.eup %15679  ;;  %v11041_v39 = vmul.f32 1.442695, %v11013_v48 }
0x11db   :  { %v11039_v61 = vmul.f32 1.442695, %v11012_v51  ;;  %v18638_v14 = vpop.eup %15681  ;;  %v10997_v55 = vpop.xlane.xlu1 %10996  ;;  %v11067_v46 = vsel %vm8312_vm5, %v18636_v5, 0.0 }
0x11dc   :  { %v10994_v10 = vpop.xlane.xlu0 %10993  ;;  %15691 = vpow2.f32 %v11041_v39  ;;  %v11015_v52 = vsub.f32 %v18571_v22, %v10997_v55  ;;  %11068 = vadd.xlane.f32.xlu1 %v11067_v46  ;;  %v11064_v53 = vsel %vm8312_vm5, %v18638_v14, 0.0 }
0x11dd   :  { %v11014_v13 = vsub.f32 %v18533_v16, %v10994_v10  ;;  %15693 = vpow2.f32 %v11039_v61  ;;  %11065 = vadd.xlane.f32.xlu0 %v11064_v53 }
0x11de   :  { %v18646_v30 = vpop.eup %15683  ;;  %v11045_v54 = vmul.f32 1.442695, %v11015_v52 }
0x11df   :  { %v11043_v57 = vmul.f32 1.442695, %v11014_v13  ;;  %v18648_v29 = vpop.eup %15685  ;;  %v11073_v56 = vsel %vm8312_vm5, %v18646_v30, 0.0 }
0x11e0   :  { %v11000_v44 = vpop.xlane.xlu0 %10999  ;;  %15695 = vpow2.f32 %v11045_v54  ;;  %11074 = vadd.xlane.f32.xlu1 %v11073_v56  ;;  %v11070_v16 = vsel %vm8312_vm5, %v18648_v29, 0.0 }
0x11e1   :  { %v11016_v22 = vsub.f32 %v18545_v24, %v11000_v44  ;;  %15697 = vpow2.f32 %v11043_v57  ;;  %11071 = vadd.xlane.f32.xlu0 %v11070_v16 }
0x11e2   :  { %v18655_v38 = vpop.eup %15687 }
0x11e3   :  { %v11047_v19 = vmul.f32 1.442695, %v11016_v22  ;;  %v18657_v37 = vpop.eup %15689  ;;  %v11079_v58 = vsel %vm8312_vm5, %v18655_v38, 0.0 }
0x11e4   :  { %11080 = vadd.xlane.f32.xlu1 %v11079_v58  ;;  %v11076_v36 = vsel %vm8312_vm5, %v18657_v37, 0.0  ;;  %v18687_v61 = vpop.permute.xlu0 %11889 }
0x11e5   :  { %15699 = vpow2.f32 %v11047_v19  ;;  %11077 = vadd.xlane.f32.xlu0 %v11076_v36 }
0x11e6   :  { %v18663_v24 = vpop.eup %15691 }
0x11e7   :  { %v18665_v35 = vpop.eup %15693  ;;  %v11085_v34 = vsel %vm8312_vm5, %v18663_v24, 0.0 }
0x11e8   :  { %11086 = vadd.xlane.f32.xlu1 %v11085_v34  ;;  %v11082_v63 = vsel %vm8312_vm5, %v18665_v35, 0.0  ;;  %v18689_v55 = vpop.permute.xlu0 %12041 }
0x11e9   :  { %11083 = vadd.xlane.f32.xlu0 %v11082_v63 }
0x11ea   :  { %v18671_v62 = vpop.eup %15695 }
0x11eb   :  { %v18673_v45 = vpop.eup %15697  ;;  %v11091_v48 = vsel %vm8312_vm5, %v18671_v62, 0.0 }
0x11ec   :  { %11092 = vadd.xlane.f32.xlu1 %v11091_v48  ;;  %v11088_v51 = vsel %vm8312_vm5, %v18673_v45, 0.0 }
0x11ed   :  { %11089 = vadd.xlane.f32.xlu0 %v11088_v51 }
0x11ef   :  { %v18679_v17 = vpop.eup %15699 }
0x11f0   :  { %v11094_v39 = vsel %vm8312_vm5, %v18679_v17, 0.0 }
0x11f1   :  { %11095 = vadd.xlane.f32.xlu0 %v11094_v39 }
0x11fd   :  { %12269 = vrot.lane.b32.xlu1 %v17820_v18, %s15770_s13  ;;  %v18697_v18 = vpop.permute.xlu1 %11965 }
0x1207   :  { %12193 = vrot.lane.b32.xlu0 %v17814_v4, %s15770_s13  ;;  %v18699_v4 = vpop.permute.xlu1 %12117 }
0x1229   :  { %v11054_v10 = vpop.xlane.xlu0 %11053 }
0x122a   :  { %15701 = vrcp.f32 %v11054_v10 }
0x1234   :  { %v15702_v46 = vpop.eup %15701 }
0x1235   :  { %v11100_v52 = vmul.f32 %v15702_v46, %v18598_v33 }
0x1237   :  { %15201 = vmatmul.mubr.msk.f32.vlgmr.msra.gmra.mrb[146].mxu0 %vm285_vm3, %v11100_v52 }
0x1238   :  { %15209 = vmatpush3.msra.mxu0 %v18602_v12  ;;  %15210 = vmatprep.mubr.msk.f32.mxu0 %vm15765_vm2, %v19530_v40 }
0x1239   :  { %15218 = vmatprep.subr.mxu0 %v19530_v40 }
0x125d   :  { %v11051_v13 = vpop.xlane.xlu1 %11050 }
0x125e   :  { %15703 = vrcp.f32 %v11051_v13 }
0x1261   :  { %v11057_v53 = vpop.xlane.xlu1 %11056 }
0x1262   :  { %15705 = vrcp.f32 %v11057_v53 }
0x1265   :  { %v11063_v54 = vpop.xlane.xlu1 %11062 }
0x1266   :  { %15707 = vrcp.f32 %v11063_v54  ;;  %v11060_v33 = vpop.xlane.xlu0 %11059 }
0x1267   :  { %15709 = vrcp.f32 %v11060_v33 }
0x1268   :  { %v15704_v57 = vpop.eup %15703 }
0x1269   :  { %v11098_v12 = vmul.f32 %v15704_v57, %v18614_v7  ;;  %v11069_v44 = vpop.xlane.xlu1 %11068 }
0x126a   :  { %15711 = vrcp.f32 %v11069_v44  ;;  %v11066_v56 = vpop.xlane.xlu0 %11065 }
0x126b   :  { %15713 = vrcp.f32 %v11066_v56  ;;  %15196 = vmatmul.mubr.msk.f32.vlgmr.msra.gmra.mrb[158].mxu1 %vm285_vm3, %v11098_v12 }
0x126c   :  { %v15706_v22 = vpop.eup %15705  ;;  %15204 = vmatpush3.msra.mxu1 %v18587_v21  ;;  %15205 = vmatprep.mubr.msk.f32.mxu1 %vm15765_vm2, %v19530_v40 }
0x126d   :  { %v11102_v16 = vmul.f32 %v15706_v22, %v18620_v28  ;;  %v11075_v19 = vpop.xlane.xlu1 %11074  ;;  %15213 = vmatprep.subr.mxu1 %v19530_v40 }
0x126e   :  { %15715 = vrcp.f32 %v11075_v19  ;;  %v11072_v58 = vpop.xlane.xlu0 %11071 }
0x126f   :  { %15717 = vrcp.f32 %v11072_v58  ;;  %15206 = vmatmul.mubr.msk.f32.vlgmr.msra.gmra.mrb[160].mxu1 %vm285_vm3, %v11102_v16 }
0x1270   :  { %v15708_v7 = vpop.eup %15707  ;;  %15214 = vmatpush3.msra.mxu1 %v18589_v41  ;;  %15215 = vmatprep.mubr.msk.f32.mxu1 %vm15765_vm2, %v19530_v40 }
0x1271   :  { %v15710_v21 = vpop.eup %15709  ;;  %v11106_v36 = vmul.f32 %v15708_v7, %v18626_v32  ;;  %v11081_v34 = vpop.xlane.xlu1 %11080  ;;  %15223 = vmatprep.subr.mxu1 %v19530_v40 }
0x1272   :  { %v11104_v28 = vmul.f32 %v15710_v21, %v18628_v60  ;;  %15719 = vrcp.f32 %v11081_v34  ;;  %v11078_v63 = vpop.xlane.xlu0 %11077 }
0x1273   :  { %15721 = vrcp.f32 %v11078_v63  ;;  %15216 = vmatmul.mubr.msk.f32.vlgmr.msra.gmra.mrb[162].mxu1 %vm285_vm3, %v11106_v36 }
0x1274   :  { %v15712_v48 = vpop.eup %15711  ;;  %15211 = vmatmul.mubr.msk.f32.vlgmr.msra.gmra.mrb[148].mxu0 %vm285_vm3, %v11104_v28  ;;  %15224 = vmatpush3.msra.mxu1 %v18604_v59 }
0x1275   :  { %v15714_v41 = vpop.eup %15713  ;;  %v11110_v51 = vmul.f32 %v15712_v48, %v18636_v5  ;;  %15219 = vmatpush3.msra.mxu0 %v18591_v8  ;;  %v11087_v32 = vpop.xlane.xlu1 %11086  ;;  %15220 = vmatprep.mubr.msk.f32.mxu0 %vm15765_vm2, %v19530_v40 }
0x1276   :  { %v11108_v60 = vmul.f32 %v15714_v41, %v18638_v14  ;;  %15723 = vrcp.f32 %v11087_v32  ;;  %v11084_v39 = vpop.xlane.xlu0 %11083  ;;  %15225 = vmatprep.mubr.msk.f32.mxu1 %vm15765_vm2, %v19530_v40  ;;  %15228 = vmatprep.subr.mxu0 %v19530_v40  ;;  %v13937_v32 = vld [vmem:[%s19461_s1 + $0xb8] sm:$0xff] }
0x1277   :  { %15725 = vrcp.f32 %v11084_v39  ;;  %15233 = vmatprep.subr.mxu1 %v19530_v40  ;;  %15226 = vmatmul.mubr.msk.f32.vlgmr.msra.gmra.mrb[164].mxu1 %vm285_vm3, %v11110_v51  ;;  %v13936_v51 = vld [vmem:[%s19461_s1 + $0xb0] sm:$0xff] }
0x1278   :  { %v15716_v59 = vpop.eup %15715  ;;  %15221 = vmatmul.mubr.msk.f32.vlgmr.msra.gmra.mrb[150].mxu0 %vm285_vm3, %v11108_v60  ;;  %15234 = vmatpush3.msra.mxu1 %v18606_v42  ;;  %v15379_v39 = vpack.c.bf16 %v13937_v32, %v13936_v51 }
0x1279   :  { %v15718_v8 = vpop.eup %15717  ;;  %v11114_v5 = vmul.f32 %v15716_v59, %v18646_v30  ;;  %15229 = vmatpush3.msra.mxu0 %v18593_v31  ;;  %v11093_v14 = vpop.xlane.xlu1 %11092  ;;  %15230 = vmatprep.mubr.msk.f32.mxu0 %vm15765_vm2, %v19530_v40 }
0x127a   :  { %v11112_v10 = vmul.f32 %v15718_v8, %v18648_v29  ;;  %15727 = vrcp.f32 %v11093_v14  ;;  %v11090_v46 = vpop.xlane.xlu0 %11089  ;;  %15235 = vmatprep.mubr.msk.f32.mxu1 %vm15765_vm2, %v19530_v40  ;;  %15238 = vmatprep.subr.mxu0 %v19530_v40 }
0x127b   :  { %15729 = vrcp.f32 %v11090_v46  ;;  %15243 = vmatprep.subr.mxu1 %v19530_v40  ;;  %15236 = vmatmul.mubr.msk.f32.vlgmr.msra.gmra.mrb[166].mxu1 %vm285_vm3, %v11114_v5 }
0x127c   :  { %v15720_v42 = vpop.eup %15719  ;;  %15231 = vmatmul.mubr.msk.f32.vlgmr.msra.gmra.mrb[152].mxu0 %vm285_vm3, %v11112_v10  ;;  %15244 = vmatpush3.msra.mxu1 %v18687_v61 }
0x127d   :  { %v15722_v31 = vpop.eup %15721  ;;  %v11118_v30 = vmul.f32 %v15720_v42, %v18655_v38  ;;  %15239 = vmatpush3.msra.mxu0 %v18595_v49  ;;  %15240 = vmatprep.mubr.msk.f32.mxu0 %vm15765_vm2, %v19530_v40  ;;  %v12270_v53 = vpop.permute.xlu1 %12269 }
0x127e   :  { %v11116_v29 = vmul.f32 %v15722_v31, %v18657_v37  ;;  %v11096_v52 = vpop.xlane.xlu0 %11095  ;;  %15245 = vmatprep.mubr.msk.f32.mxu1 %vm15765_vm2, %v19530_v40  ;;  %15248 = vmatprep.subr.mxu0 %v19530_v40 }
0x127f   :  { %15731 = vrcp.f32 %v11096_v52  ;;  %15253 = vmatprep.subr.mxu1 %v19530_v40  ;;  %15246 = vmatmul.mubr.msk.f32.vlgmr.msra.gmra.mrb[168].mxu1 %vm285_vm3, %v11118_v30 }
0x1280   :  { %v15724_v61 = vpop.eup %15723  ;;  %15241 = vmatmul.mubr.msk.f32.vlgmr.msra.gmra.mrb[154].mxu0 %vm285_vm3, %v11116_v29  ;;  %15254 = vmatpush3.msra.mxu1 %v18689_v55 }
0x1281   :  { %v15726_v49 = vpop.eup %15725  ;;  %v11122_v38 = vmul.f32 %v15724_v61, %v18663_v24  ;;  %15249 = vmatpush3.msra.mxu0 %v18697_v18  ;;  %15250 = vmatprep.mubr.msk.f32.mxu0 %vm15765_vm2, %v19530_v40 }
0x1282   :  { %v11120_v37 = vmul.f32 %v15726_v49, %v18665_v35  ;;  %v12194_v13 = vpop.permute.xlu0 %12193  ;;  %15255 = vmatprep.mubr.msk.f32.mxu1 %vm15765_vm2, %v19530_v40  ;;  %15258 = vmatprep.subr.mxu0 %v19530_v40 }
0x1283   :  { %15263 = vmatprep.subr.mxu1 %v19530_v40  ;;  %15256 = vmatmul.mubr.msk.f32.vlgmr.msra.gmra.mrb[170].mxu1 %vm285_vm3, %v11122_v38 }
0x1284   :  { %v15728_v55 = vpop.eup %15727  ;;  %15251 = vmatmul.mubr.msk.f32.vlgmr.msra.gmra.mrb[156].mxu0 %vm285_vm3, %v11120_v37  ;;  %15264 = vmatpush3.msra.mxu1 %v12194_v13 }
0x1285   :  { %v15730_v24 = vpop.eup %15729  ;;  %v11126_v18 = vmul.f32 %v15728_v55, %v18671_v62  ;;  %15259 = vmatpush3.msra.mxu0 %v18699_v4  ;;  %15260 = vmatprep.mubr.msk.f32.mxu0 %vm15765_vm2, %v19530_v40 }
0x1286   :  { %v11124_v35 = vmul.f32 %v15730_v24, %v18673_v45  ;;  %15265 = vmatprep.mubr.msk.f32.mxu1 %vm15765_vm2, %v19530_v40  ;;  %15268 = vmatprep.subr.mxu0 %v19530_v40 }
0x1287   :  { %15266 = vmatmul.mubr.msk.f32.vlgmr.msra.gmra.mrb[172].mxu1 %vm285_vm3, %v11126_v18  ;;  %15381 = vmatprep.subr.msk.bf16.mxu1 %vm15805_vm1, %v15379_v39 }
0x1288   :  { %15261 = vmatmul.mubr.msk.f32.vlgmr.msra.gmra.mrb[158].mxu0 %vm285_vm3, %v11124_v35 }
0x1289   :  { %v15732_v54 = vpop.eup %15731  ;;  %15269 = vmatpush3.msra.mxu0 %v12270_v53  ;;  %15270 = vmatprep.mubr.msk.f32.mxu0 %vm15765_vm2, %v19530_v40 }
0x128a   :  { %v11128_v62 = vmul.f32 %v15732_v54, %v18679_v17 }
0x128b   :  { %15384 = vmatpush3.bf16.xpose.msk.msra.mxu1 %vm15805_vm1, %v15379_v39 }
0x128c   :  { %15271 = vmatmul.mubr.msk.f32.vlgmr.msra.gmra.mrb[160].mxu0 %vm285_vm3, %v11128_v62 }
0x130a   :  { %v11277_v45 = vpop.f32.mrb[146].mxu0 }
0x130b   :  { %12363 = vrot.lane.b32.xlu0 %v11277_v45, %s15771_s14  ;;  %v15202_v4 = vpop.f32.mrb[147].mxu0 }
0x133e   :  { %v11201_v33 = vpop.f32.mrb[158].mxu1 }
0x133f   :  { %v15197_v57 = vpop.f32.mrb[159].mxu1  ;;  %12361 = vrot.lane.b32.xlu1 %v11201_v33, %s15771_s14 }
0x1342   :  { %v11353_v12 = vpop.f32.mrb[160].mxu1 }
0x1343   :  { %12365 = vrot.lane.b32.xlu1 %v11353_v12, %s15771_s14  ;;  %v15207_v44 = vpop.f32.mrb[161].mxu1 }
0x1346   :  { %v11505_v56 = vpop.f32.mrb[162].mxu1 }
0x1347   :  { %v11429_v22 = vpop.f32.mrb[148].mxu0  ;;  %v15217_v16 = vpop.f32.mrb[163].mxu1 }
0x1348   :  { %12367 = vrot.lane.b32.xlu0 %v11429_v22, %s15771_s14  ;;  %v15212_v40 = vpop.f32.mrb[149].mxu0 }
0x134a   :  { %v11657_v17 = vpop.f32.mrb[164].mxu1 }
0x134b   :  { %v11581_v19 = vpop.f32.mrb[150].mxu0  ;;  %v15227_v58 = vpop.f32.mrb[165].mxu1 }
0x134c   :  { %12369 = vrot.lane.b32.xlu0 %v11505_v56, %s15771_s14  ;;  %12371 = vrot.lane.b32.xlu1 %v11581_v19, %s15771_s14  ;;  %v15222_v7 = vpop.f32.mrb[151].mxu0 }
0x134e   :  { %v11809_v21 = vpop.f32.mrb[166].mxu1 }
0x134f   :  { %v11733_v36 = vpop.f32.mrb[152].mxu0  ;;  %v15237_v34 = vpop.f32.mrb[167].mxu1 }
0x1350   :  { %12373 = vrot.lane.b32.xlu1 %v11657_v17, %s15771_s14  ;;  %v15232_v28 = vpop.f32.mrb[153].mxu0 }
0x1352   :  { %v11961_v63 = vpop.f32.mrb[168].mxu1 }
0x1353   :  { %v11885_v48 = vpop.f32.mrb[154].mxu0  ;;  %v15247_v41 = vpop.f32.mrb[169].mxu1 }
0x1354   :  { %12377 = vrot.lane.b32.xlu1 %v11809_v21, %s15771_s14  ;;  %12379 = vrot.lane.b32.xlu0 %v11885_v48, %s15771_s14  ;;  %v15242_v60 = vpop.f32.mrb[155].mxu0 }
0x1356   :  { %v12113_v59 = vpop.f32.mrb[170].mxu1 }
0x1357   :  { %v12037_v5 = vpop.f32.mrb[156].mxu0  ;;  %v15257_v14 = vpop.f32.mrb[171].mxu1 }
0x1358   :  { %12381 = vrot.lane.b32.xlu1 %v11961_v63, %s15771_s14  ;;  %12383 = vrot.lane.b32.xlu0 %v12037_v5, %s15771_s14  ;;  %v15252_v10 = vpop.f32.mrb[157].mxu0 }
0x135a   :  { %v12265_v46 = vpop.f32.mrb[172].mxu1 }
0x135b   :  { %v12189_v42 = vpop.f32.mrb[158].mxu0  ;;  %v15267_v31 = vpop.f32.mrb[173].mxu1 }
0x135c   :  { %12375 = vrot.lane.b32.xlu1 %v11733_v36, %s15771_s14  ;;  %12385 = vrot.lane.b32.xlu0 %v12113_v59, %s15771_s14  ;;  %v15262_v30 = vpop.f32.mrb[159].mxu0 }
0x135f   :  { %v12341_v29 = vpop.f32.mrb[160].mxu0 }
0x1360   :  { %12387 = vrot.lane.b32.xlu0 %v12189_v42, %s15771_s14  ;;  %12391 = vrot.lane.b32.xlu1 %v12341_v29, %s15771_s14  ;;  %v15272_v52 = vpop.f32.mrb[161].mxu0 }
0x1364   :  { %12389 = vrot.lane.b32.xlu0 %v12265_v46, %s15771_s14 }
0x137d   :  { %v12364_v61 = vpop.permute.xlu0 %12363 }
0x137e   :  { %v12410_v49 = vsel %vm285_vm3, %v18485_v2, %v12364_v61 }
0x137f   :  { %v12445_v38 = vrot.slane %v12410_v49, 7 }
0x13b1   :  { %v12362_v37 = vpop.permute.xlu1 %12361 }
0x13b2   :  { %v12409_v13 = vsel %vm285_vm3, %v18463_v43, %v12362_v37 }
0x13b3   :  { %v12447_v55 = vsel %vm12446_vm6, %v12445_v38, %v12409_v13 }
0x13b5   :  { %v12366_v24 = vpop.permute.xlu1 %12365 }
0x13b6   :  { %v12411_v18 = vsel %vm285_vm3, %v18487_v9, %v12366_v24 }
0x13b7   :  { %v12448_v35 = vrot.slane %v12411_v18, 6 }
0x13b9   :  { %v12450_v53 = vsel %vm12449_vm7, %v12448_v35, %v12447_v55 }
0x13ba   :  { %v12368_v54 = vpop.permute.xlu0 %12367 }
0x13bb   :  { %v12412_v2 = vsel %vm285_vm3, %v18489_v50, %v12368_v54  ;;  %v19614_v54 = vld [vmem:[#allocation16_spill] sm:$0xff] }
0x13bc   :  { %v12451_v62 = vrot.slane %v12412_v2, 5 }
0x13be   :  { %v12453_v45 = vsel %vm12452_vm8, %v12451_v62, %v12450_v53  ;;  %v12372_v4 = vpop.permute.xlu1 %12371  ;;  %v12370_v43 = vpop.permute.xlu0 %12369  ;;  %v19615_v62 = vld [vmem:[#allocation17_spill] sm:$0xff] }
0x13bf   :  { %v12414_v33 = vsel %vm285_vm3, %v18493_v3, %v12372_v4  ;;  %v12413_v9 = vsel %vm285_vm3, %v18491_v26, %v12370_v43  ;;  %v19616_v4 = vld [vmem:[#allocation18_spill] sm:$0xff] }
0x13c0   :  { %v12457_v57 = vrot.slane %v12414_v33, 3  ;;  %v12454_v12 = vrot.slane %v12413_v9, 4  ;;  %v19617_v33 = vld [vmem:[#allocation19_spill] sm:$0xff] }
0x13c2   :  { %v12456_v44 = vsel %vm12455_vm9, %v12454_v12, %v12453_v45  ;;  %v12374_v56 = vpop.permute.xlu1 %12373 }
0x13c3   :  { %v12415_v50 = vsel %vm285_vm3, %v18495_v1, %v12374_v56  ;;  %v12459_v22 = vsel %vm12458_vm10, %v12457_v57, %v12456_v44  ;;  %v19618_v57 = vld [vmem:[#allocation20_spill] sm:$0xff] }
0x13c4   :  { %v12460_v16 = vrot.slane %v12415_v50, 2  ;;  %v19619_v50 = vld [vmem:[#allocation21_spill] sm:$0xff] }
0x13c6   :  { %v12378_v40 = vpop.permute.xlu1 %12377  ;;  %v12380_v17 = vpop.permute.xlu0 %12379  ;;  %v12462_v3 = vsel %vm12461_vm11, %v12460_v16, %v12459_v22 }
0x13c7   :  { %v12418_v26 = vsel %vm285_vm3, %v18501_v25, %v12380_v17  ;;  %v12417_v58 = vsel %vm285_vm3, %v18499_v15, %v12378_v40 }
0x13c8   :  { %v12466_v19 = vrot.slane %v12418_v26, 7 }
0x13ca   :  { %v12467_v7 = vsel %vm12446_vm6, %v12466_v19, %v12417_v58  ;;  %v12382_v21 = vpop.permute.xlu1 %12381  ;;  %v12384_v36 = vpop.permute.xlu0 %12383 }
0x13cb   :  { %v12419_v1 = vsel %vm285_vm3, %v18507_v23, %v12382_v21  ;;  %v12420_v34 = vsel %vm285_vm3, %v18503_v6, %v12384_v36 }
0x13cc   :  { %v12468_v28 = vrot.slane %v12419_v1, 6  ;;  %v12470_v63 = vrot.slane %v12420_v34, 5 }
0x13ce   :  { %v12469_v48 = vsel %vm12449_vm7, %v12468_v28, %v12467_v7  ;;  %v12376_v41 = vpop.permute.xlu1 %12375  ;;  %v12386_v25 = vpop.permute.xlu0 %12385 }
0x13cf   :  { %v12471_v51 = vsel %vm12452_vm8, %v12470_v63, %v12469_v48  ;;  %v12416_v15 = vsel %vm285_vm3, %v18497_v11, %v12376_v41  ;;  %v12421_v32 = vsel %vm285_vm3, %v18509_v0, %v12386_v25  ;;  %v19621_v63 = vld [vmem:[#allocation8_spill] sm:$0xff]  ;;  %v19622_v41 = vld [vmem:[#allocation9_spill] sm:$0xff] }
0x13d0   :  { %v12463_v60 = vrot.slane %v12416_v15, 1  ;;  %v12472_v23 = vrot.slane %v12421_v32, 4 }
0x13d2   :  { %v12473_v39 = vsel %vm12455_vm9, %v12472_v23, %v12471_v51  ;;  %v12388_v6 = vpop.permute.xlu0 %12387  ;;  %v12465_v59 = vsel %vm12464_vm12, %v12463_v60, %v12462_v3  ;;  %v12392_v5 = vpop.permute.xlu1 %12391  ;;  %v19620_v3 = vld [vmem:[#allocation22_spill] sm:$0xff]  ;;  %v19624_v23 = vld [vmem:[#allocation12_spill] sm:$0xff] }
0x13d3   :  { %v12422_v14 = vsel %vm285_vm3, %v18505_v20, %v12388_v6  ;;  %15277 = vmatprep.mubr.msk.f32.mxu1 %vm54_vm0, %v12465_v59  ;;  %v12424_v11 = vsel %vm285_vm3, %v18511_v47, %v12392_v5  ;;  %v18856_v20 = vld [vmem:[%s19463_s2 + $0x8] sm:$0xff]  ;;  %v19613_v47 = vld [vmem:[#allocation5_spill] sm:$0xff]  ;;  %v19623_v51 = vld [vmem:[#allocation10_spill] sm:$0xff] }
0x13d4   :  { %v12474_v10 = vrot.slane %v12422_v14, 3  ;;  %v12478_v30 = vrot.slane %v12424_v11, 1  ;;  %v12428_v61 = vrot.slane %v18856_v20, %v19613_v47  ;;  %v19625_v5 = vld [vmem:[#allocation14_spill] sm:$0xff] }
0x13d6   :  { %v12475_v0 = vsel %vm12458_vm10, %v12474_v10, %v12473_v39  ;;  %v12390_v46 = vpop.permute.xlu0 %12389 }
0x13d7   :  { %v12423_v42 = vsel %vm285_vm3, %v18527_v27, %v12390_v46 }
0x13d8   :  { %v12476_v31 = vrot.slane %v12423_v42, 2 }
0x13da   :  { %v12477_v29 = vsel %vm12461_vm11, %v12476_v31, %v12475_v0  ;;  %v19626_v0 = vld [vmem:[#allocation13_spill] sm:$0xff] }
0x13db   :  { %v12479_v52 = vsel %vm12464_vm12, %v12478_v30, %v12477_v29  ;;  %v19627_v29 = vld [vmem:[#allocation11_spill] sm:$0xff] }
0x13dc   :  { %15278 = vmatmul.mubr.msk.f32.vlgmr.msra.gmra.mrb[174].mxu1 %vm54_vm0, %v12479_v52 }
0x14af   :  { %v15279_v49 = vpop.f32.mrb[174].mxu1 }
0x14b0   :  { %v12562_v38 = vadd.f32 %v15279_v49, %v12428_v61  ;;  %v12556_v37 = vpop.f32.mrb[175].mxu1 }
0x14b1   :  { %v12557_v27 = vadd.f32 %v12556_v37, %v12428_v61 }
0x14b2   :  { %v12575_v13 = vrot.slane %v12562_v38, 2  ;;  %v12576_v55 = vrot.slane %v12562_v38, 3  ;;  %v12577_v24 = vrot.slane %v12562_v38, 4  ;;  %v12578_v18 = vrot.slane %v12562_v38, 5 }
0x14b3   :  { %v12579_v35 = vrot.slane %v12562_v38, 6  ;;  %v12580_v53 = vrot.slane %v12562_v38, 7  ;;  %v12568_v44 = vrot.slane %v12557_v27, 2  ;;  %v12569_v56 = vrot.slane %v12557_v27, 3 }
0x14b4   :  { %v18861_v2 = vadd.f32 %v12575_v13, %v19614_v54  ;;  %v18864_v45 = vadd.f32 %v12576_v55, %v19615_v62  ;;  %v18867_v43 = vadd.f32 %v12577_v24, %v19616_v4  ;;  %v18870_v9 = vadd.f32 %v12578_v18, %v19617_v33  ;;  %v19628_v4 = vld [vmem:[#allocation15_spill] sm:$0xff] }
0x14b5   :  { %v18873_v12 = vadd.f32 %v12579_v35, %v19618_v57  ;;  %v18876_v22 = vadd.f32 %v12580_v53, %v19619_v50  ;;  %v18882_v26 = vadd.f32 %v12562_v38, %v19620_v3  ;;  %v12570_v58 = vrot.slane %v12557_v27, 4  ;;  %v19629_v50 = vld [vmem:[#allocation6_spill] sm:$0xff] }
0x14b6   :  { %v12643_v16 = vrot.slane %v18861_v2, 7  ;;  %v12644_v40 = vrot.slane %v18864_v45, 6  ;;  %v12646_v17 = vrot.slane %v18867_v43, 5  ;;  %v12648_v19 = vrot.slane %v18870_v9, 4 }
0x14b7   :  { %v12571_v7 = vrot.slane %v12557_v27, 5  ;;  %v12650_v36 = vrot.slane %v18873_v12, 3  ;;  %v12572_v1 = vrot.slane %v12557_v27, 6  ;;  %v12573_v34 = vrot.slane %v12557_v27, 7 }
0x14b8   :  { %v12645_v21 = vsel %vm12446_vm6, %v12644_v40, %v12643_v16  ;;  %v18889_v48 = vadd.f32 %v12568_v44, %v19621_v63  ;;  %v18892_v25 = vadd.f32 %v12569_v56, %v19622_v41  ;;  %v18895_v15 = vadd.f32 %v12570_v58, %v19623_v51 }
0x14b9   :  { %v12647_v28 = vsel %vm12449_vm7, %v12646_v17, %v12645_v21  ;;  %v12652_v60 = vrot.slane %v18876_v22, 2  ;;  %v18900_v39 = vadd.f32 %v12571_v7, %v19624_v23  ;;  %v12654_v59 = vrot.slane %v18882_v26, 1 }
0x14ba   :  { %v12649_v32 = vsel %vm12452_vm8, %v12648_v19, %v12647_v28  ;;  %v18905_v14 = vadd.f32 %v12572_v1, %v19625_v5  ;;  %v12629_v10 = vrot.slane %v18889_v48, 7  ;;  %v18910_v46 = vadd.f32 %v12573_v34, %v19626_v0 }
0x14bb   :  { %v12651_v6 = vsel %vm12455_vm9, %v12650_v36, %v12649_v32  ;;  %v12630_v42 = vrot.slane %v18892_v25, 6  ;;  %v12632_v31 = vrot.slane %v18895_v15, 5  ;;  %v18916_v52 = vadd.f32 %v12557_v27, %v19627_v29 }
0x14bc   :  { %v12653_v11 = vsel %vm12458_vm10, %v12652_v60, %v12651_v6  ;;  %v12574_v49 = vrot.slane %v12562_v38, 1  ;;  %v12634_v13 = vrot.slane %v18900_v39, 4  ;;  %v12636_v24 = vrot.slane %v18905_v14, 3 }
0x14bd   :  { %v12655_v30 = vsel %vm12461_vm11, %v12654_v59, %v12653_v11  ;;  %v12631_v37 = vsel %vm12446_vm6, %v12630_v42, %v12629_v10  ;;  %v12638_v35 = vrot.slane %v18910_v46, 2  ;;  %v12640_v54 = vrot.slane %v18916_v52, 1 }
0x14be   :  { %v12667_v61 = vsel %vm12666_vm13, %v12655_v30, 0.0  ;;  %v12633_v55 = vsel %vm12449_vm7, %v12632_v31, %v12631_v37  ;;  %v12567_v62 = vrot.slane %v12557_v27, 1  ;;  %v18928_v38 = vadd.f32 %v12574_v49, %v19628_v4 }
0x14bf   :  { %12668 = vadd.xlane.f32.xlu1 %v12667_v61  ;;  %v12635_v18 = vsel %vm12452_vm8, %v12634_v13, %v12633_v55 }
0x14c0   :  { %v12637_v53 = vsel %vm12455_vm9, %v12636_v24, %v12635_v18  ;;  %v18936_v16 = vadd.f32 %v12567_v62, %v19629_v50 }
0x14c1   :  { %v12639_v33 = vsel %vm12458_vm10, %v12638_v35, %v12637_v53 }
0x14c2   :  { %v12641_v57 = vsel %vm12461_vm11, %v12640_v54, %v12639_v33  ;;  %v12660_v27 = vsel %vm12659_vm14, %v18936_v16, 0.0 }
0x14c3   :  { %v12642_v44 = vsel %vm12464_vm12, %v18928_v38, %v12641_v57 }
0x14c4   :  { %v12663_v56 = vsel %vm54_vm0, %v12642_v44, 0.0 }
0x14c5   :  { %12664 = vadd.xlane.f32.xlu0 %v12663_v56 }
0x14c9   :  { %12661 = vadd.xlane.f32.xlu0 %v12660_v27 }
0x154c   :  { %v12669_v40 = vpop.xlane.xlu1 %12668 }
0x154d   :  { %v12672_v17 = vmul.f32 0.0625, %v12669_v40 }
0x154f   :  { %v12683_v3 = vrot.slane %v12672_v17, 1  ;;  %v12684_v19 = vrot.slane %v12672_v17, 2  ;;  %v12685_v58 = vrot.slane %v12672_v17, 3  ;;  %v12686_v7 = vrot.slane %v12672_v17, 4 }
0x1550   :  { %v12687_v21 = vrot.slane %v12672_v17, 5  ;;  %v12688_v36 = vrot.slane %v12672_v17, 6  ;;  %v12689_v1 = vrot.slane %v12672_v17, 7 }
0x1551   :  { %v18941_v34 = vsub.f32 %v18861_v2, %v12683_v3  ;;  %v18944_v28 = vsub.f32 %v18864_v45, %v12684_v19  ;;  %v18947_v63 = vsub.f32 %v18867_v43, %v12685_v58  ;;  %v18950_v41 = vsub.f32 %v18870_v9, %v12686_v7 }
0x1552   :  { %v18953_v51 = vsub.f32 %v18873_v12, %v12687_v21  ;;  %v18956_v32 = vsub.f32 %v18876_v22, %v12688_v36  ;;  %v18959_v60 = vsub.f32 %v18882_v26, %v12689_v1  ;;  %v12665_v2 = vpop.xlane.xlu0 %12664 }
0x1553   :  { %v12731_v45 = vmul.f32 %v18941_v34, %v18941_v34  ;;  %v12732_v43 = vmul.f32 %v18944_v28, %v18944_v28  ;;  %v12733_v9 = vmul.f32 %v18947_v63, %v18947_v63  ;;  %v12734_v12 = vmul.f32 %v18950_v41, %v18950_v41 }
0x1554   :  { %v12671_v23 = vmul.f32 0.0625, %v12665_v2  ;;  %v12735_v22 = vmul.f32 %v18953_v51, %v18953_v51  ;;  %v12736_v26 = vmul.f32 %v18956_v32, %v18956_v32  ;;  %v12737_v10 = vmul.f32 %v18959_v60, %v18959_v60 }
0x1555   :  { %v12768_v6 = vrot.slane %v12731_v45, 7  ;;  %v12769_v59 = vrot.slane %v12732_v43, 6  ;;  %v12771_v5 = vrot.slane %v12733_v9, 5  ;;  %v12773_v11 = vrot.slane %v12734_v12, 4 }
0x1556   :  { %v12775_v0 = vrot.slane %v12735_v22, 3  ;;  %v12676_v42 = vrot.slane %v12671_v23, 1  ;;  %v12677_v30 = vrot.slane %v12671_v23, 2  ;;  %v12678_v29 = vrot.slane %v12671_v23, 3  ;;  %v12662_v50 = vpop.xlane.xlu0 %12661 }
0x1557   :  { %v12770_v31 = vsel %vm12446_vm6, %v12769_v59, %v12768_v6  ;;  %v12679_v61 = vrot.slane %v12671_v23, 4  ;;  %v12777_v37 = vrot.slane %v12736_v26, 2  ;;  %v12680_v13 = vrot.slane %v12671_v23, 5 }
0x1558   :  { %v12772_v49 = vsel %vm12449_vm7, %v12771_v5, %v12770_v31  ;;  %v12681_v55 = vrot.slane %v12671_v23, 6  ;;  %v12682_v18 = vrot.slane %v12671_v23, 7  ;;  %v18979_v35 = vsub.f32 %v18889_v48, %v12676_v42  ;;  %v13940_v31 = vld [vmem:[%s19461_s1 + $0xd0] sm:$0xff] }
0x1559   :  { %v12774_v24 = vsel %vm12452_vm8, %v12773_v11, %v12772_v49  ;;  %v18982_v53 = vsub.f32 %v18892_v25, %v12677_v30  ;;  %v12779_v62 = vrot.slane %v12737_v10, 1  ;;  %v18986_v4 = vsub.f32 %v18895_v15, %v12678_v29  ;;  %v13938_v11 = vld [vmem:[%s19461_s1 + $0xc0] sm:$0xff]  ;;  %v13941_v30 = vld [vmem:[%s19461_s1 + $0xd8] sm:$0xff]  ;;  %v13943_v49 = vld [vmem:[%s19461_s1 + $0xe8] sm:$0xff] }
0x155a   :  { %v12776_v54 = vsel %vm12455_vm9, %v12775_v0, %v12774_v24  ;;  %v18989_v33 = vsub.f32 %v18900_v39, %v12679_v61  ;;  %v18993_v44 = vsub.f32 %v18905_v14, %v12680_v13  ;;  %v18996_v48 = vsub.f32 %v18910_v46, %v12681_v55  ;;  %v13939_v0 = vld [vmem:[%s19461_s1 + $0xc8] sm:$0xff]  ;;  %v13942_v61 = vld [vmem:[%s19461_s1 + $0xe0] sm:$0xff] }
0x155b   :  { %v12778_v57 = vsel %vm12458_vm10, %v12777_v37, %v12776_v54  ;;  %v19000_v56 = vsub.f32 %v18916_v52, %v12682_v18  ;;  %v12723_v15 = vmul.f32 %v18979_v35, %v18979_v35  ;;  %v12724_v39 = vmul.f32 %v18982_v53, %v18982_v53 }
0x155c   :  { %v12780_v25 = vsel %vm12461_vm11, %v12779_v62, %v12778_v57  ;;  %v12725_v14 = vmul.f32 %v18986_v4, %v18986_v4  ;;  %v12726_v46 = vmul.f32 %v18989_v33, %v18989_v33  ;;  %v12727_v52 = vmul.f32 %v18993_v44, %v18993_v44 }
0x155d   :  { %v12790_v27 = vsel %vm12666_vm13, %v12780_v25, 0.0  ;;  %v12754_v40 = vrot.slane %v12723_v15, 7  ;;  %v12728_v17 = vmul.f32 %v18996_v48, %v18996_v48  ;;  %v12755_v3 = vrot.slane %v12724_v39, 6 }
0x155e   :  { %12791 = vadd.xlane.f32.xlu1 %v12790_v27  ;;  %v12757_v19 = vrot.slane %v12725_v14, 5  ;;  %v12670_v58 = vmul.f32 0.0625, %v12662_v50  ;;  %v12729_v7 = vmul.f32 %v19000_v56, %v19000_v56  ;;  %v19018_v21 = vsub.f32 %v18928_v38, %v12671_v23  ;;  %v19630_v14 = vld [vmem:[#allocation3_spill] sm:$0xff] }
0x155f   :  { %v12756_v36 = vsel %vm12446_vm6, %v12755_v3, %v12754_v40  ;;  %v12759_v1 = vrot.slane %v12726_v46, 4  ;;  %v12761_v45 = vrot.slane %v12727_v52, 3  ;;  %v12763_v9 = vrot.slane %v12728_v17, 2 }
0x1560   :  { %v12758_v2 = vsel %vm12449_vm7, %v12757_v19, %v12756_v36  ;;  %v19024_v12 = vsub.f32 %v18936_v16, %v12670_v58  ;;  %v12765_v26 = vrot.slane %v12729_v7, 1  ;;  %v12730_v6 = vmul.f32 %v19018_v21, %v19018_v21 }
0x1561   :  { %v12760_v43 = vsel %vm12452_vm8, %v12759_v1, %v12758_v2  ;;  %v15385_v42 = vpack.c.bf16 %v13939_v0, %v13938_v11  ;;  %v15391_v29 = vpack.c.bf16 %v13941_v30, %v13940_v31  ;;  %v15397_v37 = vpack.c.bf16 %v13943_v49, %v13942_v61 }
0x1562   :  { %v12762_v22 = vsel %vm12455_vm9, %v12761_v45, %v12760_v43  ;;  %v12722_v10 = vmul.f32 %v19024_v12, %v19024_v12  ;;  %v19631_v46 = vsub.s32 4, %v19630_v14  ;;  %v19632_v1 = vsub.s32 5, %v19630_v14 }
0x1563   :  { %v12764_v38 = vsel %vm12458_vm10, %v12763_v9, %v12762_v22  ;;  %15387 = vmatprep.subr.msk.bf16.mxu0 %vm15805_vm1, %v15385_v42  ;;  %15398 = vmatprep.subr.bf16.mxu1 %v15397_v37 }
0x1564   :  { %v12766_v23 = vsel %vm12461_vm11, %v12765_v26, %v12764_v38  ;;  %v12784_v16 = vsel %vm12659_vm14, %v12722_v10, 0.0  ;;  %15390 = vmatpush3.bf16.xpose.msk.msra.mxu0 %vm15805_vm1, %v15385_v42  ;;  %15400 = vmatpush3.bf16.msra.mxu1 %v15397_v37  ;;  %v19065_v52 = vrot.slane %v18856_v20, %v19631_v46  ;;  %v19073_v2 = vrot.slane %v18856_v20, %v19632_v1 }
0x1565   :  { %v12767_v59 = vsel %vm12464_vm12, %v12730_v6, %v12766_v23  ;;  %15393 = vmatprep.subr.msk.bf16.mxu0 %vm15805_vm1, %v15391_v29 }
0x1566   :  { %v12787_v5 = vsel %vm54_vm0, %v12767_v59, 0.0 }
0x1567   :  { %12788 = vadd.xlane.f32.xlu0 %v12787_v5 }
0x156b   :  { %12785 = vadd.xlane.f32.xlu0 %v12784_v16 }
0x156c   :  { %15396 = vmatpush3.bf16.xpose.msk.msra.mxu0 %vm15805_vm1, %v15391_v29 }
0x15eb   :  { %v12792_v13 = vpop.xlane.xlu1 %12791 }
0x15ec   :  { %v12795_v55 = vmul.f32 0.0625, %v12792_v13 }
0x15ee   :  { %v12798_v24 = vadd.f32 1e-05, %v12795_v55 }
0x15f0   :  { %15733 = vrsqrt.f32 %v12798_v24 }
0x15f4   :  { %v12789_v18 = vpop.xlane.xlu0 %12788 }
0x15f5   :  { %v12794_v54 = vmul.f32 0.0625, %v12789_v18 }
0x15f7   :  { %v12797_v62 = vadd.f32 1e-05, %v12794_v54 }
0x15f8   :  { %v12786_v57 = vpop.xlane.xlu0 %12785 }
0x15f9   :  { %15735 = vrsqrt.f32 %v12797_v62  ;;  %v12793_v25 = vmul.f32 0.0625, %v12786_v57 }
0x15fa   :  { %v15734_v8 = vpop.eup %15733 }
0x15fb   :  { %v12796_v15 = vadd.f32 1e-05, %v12793_v25  ;;  %v12812_v39 = vrot.slane %v15734_v8, 1  ;;  %v12813_v50 = vrot.slane %v15734_v8, 2  ;;  %v12814_v27 = vrot.slane %v15734_v8, 3 }
0x15fc   :  { %v12815_v40 = vrot.slane %v15734_v8, 4  ;;  %v12816_v17 = vrot.slane %v15734_v8, 5  ;;  %v12817_v3 = vrot.slane %v15734_v8, 6  ;;  %v12818_v19 = vrot.slane %v15734_v8, 7 }
0x15fd   :  { %15737 = vrsqrt.f32 %v12796_v15  ;;  %v12844_v58 = vmul.f32 %v12812_v39, %v18941_v34  ;;  %v12845_v7 = vmul.f32 %v12813_v50, %v18944_v28  ;;  %v12846_v36 = vmul.f32 %v12814_v27, %v18947_v63 }
0x15fe   :  { %v12847_v45 = vmul.f32 %v12815_v40, %v18950_v41  ;;  %v12848_v43 = vmul.f32 %v12816_v17, %v18953_v51  ;;  %v12849_v22 = vmul.f32 %v12817_v3, %v18956_v32  ;;  %v12850_v26 = vmul.f32 %v12818_v19, %v18959_v60 }
0x15ff   :  { %v12864_v34 = vmul.f32 %v19065_v52, %v12844_v58  ;;  %v12865_v28 = vmul.f32 %v19065_v52, %v12845_v7  ;;  %v12866_v41 = vmul.f32 %v19065_v52, %v12846_v36 }
0x1600   :  { %v12867_v30 = vmul.f32 %v19065_v52, %v12847_v45  ;;  %v12868_v61 = vmul.f32 %v19065_v52, %v12848_v43  ;;  %v12869_v37 = vmul.f32 %v19065_v52, %v12849_v22  ;;  %v12870_v24 = vmul.f32 %v19065_v52, %v12850_v26 }
0x1601   :  { %v19112_v18 = vadd.f32 %v19073_v2, %v12865_v28  ;;  %v19122_v57 = vadd.f32 %v19073_v2, %v12866_v41 }
0x1602   :  { %v19131_v39 = vadd.f32 %v19073_v2, %v12867_v30  ;;  %v12888_v40 = vadd.f32 %v19073_v2, %v12868_v61  ;;  %v12889_v19 = vadd.f32 %v19073_v2, %v12869_v37 }
0x1603   :  { %v15736_v9 = vpop.eup %15735  ;;  %v12928_v45 = vrot.slane %v19112_v18, 5  ;;  %v12930_v26 = vrot.slane %v19122_v57, 4 }
0x1604   :  { %v12805_v6 = vrot.slane %v15736_v9, 1  ;;  %v12806_v63 = vrot.slane %v15736_v9, 2  ;;  %v12807_v38 = vrot.slane %v15736_v9, 3  ;;  %v12808_v23 = vrot.slane %v15736_v9, 4 }
0x1605   :  { %v12809_v59 = vrot.slane %v15736_v9, 5  ;;  %v12810_v5 = vrot.slane %v15736_v9, 6  ;;  %v12843_v10 = vmul.f32 %v15736_v9, %v19018_v21  ;;  %v12811_v0 = vrot.slane %v15736_v9, 7 }
0x1606   :  { %v12836_v51 = vmul.f32 %v12805_v6, %v18979_v35  ;;  %v12837_v32 = vmul.f32 %v12806_v63, %v18982_v53  ;;  %v12838_v60 = vmul.f32 %v12807_v38, %v18986_v4  ;;  %v12839_v16 = vmul.f32 %v12808_v23, %v18989_v33 }
0x1607   :  { %v15738_v11 = vpop.eup %15737  ;;  %v12840_v42 = vmul.f32 %v12809_v59, %v18993_v44  ;;  %v12841_v31 = vmul.f32 %v12810_v5, %v18996_v48  ;;  %v12863_v33 = vmul.f32 %v19065_v52, %v12843_v10  ;;  %v19098_v44 = vadd.f32 %v19073_v2, %v12864_v34 }
0x1608   :  { %v12835_v21 = vmul.f32 %v15738_v11, %v19024_v12  ;;  %v12856_v29 = vmul.f32 %v19065_v52, %v12836_v51  ;;  %v12857_v35 = vmul.f32 %v19065_v52, %v12837_v32  ;;  %v12858_v53 = vmul.f32 %v19065_v52, %v12838_v60 }
0x1609   :  { %v12859_v4 = vmul.f32 %v19065_v52, %v12839_v16  ;;  %v12860_v49 = vmul.f32 %v19065_v52, %v12840_v42  ;;  %v12861_v13 = vmul.f32 %v19065_v52, %v12841_v31  ;;  %v12842_v62 = vmul.f32 %v12811_v0, %v19000_v56  ;;  %v13944_v31 = vld [vmem:[%s19461_s1 + $0xf0] sm:$0xff] }
0x160a   :  { %v12855_v48 = vmul.f32 %v19065_v52, %v12835_v21  ;;  %v19103_v12 = vadd.f32 %v19073_v2, %v12856_v29  ;;  %v19108_v55 = vadd.f32 %v19073_v2, %v12857_v35  ;;  %v19119_v8 = vadd.f32 %v19073_v2, %v12858_v53 }
0x160b   :  { %v19125_v25 = vadd.f32 %v19073_v2, %v12859_v4  ;;  %v19128_v15 = vadd.f32 %v19073_v2, %v12863_v33  ;;  %v12926_v50 = vrot.slane %v19098_v44, 6  ;;  %v19136_v56 = vadd.f32 %v19073_v2, %v12860_v49 }
0x160c   :  { %v19115_v54 = vadd.f32 %v19073_v2, %v12855_v48  ;;  %v12912_v46 = vrot.slane %v19103_v12, 6  ;;  %v19141_v17 = vadd.f32 %v19073_v2, %v12861_v13  ;;  %v12914_v3 = vrot.slane %v19108_v55, 5 }
0x160d   :  { %v12925_v58 = vrot.slane %v19128_v15, 7  ;;  %v12862_v7 = vmul.f32 %v19065_v52, %v12842_v62  ;;  %v12916_v1 = vrot.slane %v19119_v8, 4  ;;  %v12918_v9 = vrot.slane %v19125_v25, 3 }
0x160e   :  { %v12911_v27 = vrot.slane %v19115_v54, 7  ;;  %v12920_v28 = vrot.slane %v19136_v56, 2  ;;  %v12932_v6 = vrot.slane %v19131_v39, 3  ;;  %v12922_v38 = vrot.slane %v19141_v17, 1 }
0x160f   :  { %v12927_v22 = vsel %vm12446_vm6, %v12926_v50, %v12925_v58  ;;  %v12934_v59 = vrot.slane %v12888_v40, 2  ;;  %v19162_v5 = vadd.f32 %v19073_v2, %v12862_v7  ;;  %v12936_v51 = vrot.slane %v12889_v19, 1 }
0x1610   :  { %v12913_v36 = vsel %vm12446_vm6, %v12912_v46, %v12911_v27  ;;  %v12929_v52 = vsel %vm12449_vm7, %v12928_v45, %v12927_v22  ;;  %v12890_v60 = vadd.f32 %v19073_v2, %v12870_v24  ;;  %v13945_v2 = vld [vmem:[%s19461_s1 + $0xf8] sm:$0xff]  ;;  %v19633_v21 = vsub.s32 2, %v19630_v14 }
0x1611   :  { %v12915_v43 = vsel %vm12449_vm7, %v12914_v3, %v12913_v36  ;;  %v12931_v23 = vsel %vm12452_vm8, %v12930_v26, %v12929_v52  ;;  %v15401_v30 = vpack.c.bf16 %v13945_v2, %v13944_v31  ;;  %v19634_v49 = vsub.s32 3, %v19630_v14 }
0x1612   :  { %v12917_v34 = vsel %vm12452_vm8, %v12916_v1, %v12915_v43  ;;  %v12933_v41 = vsel %vm12455_vm9, %v12932_v6, %v12931_v23  ;;  %v12894_v29 = vrot.slane %v18856_v20, %v19633_v21 }
0x1613   :  { %v12919_v63 = vsel %vm12455_vm9, %v12918_v9, %v12917_v34  ;;  %v12935_v16 = vsel %vm12458_vm10, %v12934_v59, %v12933_v41  ;;  %15402 = vmatprep.subr.bf16.mxu1 %v15401_v30  ;;  %v13035_v37 = vrot.slane %v18856_v20, %v19634_v49 }
0x1614   :  { %v12921_v10 = vsel %vm12458_vm10, %v12920_v28, %v12919_v63  ;;  %v12937_v0 = vsel %vm12461_vm11, %v12936_v51, %v12935_v16  ;;  %15404 = vmatpush3.bf16.msra.mxu1 %v15401_v30 }
0x1615   :  { %v12923_v32 = vsel %vm12461_vm11, %v12922_v38, %v12921_v10  ;;  %v12938_v42 = vsel %vm12464_vm12, %v12890_v60, %v12937_v0 }
0x1616   :  { %v12924_v11 = vsel %vm12464_vm12, %v19162_v5, %v12923_v32 }
0x1617   :  { %15288 = vmatprep.mubr.msk.f32.mxu0 %vm54_vm0, %v12924_v11 }
0x1618   :  { %15289 = vmatmul.mubr.msk.f32.vlgmr.msra.gmra.mrb[162].mxu0 %vm54_vm0, %v12938_v42 }
0x16eb   :  { %v15290_v35 = vpop.f32.mrb[162].mxu0 }
0x16ec   :  { %v13027_v53 = vadd.f32 %v15290_v35, %v12894_v29  ;;  %v13021_v4 = vpop.f32.mrb[163].mxu0 }
0x16ed   :  { %v13022_v33 = vadd.f32 %v13021_v4, %v12894_v29 }
0x16ee   :  { %v13031_v48 = vmax.f32 %v13027_v53, 0.0 }
0x16ef   :  { %v13030_v61 = vmax.f32 %v13022_v33, 0.0 }
0x16f1   :  { %15299 = vmatprep.mubr.msk.f32.mxu1 %vm6340_vm4, %v13030_v61 }
0x16f2   :  { %15300 = vmatmul.mubr.msk.f32.vlgmr.msra.gmra.mrb[176].mxu1 %vm6340_vm4, %v13031_v48 }
0x17c5   :  { %v15301_v13 = vpop.f32.mrb[176].mxu1 }
0x17c6   :  { %v13114_v24 = vadd.f32 %v15301_v13, %v13035_v37  ;;  %v13108_v62 = vpop.f32.mrb[177].mxu1 }
0x17c7   :  { %v13109_v50 = vadd.f32 %v13108_v62, %v13035_v37 }
0x17c8   :  { %v13127_v27 = vrot.slane %v13114_v24, 2  ;;  %v13128_v46 = vrot.slane %v13114_v24, 3  ;;  %v13129_v3 = vrot.slane %v13114_v24, 4  ;;  %v13130_v58 = vrot.slane %v13114_v24, 5 }
0x17c9   :  { %v13131_v7 = vrot.slane %v13114_v24, 6  ;;  %v13132_v36 = vrot.slane %v13114_v24, 7  ;;  %v13120_v26 = vrot.slane %v13109_v50, 2  ;;  %v13121_v34 = vrot.slane %v13109_v50, 3 }
0x17ca   :  { %v19190_v1 = vadd.f32 %v13127_v27, %v19098_v44  ;;  %v19193_v45 = vadd.f32 %v13128_v46, %v19112_v18  ;;  %v19196_v43 = vadd.f32 %v13129_v3, %v19122_v57  ;;  %v19199_v9 = vadd.f32 %v13130_v58, %v19131_v39 }
0x17cb   :  { %v19201_v22 = vadd.f32 %v13131_v7, %v12888_v40  ;;  %v19203_v28 = vadd.f32 %v13132_v36, %v12889_v19  ;;  %v13164_v18 = vadd.f32 %v13114_v24, %v12890_v60  ;;  %v13122_v57 = vrot.slane %v13109_v50, 4 }
0x17cc   :  { %v13195_v52 = vrot.slane %v19190_v1, 7  ;;  %v13196_v44 = vrot.slane %v19193_v45, 6  ;;  %v13198_v6 = vrot.slane %v19196_v43, 5  ;;  %v13200_v63 = vrot.slane %v19199_v9, 4 }
0x17cd   :  { %v13123_v38 = vrot.slane %v13109_v50, 5  ;;  %v13202_v40 = vrot.slane %v19201_v22, 3  ;;  %v13124_v23 = vrot.slane %v13109_v50, 6  ;;  %v13125_v59 = vrot.slane %v13109_v50, 7 }
0x17ce   :  { %v13197_v39 = vsel %vm12446_vm6, %v13196_v44, %v13195_v52  ;;  %v19213_v10 = vadd.f32 %v13120_v26, %v19103_v12  ;;  %v19216_v41 = vadd.f32 %v13121_v34, %v19108_v55  ;;  %v19219_v51 = vadd.f32 %v13122_v57, %v19119_v8 }
0x17cf   :  { %v13199_v19 = vsel %vm12449_vm7, %v13198_v6, %v13197_v39  ;;  %v13204_v60 = vrot.slane %v19203_v28, 2  ;;  %v19224_v16 = vadd.f32 %v13123_v38, %v19125_v25  ;;  %v13206_v0 = vrot.slane %v13164_v18, 1 }
0x17d0   :  { %v13201_v32 = vsel %vm12452_vm8, %v13200_v63, %v13199_v19  ;;  %v19228_v42 = vadd.f32 %v13124_v23, %v19136_v56  ;;  %v13181_v12 = vrot.slane %v19213_v10, 7  ;;  %v19233_v8 = vadd.f32 %v13125_v59, %v19141_v17 }
0x17d1   :  { %v13203_v11 = vsel %vm12455_vm9, %v13202_v40, %v13201_v32  ;;  %v13182_v31 = vrot.slane %v19216_v41, 6  ;;  %v13184_v2 = vrot.slane %v19219_v51, 5  ;;  %v19239_v30 = vadd.f32 %v13109_v50, %v19162_v5 }
0x17d2   :  { %v13205_v55 = vsel %vm12458_vm10, %v13204_v60, %v13203_v11  ;;  %v13126_v56 = vrot.slane %v13114_v24, 1  ;;  %v13186_v35 = vrot.slane %v19224_v16, 4  ;;  %v13188_v53 = vrot.slane %v19228_v42, 3 }
0x17d3   :  { %v13207_v25 = vsel %vm12461_vm11, %v13206_v0, %v13205_v55  ;;  %v13183_v29 = vsel %vm12446_vm6, %v13182_v31, %v13181_v12  ;;  %v13190_v33 = vrot.slane %v19233_v8, 2  ;;  %v13192_v5 = vrot.slane %v19239_v30, 1 }
0x17d4   :  { %v13217_v21 = vsel %vm12666_vm13, %v13207_v25, 0.0  ;;  %v13185_v17 = vsel %vm12449_vm7, %v13184_v2, %v13183_v29  ;;  %v13119_v48 = vrot.slane %v13109_v50, 1  ;;  %v19251_v49 = vadd.f32 %v13126_v56, %v19128_v15 }
0x17d5   :  { %13218 = vadd.xlane.f32.xlu0 %v13217_v21  ;;  %v13187_v4 = vsel %vm12452_vm8, %v13186_v35, %v13185_v17 }
0x17d6   :  { %v13189_v61 = vsel %vm12455_vm9, %v13188_v53, %v13187_v4  ;;  %v19259_v27 = vadd.f32 %v13119_v48, %v19115_v54 }
0x17d7   :  { %v13191_v37 = vsel %vm12458_vm10, %v13190_v33, %v13189_v61 }
0x17d8   :  { %v13193_v13 = vsel %vm12461_vm11, %v13192_v5, %v13191_v37  ;;  %v13211_v46 = vsel %vm12659_vm14, %v19259_v27, 0.0 }
0x17d9   :  { %v13194_v24 = vsel %vm12464_vm12, %v19251_v49, %v13193_v13 }
0x17da   :  { %v13214_v62 = vsel %vm54_vm0, %v13194_v24, 0.0 }
0x17db   :  { %13215 = vadd.xlane.f32.xlu1 %v13214_v62 }
0x17df   :  { %13212 = vadd.xlane.f32.xlu1 %v13211_v46 }
0x1862   :  { %v13219_v50 = vpop.xlane.xlu0 %13218 }
0x1863   :  { %v13222_v15 = vmul.f32 0.0625, %v13219_v50 }
0x1865   :  { %v13233_v3 = vrot.slane %v13222_v15, 1  ;;  %v13234_v58 = vrot.slane %v13222_v15, 2  ;;  %v13235_v7 = vrot.slane %v13222_v15, 3  ;;  %v13236_v36 = vrot.slane %v13222_v15, 4 }
0x1866   :  { %v13237_v26 = vrot.slane %v13222_v15, 5  ;;  %v13238_v34 = vrot.slane %v13222_v15, 6  ;;  %v13239_v52 = vrot.slane %v13222_v15, 7 }
0x1867   :  { %v19264_v44 = vsub.f32 %v19190_v1, %v13233_v3  ;;  %v19267_v54 = vsub.f32 %v19193_v45, %v13234_v58  ;;  %v19270_v6 = vsub.f32 %v19196_v43, %v13235_v7  ;;  %v19273_v63 = vsub.f32 %v19199_v9, %v13236_v36 }
0x1868   :  { %v19276_v57 = vsub.f32 %v19201_v22, %v13237_v26  ;;  %v19279_v38 = vsub.f32 %v19203_v28, %v13238_v34  ;;  %v19281_v39 = vsub.f32 %v13164_v18, %v13239_v52  ;;  %v13216_v40 = vpop.xlane.xlu1 %13215 }
0x1869   :  { %v13281_v1 = vmul.f32 %v19264_v44, %v19264_v44  ;;  %v13282_v45 = vmul.f32 %v19267_v54, %v19267_v54  ;;  %v13283_v43 = vmul.f32 %v19270_v6, %v19270_v6  ;;  %v13284_v9 = vmul.f32 %v19273_v63, %v19273_v63 }
0x186a   :  { %v13221_v22 = vmul.f32 0.0625, %v13216_v40  ;;  %v13285_v28 = vmul.f32 %v19276_v57, %v19276_v57  ;;  %v13286_v18 = vmul.f32 %v19279_v38, %v19279_v38  ;;  %v13287_v32 = vmul.f32 %v19281_v39, %v19281_v39 }
0x186b   :  { %v13318_v23 = vrot.slane %v13281_v1, 7  ;;  %v13319_v59 = vrot.slane %v13282_v45, 6  ;;  %v13321_v19 = vrot.slane %v13283_v43, 5  ;;  %v13323_v60 = vrot.slane %v13284_v9, 4 }
0x186c   :  { %v13325_v11 = vrot.slane %v13285_v28, 3  ;;  %v13226_v0 = vrot.slane %v13221_v22, 1  ;;  %v13227_v55 = vrot.slane %v13221_v22, 2  ;;  %v13228_v31 = vrot.slane %v13221_v22, 3  ;;  %v13213_v62 = vpop.xlane.xlu1 %13212 }
0x186d   :  { %v13320_v12 = vsel %vm12446_vm6, %v13319_v59, %v13318_v23  ;;  %v13229_v2 = vrot.slane %v13221_v22, 4  ;;  %v13327_v21 = vrot.slane %v13286_v18, 2  ;;  %v13230_v56 = vrot.slane %v13221_v22, 5 }
0x186e   :  { %v13322_v25 = vsel %vm12449_vm7, %v13321_v19, %v13320_v12  ;;  %v13231_v29 = vrot.slane %v13221_v22, 6  ;;  %v13232_v17 = vrot.slane %v13221_v22, 7  ;;  %v19301_v53 = vsub.f32 %v19213_v10, %v13226_v0 }
0x186f   :  { %v13324_v35 = vsel %vm12452_vm8, %v13323_v60, %v13322_v25  ;;  %v19304_v4 = vsub.f32 %v19216_v41, %v13227_v55  ;;  %v13329_v61 = vrot.slane %v13287_v32, 1  ;;  %v19308_v5 = vsub.f32 %v19219_v51, %v13228_v31  ;;  %v13441_v60 = vld [vmem:[%s19464_s3] sm:$0xff] }
0x1870   :  { %v13326_v33 = vsel %vm12455_vm9, %v13325_v11, %v13324_v35  ;;  %v19311_v48 = vsub.f32 %v19224_v16, %v13229_v2  ;;  %v19315_v13 = vsub.f32 %v19228_v42, %v13230_v56  ;;  %v19318_v10 = vsub.f32 %v19233_v8, %v13231_v29  ;;  %15302 = vmatprep.subr.msk.mxu1 %vm54_vm0, %v13441_v60  ;;  %v19366_v11 = vld [vmem:[%s19464_s3 + $0x8] sm:$0xff] }
0x1871   :  { %v13328_v37 = vsel %vm12458_vm10, %v13327_v21, %v13326_v33  ;;  %v19322_v24 = vsub.f32 %v19239_v30, %v13232_v17  ;;  %v13273_v51 = vmul.f32 %v19301_v53, %v19301_v53  ;;  %v13274_v16 = vmul.f32 %v19304_v4, %v19304_v4  ;;  %15303 = vmatpush3.xpose.msk.msra.mxu1 %vm54_vm0, %v13441_v60 }
0x1872   :  { %v13330_v41 = vsel %vm12461_vm11, %v13329_v61, %v13328_v37  ;;  %v13275_v42 = vmul.f32 %v19308_v5, %v19308_v5  ;;  %v13276_v8 = vmul.f32 %v19311_v48, %v19311_v48  ;;  %v13277_v30 = vmul.f32 %v19315_v13, %v19315_v13  ;;  %15307 = vmatprep.subr.msk.mxu0 %vm285_vm3, %v19366_v11 }
0x1873   :  { %v13340_v46 = vsel %vm12666_vm13, %v13330_v41, 0.0  ;;  %v13304_v50 = vrot.slane %v13273_v51, 7  ;;  %v13278_v15 = vmul.f32 %v19318_v10, %v19318_v10  ;;  %v13305_v3 = vrot.slane %v13274_v16, 6  ;;  %15308 = vmatpush3.xpose.msk.msra.mxu0 %vm285_vm3, %v19366_v11 }
0x1874   :  { %13341 = vadd.xlane.f32.xlu1 %v13340_v46  ;;  %v13307_v58 = vrot.slane %v13275_v42, 5  ;;  %v13220_v7 = vmul.f32 0.0625, %v13213_v62  ;;  %v13279_v36 = vmul.f32 %v19322_v24, %v19322_v24  ;;  %v19340_v26 = vsub.f32 %v19251_v49, %v13221_v22 }
0x1875   :  { %v13306_v34 = vsel %vm12446_vm6, %v13305_v3, %v13304_v50  ;;  %v13309_v52 = vrot.slane %v13276_v8, 4  ;;  %v13311_v1 = vrot.slane %v13277_v30, 3  ;;  %v13313_v43 = vrot.slane %v13278_v15, 2  ;;  %v19636_v50 = vld [vmem:[#allocation7_spill] sm:$0xff] }
0x1876   :  { %v13308_v40 = vsel %vm12449_vm7, %v13307_v58, %v13306_v34  ;;  %v19346_v9 = vsub.f32 %v19259_v27, %v13220_v7  ;;  %v13315_v18 = vrot.slane %v13279_v36, 1  ;;  %v13280_v23 = vmul.f32 %v19340_v26, %v19340_v26 }
0x1877   :  { %v13310_v45 = vsel %vm12452_vm8, %v13309_v52, %v13308_v40  ;;  %v19635_v37 = vsub.s32 6, %v19630_v14  ;;  %v19382_v15 = vrot.slane %v18856_v20, %v19636_v50 }
0x1878   :  { %v13312_v28 = vsel %vm12455_vm9, %v13311_v1, %v13310_v45  ;;  %v13272_v32 = vmul.f32 %v19346_v9, %v19346_v9 }
0x1879   :  { %v13314_v49 = vsel %vm12458_vm10, %v13313_v43, %v13312_v28  ;;  %v19375_v41 = vrot.slane %v18856_v20, %v19635_v37 }
0x187a   :  { %v13316_v22 = vsel %vm12461_vm11, %v13315_v18, %v13314_v49  ;;  %v13334_v27 = vsel %vm12659_vm14, %v13272_v32, 0.0 }
0x187b   :  { %v13317_v59 = vsel %vm12464_vm12, %v13280_v23, %v13316_v22 }
0x187c   :  { %v13337_v19 = vsel %vm54_vm0, %v13317_v59, 0.0 }
0x187d   :  { %13338 = vadd.xlane.f32.xlu0 %v13337_v19 }
0x1881   :  { %13335 = vadd.xlane.f32.xlu0 %v13334_v27 }
0x1901   :  { %v13342_v0 = vpop.xlane.xlu1 %13341 }
0x1902   :  { %v13345_v12 = vmul.f32 0.0625, %v13342_v0 }
0x1904   :  { %v13348_v55 = vadd.f32 1e-05, %v13345_v12 }
0x1906   :  { %15739 = vrsqrt.f32 %v13348_v55 }
0x190a   :  { %v13339_v31 = vpop.xlane.xlu0 %13338 }
0x190b   :  { %v13344_v2 = vmul.f32 0.0625, %v13339_v31 }
0x190d   :  { %v13347_v25 = vadd.f32 1e-05, %v13344_v2 }
0x190e   :  { %v13336_v56 = vpop.xlane.xlu0 %13335 }
0x190f   :  { %15741 = vrsqrt.f32 %v13347_v25  ;;  %v13343_v29 = vmul.f32 0.0625, %v13336_v56 }
0x1910   :  { %v15740_v21 = vpop.eup %15739 }
0x1911   :  { %v13346_v35 = vadd.f32 1e-05, %v13343_v29  ;;  %v13362_v17 = vrot.slane %v15740_v21, 1  ;;  %v13363_v33 = vrot.slane %v15740_v21, 2  ;;  %v13364_v61 = vrot.slane %v15740_v21, 3 }
0x1912   :  { %v13365_v51 = vrot.slane %v15740_v21, 4  ;;  %v13366_v16 = vrot.slane %v15740_v21, 5  ;;  %v13367_v62 = vrot.slane %v15740_v21, 6  ;;  %v13368_v46 = vrot.slane %v15740_v21, 7 }
0x1913   :  { %15743 = vrsqrt.f32 %v13346_v35  ;;  %v13394_v42 = vmul.f32 %v13362_v17, %v19264_v44  ;;  %v13395_v8 = vmul.f32 %v13363_v33, %v19267_v54  ;;  %v13396_v30 = vmul.f32 %v13364_v61, %v19270_v6 }
0x1914   :  { %v13397_v3 = vmul.f32 %v13365_v51, %v19273_v63  ;;  %v13398_v14 = vmul.f32 %v13366_v16, %v19276_v57  ;;  %v13399_v7 = vmul.f32 %v13367_v62, %v19279_v38  ;;  %v13400_v36 = vmul.f32 %v13368_v46, %v19281_v39 }
0x1915   :  { %v13414_v34 = vmul.f32 %v19375_v41, %v13394_v42  ;;  %v13415_v44 = vmul.f32 %v19375_v41, %v13395_v8  ;;  %v13416_v63 = vmul.f32 %v19375_v41, %v13396_v30 }
0x1916   :  { %v13417_v22 = vmul.f32 %v19375_v41, %v13397_v3  ;;  %v13418_v19 = vmul.f32 %v19375_v41, %v13398_v14  ;;  %v13419_v27 = vmul.f32 %v19375_v41, %v13399_v7  ;;  %v13420_v12 = vmul.f32 %v19375_v41, %v13400_v36 }
0x1917   :  { %v13435_v55 = vadd.f32 %v19382_v15, %v13415_v44  ;;  %v13436_v21 = vadd.f32 %v19382_v15, %v13416_v63 }
0x1918   :  { %v13437_v35 = vadd.f32 %v19382_v15, %v13417_v22  ;;  %v13438_v51 = vadd.f32 %v19382_v15, %v13418_v19  ;;  %v13439_v62 = vadd.f32 %v19382_v15, %v13419_v27 }
0x1919   :  { %v15742_v58 = vpop.eup %15741  ;;  %v13481_v3 = vrot.slane %v13435_v55, 5  ;;  %v13483_v36 = vrot.slane %v13436_v21, 4 }
0x191a   :  { %v13355_v54 = vrot.slane %v15742_v58, 1  ;;  %v13356_v52 = vrot.slane %v15742_v58, 2  ;;  %v13357_v6 = vrot.slane %v15742_v58, 3  ;;  %v13358_v40 = vrot.slane %v15742_v58, 4 }
0x191b   :  { %v13359_v1 = vrot.slane %v15742_v58, 5  ;;  %v13360_v20 = vrot.slane %v15742_v58, 6  ;;  %v13393_v45 = vmul.f32 %v15742_v58, %v19340_v26  ;;  %v13361_v18 = vrot.slane %v15742_v58, 7 }
0x191c   :  { %v13386_v57 = vmul.f32 %v13355_v54, %v19301_v53  ;;  %v13387_v38 = vmul.f32 %v13356_v52, %v19304_v4  ;;  %v13388_v39 = vmul.f32 %v13357_v6, %v19308_v5  ;;  %v13389_v43 = vmul.f32 %v13358_v40, %v19311_v48 }
0x191d   :  { %v15744_v28 = vpop.eup %15743  ;;  %v13390_v23 = vmul.f32 %v13359_v1, %v19315_v13  ;;  %v13391_v49 = vmul.f32 %v13360_v20, %v19318_v10  ;;  %v13413_v48 = vmul.f32 %v19375_v41, %v13393_v45  ;;  %v13434_v13 = vadd.f32 %v19382_v15, %v13414_v34 }
0x191e   :  { %v13385_v26 = vmul.f32 %v15744_v28, %v19346_v9  ;;  %v13406_v59 = vmul.f32 %v19375_v41, %v13386_v57  ;;  %v13407_v53 = vmul.f32 %v19375_v41, %v13387_v38  ;;  %v13408_v4 = vmul.f32 %v19375_v41, %v13388_v39 }
0x191f   :  { %v13409_v5 = vmul.f32 %v19375_v41, %v13389_v43  ;;  %v13410_v32 = vmul.f32 %v19375_v41, %v13390_v23  ;;  %v13411_v60 = vmul.f32 %v19375_v41, %v13391_v49  ;;  %v13392_v2 = vmul.f32 %v13361_v18, %v19322_v24 }
0x1920   :  { %v13405_v10 = vmul.f32 %v19375_v41, %v13385_v26  ;;  %v13426_v9 = vadd.f32 %v19382_v15, %v13406_v59  ;;  %v13427_v0 = vadd.f32 %v19382_v15, %v13407_v53  ;;  %v13428_v25 = vadd.f32 %v19382_v15, %v13408_v4  ;;  %v13443_v4 = vld [vmem:[%s19464_s3 + $0x10] sm:$0x3] }
0x1921   :  { %v13429_v56 = vadd.f32 %v19382_v15, %v13409_v5  ;;  %v13433_v29 = vadd.f32 %v19382_v15, %v13413_v48  ;;  %v13479_v17 = vrot.slane %v13434_v13, 6  ;;  %v13430_v61 = vadd.f32 %v19382_v15, %v13410_v32  ;;  %v19637_v5 = vld [vmem:[#allocation4_spill] sm:$0xff] }
0x1922   :  { %v13425_v31 = vadd.f32 %v19382_v15, %v13405_v10  ;;  %v13465_v37 = vrot.slane %v13426_v9, 6  ;;  %v13431_v16 = vadd.f32 %v19382_v15, %v13411_v60  ;;  %v13467_v24 = vrot.slane %v13427_v0, 5 }
0x1923   :  { %v13478_v46 = vrot.slane %v13433_v29, 7  ;;  %v13412_v42 = vmul.f32 %v19375_v41, %v13392_v2  ;;  %v13469_v30 = vrot.slane %v13428_v25, 4  ;;  %v13471_v58 = vrot.slane %v13429_v56, 3 }
0x1924   :  { %v13464_v33 = vrot.slane %v13425_v31, 7  ;;  %v13473_v44 = vrot.slane %v13430_v61, 2  ;;  %v13485_v52 = vrot.slane %v13437_v35, 3  ;;  %v13475_v40 = vrot.slane %v13431_v16, 1 }
0x1925   :  { %v13480_v7 = vsel %vm12446_vm6, %v13479_v17, %v13478_v46  ;;  %v13487_v1 = vrot.slane %v13438_v51, 2  ;;  %v13432_v20 = vadd.f32 %v19382_v15, %v13412_v42  ;;  %v13489_v57 = vrot.slane %v13439_v62, 1 }
0x1926   :  { %v13466_v8 = vsel %vm12446_vm6, %v13465_v37, %v13464_v33  ;;  %v13482_v54 = vsel %vm12449_vm7, %v13481_v3, %v13480_v7  ;;  %v13440_v39 = vadd.f32 %v19382_v15, %v13420_v12  ;;  %v13447_v49 = vrot.slane %v19366_v11, %v19636_v50 }
0x1927   :  { %v13468_v14 = vsel %vm12449_vm7, %v13467_v24, %v13466_v8  ;;  %v13484_v41 = vsel %vm12452_vm8, %v13483_v36, %v13482_v54  ;;  %v13666_v15 = vrot.slane %v19366_v11, 5  ;;  %v13577_v48 = vrot.slane %v13443_v4, %v19637_v5 }
0x1928   :  { %v13470_v34 = vsel %vm12452_vm8, %v13469_v30, %v13468_v14  ;;  %v13486_v63 = vsel %vm12455_vm9, %v13485_v52, %v13484_v41  ;;  %v13665_v32 = vrot.slane %v13443_v4, %v19613_v47 }
0x1929   :  { %v13472_v6 = vsel %vm12455_vm9, %v13471_v58, %v13470_v34  ;;  %v13488_v43 = vsel %vm12458_vm10, %v13487_v1, %v13486_v63  ;;  %15312 = vmatprep.subr.msk.mxu1 %vm13667_vm15, %v13666_v15 }
0x192a   :  { %v13474_v45 = vsel %vm12458_vm10, %v13473_v44, %v13472_v6  ;;  %v13490_v18 = vsel %vm12461_vm11, %v13489_v57, %v13488_v43 }
0x192b   :  { %v13476_v38 = vsel %vm12461_vm11, %v13475_v40, %v13474_v45  ;;  %v13491_v23 = vsel %vm12464_vm12, %v13440_v39, %v13490_v18 }
0x192c   :  { %v13477_v28 = vsel %vm12464_vm12, %v13432_v20, %v13476_v38 }
0x192d   :  { %15304 = vmatprep.mubr.msk.f32.mxu1 %vm54_vm0, %v13477_v28 }
0x192e   :  { %15305 = vmatmul.mubr.msk.f32.vlgmr.msra.gmra.mrb[178].mxu1 %vm54_vm0, %v13491_v23  ;;  %vm13751_vm0 = vcmask 15360  }
0x192f   :  { %15313 = vmatpush3.xpose.msk.msra.mxu1 %vm13667_vm15, %v13666_v15 }
0x1a01   :  { %v15306_v22 = vpop.f32.mrb[178].mxu1 }
0x1a02   :  { %v13565_v26 = vpop.f32.mrb[179].mxu1  ;;  %v13571_v53 = vadd.f32 %v15306_v22, %v13447_v49 }
0x1a03   :  { %v13566_v59 = vadd.f32 %v13565_v26, %v13447_v49 }
0x1a05   :  { %15309 = vmatprep.mubr.msk.f32.mxu0 %vm285_vm3, %v13566_v59 }
0x1a06   :  { %15310 = vmatmul.mubr.msk.f32.vlgmr.msra.gmra.mrb[164].mxu0 %vm285_vm3, %v13571_v53 }
0x1ad9   :  { %v15311_v50 = vpop.f32.mrb[164].mxu0 }
0x1ada   :  { %v13653_v19 = vpop.f32.mrb[165].mxu0  ;;  %v13659_v10 = vadd.f32 %v15311_v50, %v13577_v48 }
0x1adb   :  { %v13654_v13 = vadd.f32 %v13653_v19, %v13577_v48 }
0x1add   :  { %15314 = vmatprep.mubr.msk.f32.mxu1 %vm13667_vm15, %v13654_v13 }
0x1ade   :  { %15315 = vmatmul.mubr.msk.f32.vlgmr.msra.gmra.mrb[180].mxu1 %vm13667_vm15, %v13659_v10 }
0x1bb1   :  { %v15316_v9 = vpop.f32.mrb[180].mxu1 }
0x1bb2   :  { %v13748_v11 = vadd.f32 %v15316_v9, %v13665_v32  ;;  %v13742_v27 = vpop.f32.mrb[181].mxu1 }
0x1bb3   :  { %v13743_v60 = vadd.f32 %v13742_v27, %v13665_v32 }
0x1bb4   :  { %13753 = vst.msk [vmem:[%s19465_s4 + $0x8] sm:$0xff] %vm13751_vm0, %v13748_v11 }
0x1bb5   :  { %13752 = vst.msk [vmem:[%s19465_s4] sm:$0xff] %vm13751_vm0, %v13743_v60 }

</bundles_post_ra>
